<compile_context>
chip_gen: v5e
topology: v5e:2x2
jax: 0.10.0
libtpu: 0.0.40
codegen_flags: <defaults>
</compile_context>

<pallas_src>
import math
from functools import partial

import numpy as np
import jax
import jax.numpy as jnp
from jax import lax
from jax.experimental import pallas as pl
from jax.experimental.pallas import tpu as pltpu

FP = 128           # lane-aligned padded feature width for every slab / weight
ROW = 32           # row (sublane) rounding so int8 (32,128) packed tiles stay aligned
NEG = -1e30        # logit value for missing edges


# ----------------------------- small helpers -------------------------------

def _roundup(n, m):
    return ((n + m - 1) // m) * m


def _vmem():
    return pl.BlockSpec(memory_space=pltpu.MemorySpace.VMEM)


def _smem():
    return pl.BlockSpec(memory_space=pltpu.MemorySpace.SMEM)


def _pad2(w, rows, cols):
    return jnp.pad(w, ((0, rows - w.shape[0]), (0, cols - w.shape[1])))


def _pad1(v, n):
    return jnp.pad(v, (0, n - v.shape[0]))


def _gelu_tanh(x):
    # tanh-approximate GELU (EUP tanh). ~1e-3 max abs error vs torch's default exact-erf gelu.
    c = 0.7978845608028654
    return 0.5 * x * (1.0 + jnp.tanh(c * (x + 0.044715 * x * x * x)))


# ----------------------------- fused Pallas kernel --------------------------

def _hgt_fused_kernel(meta,
                      x_ref, mask_ref,
                      wkqv1, bkqv1, wkv1, wout1, bout1, skip1,
                      wkqv2, bkqv2, wkv2, wout2, bout2, skip2,
                      wdec_ref, bdec_ref,
                      o_ref, kvq_s, ks_s, vs_s, h_s):
    """conv1 -> conv2 -> decoder, fully fused, single program (heads=1 HGTConv semantics)."""

    ns_real, ns_pad = meta['ns_real'], meta['ns_pad']
    if ns_pad > ns_real:
        # zero-init padded source rows of K/V scratch once (exp(NEG)=0 * NaN would be NaN)
        pad = ns_pad - ns_real
        zpad = jnp.zeros((pad, FP), jnp.bfloat16)
        ks_s[pl.ds(ns_real, pad), :] = zpad
        vs_s[pl.ds(ns_real, pad), :] = zpad

    def conv_layer(lmeta, wkqv_ref, bkqv_ref, wkv_ref, wout_ref, bout_ref, skip_ref,
                   read_x, finalize):
        # 1) per-node-type fused kqv projection, stored column-reordered [K|V|Q] as bf16.
        #    Unused thirds are skipped statically (src-only types need K/V, dst-only need Q).
        for ti, r0, rn, is_src, is_dst in lmeta['node_segs']:
            if not (is_src or is_dst):
                continue
            xb = read_x(r0, rn).astype(jnp.bfloat16)
            w = wkqv_ref[ti]                      # (FP, 3*FP) bf16
            b = bkqv_ref[ti]                      # (1, 3*FP) f32
            if is_src and is_dst:
                kvq = jnp.dot(xb, w, preferred_element_type=jnp.float32) + b
                kvq_s[pl.ds(r0, rn), :] = kvq.astype(jnp.bfloat16)
            elif is_src:
                kv = jnp.dot(xb, w[:, :2 * FP],
                             preferred_element_type=jnp.float32) + b[:, :2 * FP]
                kvq_s[pl.ds(r0, rn), pl.ds(0, 2 * FP)] = kv.astype(jnp.bfloat16)
            else:  # dst only
                q = jnp.dot(xb, w[:, 2 * FP:],
                            preferred_element_type=jnp.float32) + b[:, 2 * FP:]
                kvq_s[pl.ds(r0, rn), pl.ds(2 * FP, FP)] = q.astype(jnp.bfloat16)

        # 2) per-edge-type relation projection: one block-diag (2FP x 2FP) bf16 matmul per
        #    edge type, reading the contiguous [K|V] slice and writing straight into the
        #    concatenated source-axis K/V slabs. p_rel and 1/sqrt(F) already folded into W_k.
        for ei, s0, sn, r0s in lmeta['edge_segs']:
            kv_src = kvq_s[pl.ds(r0s, sn), pl.ds(0, 2 * FP)]       # bf16 (sn, 2*FP)
            kv = jnp.dot(kv_src, wkv_ref[ei], preferred_element_type=jnp.float32)
            ks_s[pl.ds(s0, sn), :] = kv[:, :FP].astype(jnp.bfloat16)
            vs_s[pl.ds(s0, sn), :] = kv[:, FP:].astype(jnp.bfloat16)

        # 3) per-destination-type masked softmax attention + gelu + out Linear + sigmoid skip
        for ti, r0, rn, is_src, is_dst, use_skip in lmeta['out_segs']:
            if not is_dst:
                # node type is never a destination -> PyG produces no output for it
                finalize(ti, r0, rn, None)
                continue
            q = kvq_s[pl.ds(r0, rn), pl.ds(2 * FP, FP)]            # bf16 (rn, FP)
            ks = ks_s[...]                                         # bf16 (NS_pad, FP)
            vs = vs_s[...]
            s = lax.dot_general(q, ks, (((1,), (1,)), ((), ())),
                                preferred_element_type=jnp.float32)
            m = mask_ref[pl.ds(r0, rn), :].astype(jnp.float32)     # int8 -> f32, single pass
            s = jnp.where(m > 0.0, s, NEG)
            mx = jnp.max(s, axis=-1, keepdims=True)
            p = jnp.exp(s - mx)
            denom = jnp.sum(p, axis=-1, keepdims=True)
            # rows with no incoming edge (incl. padded rows) have mx == NEG -> zero output
            has_edge = jnp.where(mx > 0.5 * NEG, 1.0, 0.0)
            agg = lax.dot_general(p.astype(jnp.bfloat16), vs, (((1,), (0,)), ((), ())),
                                  preferred_element_type=jnp.float32)
            agg = agg * (pl.reciprocal(denom, approx=True) * has_edge)

            a = jnp.dot(_gelu_tanh(agg).astype(jnp.bfloat16), wout_ref[ti],
                        preferred_element_type=jnp.float32) + bout_ref[ti]
            if use_skip:                                           # static: only when dims match
                al = skip_ref[ti]                                  # sigmoid(skip) scalar (SMEM)
                a = al * a + (1.0 - al) * read_x(r0, rn)
            finalize(ti, r0, rn, a)

    # ----- layer 1: x_ref -> h_s (VMEM scratch, f32) -----
    def read_x1(r0, rn):
        return x_ref[pl.ds(r0, rn), :]

    def fin1(ti, r0, rn, a):
        if a is None:
            h_s[pl.ds(r0, rn), :] = jnp.zeros((rn, FP), jnp.float32)
        else:
            h_s[pl.ds(r0, rn), :] = a

    conv_layer(meta['l1'], wkqv1, bkqv1, wkv1, wout1, bout1, skip1, read_x1, fin1)

    # ----- layer 2 + fused decoder: h_s -> o_ref -----
    def read_x2(r0, rn):
        return h_s[pl.ds(r0, rn), :]

    def fin2(ti, r0, rn, a):
        if a is None:
            o_ref[pl.ds(r0, rn), :] = jnp.zeros((rn, FP), jnp.float32)
        else:
            o_ref[pl.ds(r0, rn), :] = (
                jnp.dot(a.astype(jnp.bfloat16), wdec_ref[ti],
                        preferred_element_type=jnp.float32) + bdec_ref[ti])

    conv_layer(meta['l2'], wkqv2, bkqv2, wkv2, wout2, bout2, skip2, read_x2, fin2)


# ----------------------------- pallas_call wrapper --------------------------

def hgt_forward_fused(graph, c1p, c2p, decp, x_slab):
    meta = dict(l1=c1p['meta'], l2=c2p['meta'],
                ns_real=graph['NS'], ns_pad=graph['NS_pad'])
    kern = partial(_hgt_fused_kernel, meta)

    operands = (x_slab, graph['mask'],
                c1p['wkqv'], c1p['bkqv'], c1p['wkv'], c1p['wout'], c1p['bout'], c1p['skip'],
                c2p['wkqv'], c2p['bkqv'], c2p['wkv'], c2p['wout'], c2p['bout'], c2p['skip'],
                decp['w'], decp['b'])
    smem_idx = (7, 13)                                    # the two sigmoid(skip) scalar stacks
    in_specs = [_smem() if i in smem_idx else _vmem() for i in range(len(operands))]

    NP, NSP = graph['NP'], graph['NS_pad']
    scratch = [pltpu.VMEM((NP, 3 * FP), jnp.bfloat16),    # [K|V|Q] per node (reused per layer)
               pltpu.VMEM((NSP, FP), jnp.bfloat16),       # concat K over source axis
               pltpu.VMEM((NSP, FP), jnp.bfloat16),       # concat V over source axis
               pltpu.VMEM((NP, FP), jnp.float32)]         # conv1 output / conv2 input

    # explicit VMEM budget (v5e default scoped limit is 16 MiB; v7x physical VMEM is 64 MiB)
    op_bytes = sum(int(np.prod(o.shape)) * o.dtype.itemsize for o in operands)
    scr_bytes = NP * 3 * FP * 2 + 2 * NSP * FP * 2 + NP * FP * 4
    out_bytes = NP * FP * 4
    vmem_limit = int(min(64 << 20, max(8 << 20, 2 * (op_bytes + out_bytes) + scr_bytes + (2 << 20))))

    return pl.pallas_call(
        kern,
        out_shape=jax.ShapeDtypeStruct((NP, FP), jnp.float32),
        in_specs=in_specs,
        out_specs=_vmem(),
        scratch_shapes=scratch,
        compiler_params=pltpu.CompilerParams(vmem_limit_bytes=vmem_limit),
    )(*operands)


# ----------------------------- graph / parameter prep ----------------------

def build_graph(node_types, node_counts, edge_index_dict):
    row_off, row_len, cum = {}, {}, 0
    for t in node_types:
        row_off[t] = cum
        row_len[t] = _roundup(node_counts[t], ROW)
        cum += row_len[t]
    NP = cum

    edge_types = list(edge_index_dict.keys())
    src_off, cum = {}, 0
    for et in edge_types:
        src_off[et] = cum
        cum += row_len[et[0]]
    NS = cum
    NS_pad = _roundup(max(NS, 1), 128)       # lane-dense logits / MXU-aligned p@V contraction

    # compact int8 edge mask: 1 where an edge exists, 0 elsewhere (expanded in-kernel)
    mask = np.zeros((NP, NS_pad), np.int8)
    for et, ei in edge_index_dict.items():
        ei = np.asarray(ei)
        mask[ei[1] + row_off[et[-1]], ei[0] + src_off[et]] = 1

    return dict(node_types=list(node_types), edge_types=edge_types,
                row_off=row_off, row_len=row_len, NP=NP,
                src_off=src_off, NS=NS, NS_pad=NS_pad,
                mask=jnp.asarray(mask),
                src_types={et[0] for et in edge_types},
                dst_types={et[-1] for et in edge_types})


def init_hgt_conv(key, in_dims, out_channels, node_types, edge_types):
    p = {'kqv_w': {}, 'kqv_b': {}, 'out_w': {}, 'out_b': {},
         'k_rel': {}, 'v_rel': {}, 'p_rel': {}, 'skip': {}}
    for t in node_types:
        key, k1, k2 = jax.random.split(key, 3)
        p['kqv_w'][t] = (0.1 * jax.random.normal(k1, (in_dims[t], 3 * out_channels))).astype(jnp.float32)
        p['kqv_b'][t] = jnp.zeros((3 * out_channels,), jnp.float32)
        p['out_w'][t] = (0.1 * jax.random.normal(k2, (out_channels, out_channels))).astype(jnp.float32)
        p['out_b'][t] = jnp.zeros((out_channels,), jnp.float32)
        p['skip'][t] = jnp.array(1.0, jnp.float32)          # PyG initializes skip with ones
    for et in edge_types:
        key, k1, k2 = jax.random.split(key, 3)
        p['k_rel'][et] = (0.1 * jax.random.normal(k1, (out_channels, out_channels))).astype(jnp.float32)
        p['v_rel'][et] = (0.1 * jax.random.normal(k2, (out_channels, out_channels))).astype(jnp.float32)
        p['p_rel'][et] = jnp.array(1.0, jnp.float32)        # PyG initializes p_rel with ones
    return p, key


def prep_hgt_conv(params, graph, in_dims, out_channels):
    """Stack / zero-pad weights to 128-lane bf16 slabs ([K|V|Q] column order); fold p_rel and
    1/sqrt(F) into k_rel; build block-diagonal per-edge-type relation weights."""
    F = out_channels
    scale = 1.0 / math.sqrt(F)
    nts, ets = graph['node_types'], graph['edge_types']

    wkqv, bkqv, wout, bout, skip = [], [], [], [], []
    for t in nts:
        w = params['kqv_w'][t]                      # columns [k | q | v] (PyG tensor_split)
        wk_, wq_, wv_ = w[:, :F], w[:, F:2 * F], w[:, 2 * F:]
        wkqv.append(jnp.concatenate([_pad2(wk_, FP, FP), _pad2(wv_, FP, FP),
                                     _pad2(wq_, FP, FP)], axis=1).astype(jnp.bfloat16))
        b = params['kqv_b'][t]
        bkqv.append(jnp.concatenate([_pad1(b[:F], FP), _pad1(b[2 * F:], FP),
                                     _pad1(b[F:2 * F], FP)]).reshape(1, 3 * FP))
        wout.append(_pad2(params['out_w'][t], FP, FP).astype(jnp.bfloat16))
        bout.append(_pad1(params['out_b'][t], FP).reshape(1, FP))
        skip.append(jax.nn.sigmoid(params['skip'][t]))      # scalar, precomputed once

    wkv = []
    for et in ets:
        blk = jnp.zeros((2 * FP, 2 * FP), jnp.float32)
        blk = blk.at[:FP, :FP].set(_pad2(params['k_rel'][et] * (params['p_rel'][et] * scale), FP, FP))
        blk = blk.at[FP:, FP:].set(_pad2(params['v_rel'][et], FP, FP))
        wkv.append(blk.astype(jnp.bfloat16))

    node_segs = tuple((ti, graph['row_off'][t], graph['row_len'][t],
                       t in graph['src_types'], t in graph['dst_types'])
                      for ti, t in enumerate(nts))
    edge_segs = tuple((ei, graph['src_off'][et], graph['row_len'][et[0]],
                       graph['row_off'][et[0]])
                      for ei, et in enumerate(ets))
    out_segs = tuple((ti, graph['row_off'][t], graph['row_len'][t],
                      t in graph['src_types'], t in graph['dst_types'],
                      out_channels == in_dims[t])
                     for ti, t in enumerate(nts))

    return dict(wkqv=jnp.stack(wkqv), bkqv=jnp.stack(bkqv), wkv=jnp.stack(wkv),
                wout=jnp.stack(wout), bout=jnp.stack(bout),
                skip=jnp.stack(skip).astype(jnp.float32),
                meta=dict(node_segs=node_segs, edge_segs=edge_segs, out_segs=out_segs))


def prep_decoder(dec_w, dec_b, graph):
    nts = graph['node_types']
    ws, bs = [], []
    for t in nts:
        if t in graph['dst_types']:
            ws.append(_pad2(dec_w[t], FP, FP).astype(jnp.bfloat16))
            bs.append(_pad1(dec_b[t], FP).reshape(1, FP))
        else:
            ws.append(jnp.zeros((FP, FP), jnp.bfloat16))
            bs.append(jnp.zeros((1, FP), jnp.float32))
    return dict(w=jnp.stack(ws), b=jnp.stack(bs))


def build_x_slab(graph, x_dict):
    slab = jnp.zeros((graph['NP'], FP), jnp.float32)
    for t in graph['node_types']:
        x = x_dict[t].astype(jnp.float32)
        r0 = graph['row_off'][t]
        slab = slab.at[r0:r0 + x.shape[0], :x.shape[1]].set(x)
    return slab


# ----------------------------- top-level HGT --------------------------------

if __name__ == "__main__":
    key = jax.random.PRNGKey(0)

    node_types = ['a', 'b']
    edge_types = [('a', 'to', 'b'), ('b', 'rev', 'a')]
    Na, Nb = 8, 8
    Fa, Fb = 16, 24
    hidden = 32        # conv1 out_channels
    output_dim = 32    # conv2 out_channels (== hidden -> conv2 exercises the sigmoid skip)

    key, ka, kb = jax.random.split(key, 3)
    x_dict = {'a': jax.random.normal(ka, (Na, Fa), jnp.float32),
              'b': jax.random.normal(kb, (Nb, Fb), jnp.float32)}
    edge_index_dict = {
        ('a', 'to', 'b'): np.array([[0, 1, 2, 3, 4, 5, 6, 7, 0, 2, 4, 6],
                                    [0, 1, 2, 3, 4, 5, 6, 7, 1, 3, 5, 7]], dtype=np.int32),
        ('b', 'rev', 'a'): np.array([[0, 1, 2, 3, 4, 5, 6, 7, 1, 3],
                                     [0, 1, 2, 3, 4, 5, 6, 7, 0, 4]], dtype=np.int32),
    }

    graph = build_graph(node_types, {'a': Na, 'b': Nb}, edge_index_dict)

    conv1_params, key = init_hgt_conv(key, {'a': Fa, 'b': Fb}, hidden, node_types, edge_types)
    conv2_params, key = init_hgt_conv(key, {'a': hidden, 'b': hidden}, output_dim,
                                      node_types, edge_types)

    # per-node-type decoder Linear(output_dim -> original feature dim)
    dec_w, dec_b = {}, {}
    for t, fdim in {'a': Fa, 'b': Fb}.items():
        key, kw = jax.random.split(key)
        dec_w[t] = (0.1 * jax.random.normal(kw, (output_dim, fdim))).astype(jnp.float32)
        dec_b[t] = jnp.zeros((fdim,), jnp.float32)
    # TODO(synk): decoder00 and attention_weights are declared in __init__ but never used in
    # forward(); they are intentionally not instantiated here.

    conv1p = prep_hgt_conv(conv1_params, graph, {'a': Fa, 'b': Fb}, hidden)
    conv2p = prep_hgt_conv(conv2_params, graph, {'a': hidden, 'b': hidden}, output_dim)
    decp = prep_decoder(dec_w, dec_b, graph)

    x_slab = build_x_slab(graph, x_dict)

    # one fused pallas_call = conv1 -> conv2 -> decoder
    dec_slab = hgt_forward_fused(graph, conv1p, conv2p, decp, x_slab)

    out = {t: dec_slab[graph['row_off'][t]:graph['row_off'][t] + n, :f]
           for t, n, f in (('a', Na, Fa), ('b', Nb, Fb))}

    for v in out.values():
        jax.block_until_ready(v)
    assert out['a'].shape == (Na, Fa) and out['b'].shape == (Nb, Fb)
    assert all(bool(jnp.all(jnp.isfinite(v))) for v in out.values())
    print("KERNEL_OK")
</pallas_src>

<mosaic_0001>
module attributes {stable_mosaic.version = 11 : i64} {
  func.func @_hgt_fused_kernel(%arg0: memref<64x128xf32, #tpu.memory_space<vmem>>, %arg1: memref<64x128xi8, #tpu.memory_space<vmem>>, %arg2: memref<2x128x384xbf16, #tpu.memory_space<vmem>>, %arg3: memref<2x1x384xf32, #tpu.memory_space<vmem>>, %arg4: memref<2x256x256xbf16, #tpu.memory_space<vmem>>, %arg5: memref<2x128x128xbf16, #tpu.memory_space<vmem>>, %arg6: memref<2x1x128xf32, #tpu.memory_space<vmem>>, %arg7: memref<2xf32, #tpu.memory_space<smem>>, %arg8: memref<2x128x384xbf16, #tpu.memory_space<vmem>>, %arg9: memref<2x1x384xf32, #tpu.memory_space<vmem>>, %arg10: memref<2x256x256xbf16, #tpu.memory_space<vmem>>, %arg11: memref<2x128x128xbf16, #tpu.memory_space<vmem>>, %arg12: memref<2x1x128xf32, #tpu.memory_space<vmem>>, %arg13: memref<2xf32, #tpu.memory_space<smem>>, %arg14: memref<2x128x128xbf16, #tpu.memory_space<vmem>>, %arg15: memref<2x1x128xf32, #tpu.memory_space<vmem>>, %arg16: memref<64x128xf32, #tpu.memory_space<vmem>>, %arg17: memref<64x384xbf16, #tpu.memory_space<vmem>>, %arg18: memref<128x128xbf16, #tpu.memory_space<vmem>>, %arg19: memref<128x128xbf16, #tpu.memory_space<vmem>>, %arg20: memref<64x128xf32, #tpu.memory_space<vmem>>) attributes {dimension_semantics = [], scalar_prefetch = 0 : i64, scratch_operands = 4 : i64, tpu.core_type = #tpu.core_type<tc>} {
    %cst = arith.constant 0.000000e+00 : bf16
    %0 = vector.broadcast %cst : bf16 to vector<64x128xbf16>
    %c64 = arith.constant 64 : index
    %c0 = arith.constant 0 : index
    %1 = vector.load %arg18[%c64, %c0] : memref<128x128xbf16, #tpu.memory_space<vmem>>, vector<64x128xbf16>
    tpu.vector_store %arg18[%c64, %c0], %0 {strides = array<i32>} : memref<128x128xbf16, #tpu.memory_space<vmem>>, vector<64x128xbf16>,
    %c64_0 = arith.constant 64 : index
    %c0_1 = arith.constant 0 : index
    %2 = vector.load %arg19[%c64_0, %c0_1] : memref<128x128xbf16, #tpu.memory_space<vmem>>, vector<64x128xbf16>
    tpu.vector_store %arg19[%c64_0, %c0_1], %0 {strides = array<i32>} : memref<128x128xbf16, #tpu.memory_space<vmem>>, vector<64x128xbf16>,
    %c0_2 = arith.constant 0 : index
    %c0_3 = arith.constant 0 : index
    %3 = vector.load %arg0[%c0_2, %c0_3] : memref<64x128xf32, #tpu.memory_space<vmem>>, vector<32x128xf32>
    %4 = arith.truncf %3 : vector<32x128xf32> to vector<32x128xbf16>
    %c0_4 = arith.constant 0 : index
    %c0_5 = arith.constant 0 : index
    %c0_6 = arith.constant 0 : index
    %5 = vector.load %arg2[%c0_4, %c0_5, %c0_6] : memref<2x128x384xbf16, #tpu.memory_space<vmem>>, vector<1x128x384xbf16>
    %6 = vector.shape_cast %5 : vector<1x128x384xbf16> to vector<128x384xbf16>
    %c0_7 = arith.constant 0 : index
    %c0_8 = arith.constant 0 : index
    %c0_9 = arith.constant 0 : index
    %7 = vector.load %arg3[%c0_7, %c0_8, %c0_9] : memref<2x1x384xf32, #tpu.memory_space<vmem>>, vector<1x1x384xf32>
    %8 = vector.shape_cast %7 : vector<1x1x384xf32> to vector<1x384xf32>
    %cst_10 = arith.constant dense<0.000000e+00> : vector<32x384xf32>
    %9 = tpu.matmul %4, %6, %cst_10 {dimension_numbers = #tpu.dot_dimension_numbers<[1], [0], [0], [1], [0, 0, 1, 1], [], []>} : vector<32x128xbf16>, vector<128x384xbf16>, vector<32x384xf32> -> vector<32x384xf32>
    %10 = vector.broadcast %8 : vector<1x384xf32> to vector<32x384xf32>
    %11 = arith.addf %9, %10 : vector<32x384xf32>
    %12 = arith.truncf %11 : vector<32x384xf32> to vector<32x384xbf16>
    %c0_11 = arith.constant 0 : index
    %c0_12 = arith.constant 0 : index
    %13 = vector.load %arg17[%c0_11, %c0_12] : memref<64x384xbf16, #tpu.memory_space<vmem>>, vector<32x384xbf16>
    tpu.vector_store %arg17[%c0_11, %c0_12], %12 {strides = array<i32>} : memref<64x384xbf16, #tpu.memory_space<vmem>>, vector<32x384xbf16>,
    %c32 = arith.constant 32 : index
    %c0_13 = arith.constant 0 : index
    %14 = vector.load %arg0[%c32, %c0_13] : memref<64x128xf32, #tpu.memory_space<vmem>>, vector<32x128xf32>
    %15 = arith.truncf %14 : vector<32x128xf32> to vector<32x128xbf16>
    %c1 = arith.constant 1 : index
    %c0_14 = arith.constant 0 : index
    %c0_15 = arith.constant 0 : index
    %16 = vector.load %arg2[%c1, %c0_14, %c0_15] : memref<2x128x384xbf16, #tpu.memory_space<vmem>>, vector<1x128x384xbf16>
    %17 = vector.shape_cast %16 : vector<1x128x384xbf16> to vector<128x384xbf16>
    %c1_16 = arith.constant 1 : index
    %c0_17 = arith.constant 0 : index
    %c0_18 = arith.constant 0 : index
    %18 = vector.load %arg3[%c1_16, %c0_17, %c0_18] : memref<2x1x384xf32, #tpu.memory_space<vmem>>, vector<1x1x384xf32>
    %19 = vector.shape_cast %18 : vector<1x1x384xf32> to vector<1x384xf32>
    %cst_19 = arith.constant dense<0.000000e+00> : vector<32x384xf32>
    %20 = tpu.matmul %15, %17, %cst_19 {dimension_numbers = #tpu.dot_dimension_numbers<[1], [0], [0], [1], [0, 0, 1, 1], [], []>} : vector<32x128xbf16>, vector<128x384xbf16>, vector<32x384xf32> -> vector<32x384xf32>
    %21 = vector.broadcast %19 : vector<1x384xf32> to vector<32x384xf32>
    %22 = arith.addf %20, %21 : vector<32x384xf32>
    %23 = arith.truncf %22 : vector<32x384xf32> to vector<32x384xbf16>
    %c32_20 = arith.constant 32 : index
    %c0_21 = arith.constant 0 : index
    %24 = vector.load %arg17[%c32_20, %c0_21] : memref<64x384xbf16, #tpu.memory_space<vmem>>, vector<32x384xbf16>
    tpu.vector_store %arg17[%c32_20, %c0_21], %23 {strides = array<i32>} : memref<64x384xbf16, #tpu.memory_space<vmem>>, vector<32x384xbf16>,
    %c0_22 = arith.constant 0 : index
    %c0_23 = arith.constant 0 : index
    %25 = vector.load %arg17[%c0_22, %c0_23] : memref<64x384xbf16, #tpu.memory_space<vmem>>, vector<32x256xbf16>
    %c0_24 = arith.constant 0 : index
    %c0_25 = arith.constant 0 : index
    %c0_26 = arith.constant 0 : index
    %26 = vector.load %arg4[%c0_24, %c0_25, %c0_26] : memref<2x256x256xbf16, #tpu.memory_space<vmem>>, vector<1x256x256xbf16>
    %27 = vector.shape_cast %26 : vector<1x256x256xbf16> to vector<256x256xbf16>
    %cst_27 = arith.constant dense<0.000000e+00> : vector<32x256xf32>
    %28 = tpu.matmul %25, %27, %cst_27 {dimension_numbers = #tpu.dot_dimension_numbers<[1], [0], [0], [1], [0, 0, 1, 1], [], []>} : vector<32x256xbf16>, vector<256x256xbf16>, vector<32x256xf32> -> vector<32x256xf32>
    %29 = vector.extract_strided_slice %28 {offsets = [0, 0], sizes = [32, 128], strides = [1, 1]} : vector<32x256xf32> to vector<32x128xf32>
    %30 = arith.truncf %29 : vector<32x128xf32> to vector<32x128xbf16>
    %c0_28 = arith.constant 0 : index
    %c0_29 = arith.constant 0 : index
    %31 = vector.load %arg18[%c0_28, %c0_29] : memref<128x128xbf16, #tpu.memory_space<vmem>>, vector<32x128xbf16>
    tpu.vector_store %arg18[%c0_28, %c0_29], %30 {strides = array<i32>} : memref<128x128xbf16, #tpu.memory_space<vmem>>, vector<32x128xbf16>,
    %32 = vector.extract_strided_slice %28 {offsets = [0, 128], sizes = [32, 128], strides = [1, 1]} : vector<32x256xf32> to vector<32x128xf32>
    %33 = arith.truncf %32 : vector<32x128xf32> to vector<32x128xbf16>
    %c0_30 = arith.constant 0 : index
    %c0_31 = arith.constant 0 : index
    %34 = vector.load %arg19[%c0_30, %c0_31] : memref<128x128xbf16, #tpu.memory_space<vmem>>, vector<32x128xbf16>
    tpu.vector_store %arg19[%c0_30, %c0_31], %33 {strides = array<i32>} : memref<128x128xbf16, #tpu.memory_space<vmem>>, vector<32x128xbf16>,
    %c32_32 = arith.constant 32 : index
    %c0_33 = arith.constant 0 : index
    %35 = vector.load %arg17[%c32_32, %c0_33] : memref<64x384xbf16, #tpu.memory_space<vmem>>, vector<32x256xbf16>
    %c1_34 = arith.constant 1 : index
    %c0_35 = arith.constant 0 : index
    %c0_36 = arith.constant 0 : index
    %36 = vector.load %arg4[%c1_34, %c0_35, %c0_36] : memref<2x256x256xbf16, #tpu.memory_space<vmem>>, vector<1x256x256xbf16>
    %37 = vector.shape_cast %36 : vector<1x256x256xbf16> to vector<256x256xbf16>
    %cst_37 = arith.constant dense<0.000000e+00> : vector<32x256xf32>
    %38 = tpu.matmul %35, %37, %cst_37 {dimension_numbers = #tpu.dot_dimension_numbers<[1], [0], [0], [1], [0, 0, 1, 1], [], []>} : vector<32x256xbf16>, vector<256x256xbf16>, vector<32x256xf32> -> vector<32x256xf32>
    %39 = vector.extract_strided_slice %38 {offsets = [0, 0], sizes = [32, 128], strides = [1, 1]} : vector<32x256xf32> to vector<32x128xf32>
    %40 = arith.truncf %39 : vector<32x128xf32> to vector<32x128xbf16>
    %c32_38 = arith.constant 32 : index
    %c0_39 = arith.constant 0 : index
    %41 = vector.load %arg18[%c32_38, %c0_39] : memref<128x128xbf16, #tpu.memory_space<vmem>>, vector<32x128xbf16>
    tpu.vector_store %arg18[%c32_38, %c0_39], %40 {strides = array<i32>} : memref<128x128xbf16, #tpu.memory_space<vmem>>, vector<32x128xbf16>,
    %42 = vector.extract_strided_slice %38 {offsets = [0, 128], sizes = [32, 128], strides = [1, 1]} : vector<32x256xf32> to vector<32x128xf32>
    %43 = arith.truncf %42 : vector<32x128xf32> to vector<32x128xbf16>
    %c32_40 = arith.constant 32 : index
    %c0_41 = arith.constant 0 : index
    %44 = vector.load %arg19[%c32_40, %c0_41] : memref<128x128xbf16, #tpu.memory_space<vmem>>, vector<32x128xbf16>
    tpu.vector_store %arg19[%c32_40, %c0_41], %43 {strides = array<i32>} : memref<128x128xbf16, #tpu.memory_space<vmem>>, vector<32x128xbf16>,
    %c0_42 = arith.constant 0 : index
    %c256 = arith.constant 256 : index
    %45 = vector.load %arg17[%c0_42, %c256] : memref<64x384xbf16, #tpu.memory_space<vmem>>, vector<32x128xbf16>
    %c0_43 = arith.constant 0 : index
    %c0_44 = arith.constant 0 : index
    %46 = vector.load %arg18[%c0_43, %c0_44] : memref<128x128xbf16, #tpu.memory_space<vmem>>, vector<128x128xbf16>
    %c0_45 = arith.constant 0 : index
    %c0_46 = arith.constant 0 : index
    %47 = vector.load %arg19[%c0_45, %c0_46] : memref<128x128xbf16, #tpu.memory_space<vmem>>, vector<128x128xbf16>
    %cst_47 = arith.constant dense<0.000000e+00> : vector<32x128xf32>
    %48 = tpu.matmul %45, %46, %cst_47 {dimension_numbers = #tpu.dot_dimension_numbers<[1], [1], [0], [0], [0, 0, 1, 0], [], []>} : vector<32x128xbf16>, vector<128x128xbf16>, vector<32x128xf32> -> vector<32x128xf32>
    %c0_48 = arith.constant 0 : index
    %c0_49 = arith.constant 0 : index
    %49 = vector.load %arg1[%c0_48, %c0_49] : memref<64x128xi8, #tpu.memory_space<vmem>>, vector<32x128xi8>
    %50 = arith.sitofp %49 : vector<32x128xi8> to vector<32x128xf32>
    %cst_50 = arith.constant 0.000000e+00 : f32
    %51 = vector.broadcast %cst_50 : f32 to vector<32x128xf32>
    %52 = arith.cmpf ogt, %50, %51 : vector<32x128xf32>
    %cst_51 = arith.constant -1.000000e+30 : f32
    %53 = vector.broadcast %cst_51 : f32 to vector<32x128xf32>
    %54 = arith.select %52, %48, %53 : vector<32x128xi1>, vector<32x128xf32>
    %cst_52 = arith.constant dense<0xFF800000> : vector<32xf32>
    %55 = vector.multi_reduction <maximumf>, %54, %cst_52 [1] : vector<32x128xf32> to vector<32xf32>
    %56 = vector.shape_cast %55 : vector<32xf32> to vector<32x1xf32>
    %57 = vector.broadcast %56 : vector<32x1xf32> to vector<32x128xf32>
    %58 = arith.subf %54, %57 : vector<32x128xf32>
    %59 = math.exp %58 : vector<32x128xf32>
    %cst_53 = arith.constant dense<0.000000e+00> : vector<32xf32>
    %60 = vector.multi_reduction <add>, %59, %cst_53 [1] : vector<32x128xf32> to vector<32xf32>
    %61 = vector.shape_cast %60 : vector<32xf32> to vector<32x1xf32>
    %cst_54 = arith.constant -5.000000e+29 : f32
    %62 = vector.broadcast %cst_54 : f32 to vector<32x1xf32>
    %63 = arith.cmpf ogt, %56, %62 : vector<32x1xf32>
    %cst_55 = arith.constant 1.000000e+00 : f32
    %cst_56 = arith.constant 0.000000e+00 : f32
    %64 = vector.broadcast %cst_55 : f32 to vector<32x1xf32>
    %65 = vector.broadcast %cst_56 : f32 to vector<32x1xf32>
    %66 = arith.select %63, %64, %65 : vector<32x1xi1>, vector<32x1xf32>
    %67 = arith.truncf %59 : vector<32x128xf32> to vector<32x128xbf16>
    %cst_57 = arith.constant dense<0.000000e+00> : vector<32x128xf32>
    %68 = tpu.matmul %67, %47, %cst_57 {dimension_numbers = #tpu.dot_dimension_numbers<[1], [0], [0], [1], [0, 0, 1, 1], [], []>} : vector<32x128xbf16>, vector<128x128xbf16>, vector<32x128xf32> -> vector<32x128xf32>
    %69 = tpu.reciprocal %61 {approx = true} : vector<32x1xf32> -> vector<32x1xf32>
    %70 = arith.mulf %69, %66 : vector<32x1xf32>
    %71 = vector.broadcast %70 : vector<32x1xf32> to vector<32x128xf32>
    %72 = arith.mulf %68, %71 : vector<32x128xf32>
    %cst_58 = arith.constant 5.000000e-01 : f32
    %73 = vector.broadcast %cst_58 : f32 to vector<32x128xf32>
    %74 = arith.mulf %73, %72 : vector<32x128xf32>
    %cst_59 = arith.constant 4.471500e-02 : f32
    %75 = vector.broadcast %cst_59 : f32 to vector<32x128xf32>
    %76 = arith.mulf %75, %72 : vector<32x128xf32>
    %77 = arith.mulf %76, %72 : vector<32x128xf32>
    %78 = arith.mulf %77, %72 : vector<32x128xf32>
    %79 = arith.addf %72, %78 : vector<32x128xf32>
    %cst_60 = arith.constant 0.797884583 : f32
    %80 = vector.broadcast %cst_60 : f32 to vector<32x128xf32>
    %81 = arith.mulf %80, %79 : vector<32x128xf32>
    %82 = math.tanh %81 : vector<32x128xf32>
    %cst_61 = arith.constant 1.000000e+00 : f32
    %83 = vector.broadcast %cst_61 : f32 to vector<32x128xf32>
    %84 = arith.addf %83, %82 : vector<32x128xf32>
    %85 = arith.mulf %74, %84 : vector<32x128xf32>
    %86 = arith.truncf %85 : vector<32x128xf32> to vector<32x128xbf16>
    %c0_62 = arith.constant 0 : index
    %c0_63 = arith.constant 0 : index
    %c0_64 = arith.constant 0 : index
    %87 = vector.load %arg5[%c0_62, %c0_63, %c0_64] : memref<2x128x128xbf16, #tpu.memory_space<vmem>>, vector<1x128x128xbf16>
    %88 = vector.shape_cast %87 : vector<1x128x128xbf16> to vector<128x128xbf16>
    %cst_65 = arith.constant dense<0.000000e+00> : vector<32x128xf32>
    %89 = tpu.matmul %86, %88, %cst_65 {dimension_numbers = #tpu.dot_dimension_numbers<[1], [0], [0], [1], [0, 0, 1, 1], [], []>} : vector<32x128xbf16>, vector<128x128xbf16>, vector<32x128xf32> -> vector<32x128xf32>
    %c0_66 = arith.constant 0 : index
    %c0_67 = arith.constant 0 : index
    %c0_68 = arith.constant 0 : index
    %90 = vector.load %arg6[%c0_66, %c0_67, %c0_68] : memref<2x1x128xf32, #tpu.memory_space<vmem>>, vector<1x1x128xf32>
    %91 = vector.shape_cast %90 : vector<1x1x128xf32> to vector<1x128xf32>
    %92 = vector.broadcast %91 : vector<1x128xf32> to vector<32x128xf32>
    %93 = arith.addf %89, %92 : vector<32x128xf32>
    %c0_69 = arith.constant 0 : index
    %c0_70 = arith.constant 0 : index
    %94 = vector.load %arg20[%c0_69, %c0_70] : memref<64x128xf32, #tpu.memory_space<vmem>>, vector<32x128xf32>
    tpu.vector_store %arg20[%c0_69, %c0_70], %93 {strides = array<i32>} : memref<64x128xf32, #tpu.memory_space<vmem>>, vector<32x128xf32>,
    %c32_71 = arith.constant 32 : index
    %c256_72 = arith.constant 256 : index
    %95 = vector.load %arg17[%c32_71, %c256_72] : memref<64x384xbf16, #tpu.memory_space<vmem>>, vector<32x128xbf16>
    %c0_73 = arith.constant 0 : index
    %c0_74 = arith.constant 0 : index
    %96 = vector.load %arg18[%c0_73, %c0_74] : memref<128x128xbf16, #tpu.memory_space<vmem>>, vector<128x128xbf16>
    %c0_75 = arith.constant 0 : index
    %c0_76 = arith.constant 0 : index
    %97 = vector.load %arg19[%c0_75, %c0_76] : memref<128x128xbf16, #tpu.memory_space<vmem>>, vector<128x128xbf16>
    %cst_77 = arith.constant dense<0.000000e+00> : vector<32x128xf32>
    %98 = tpu.matmul %95, %96, %cst_77 {dimension_numbers = #tpu.dot_dimension_numbers<[1], [1], [0], [0], [0, 0, 1, 0], [], []>} : vector<32x128xbf16>, vector<128x128xbf16>, vector<32x128xf32> -> vector<32x128xf32>
    %c32_78 = arith.constant 32 : index
    %c0_79 = arith.constant 0 : index
    %99 = vector.load %arg1[%c32_78, %c0_79] : memref<64x128xi8, #tpu.memory_space<vmem>>, vector<32x128xi8>
    %100 = arith.sitofp %99 : vector<32x128xi8> to vector<32x128xf32>
    %cst_80 = arith.constant 0.000000e+00 : f32
    %101 = vector.broadcast %cst_80 : f32 to vector<32x128xf32>
    %102 = arith.cmpf ogt, %100, %101 : vector<32x128xf32>
    %cst_81 = arith.constant -1.000000e+30 : f32
    %103 = vector.broadcast %cst_81 : f32 to vector<32x128xf32>
    %104 = arith.select %102, %98, %103 : vector<32x128xi1>, vector<32x128xf32>
    %cst_82 = arith.constant dense<0xFF800000> : vector<32xf32>
    %105 = vector.multi_reduction <maximumf>, %104, %cst_82 [1] : vector<32x128xf32> to vector<32xf32>
    %106 = vector.shape_cast %105 : vector<32xf32> to vector<32x1xf32>
    %107 = vector.broadcast %106 : vector<32x1xf32> to vector<32x128xf32>
    %108 = arith.subf %104, %107 : vector<32x128xf32>
    %109 = math.exp %108 : vector<32x128xf32>
    %cst_83 = arith.constant dense<0.000000e+00> : vector<32xf32>
    %110 = vector.multi_reduction <add>, %109, %cst_83 [1] : vector<32x128xf32> to vector<32xf32>
    %111 = vector.shape_cast %110 : vector<32xf32> to vector<32x1xf32>
    %cst_84 = arith.constant -5.000000e+29 : f32
    %112 = vector.broadcast %cst_84 : f32 to vector<32x1xf32>
    %113 = arith.cmpf ogt, %106, %112 : vector<32x1xf32>
    %cst_85 = arith.constant 1.000000e+00 : f32
    %cst_86 = arith.constant 0.000000e+00 : f32
    %114 = vector.broadcast %cst_85 : f32 to vector<32x1xf32>
    %115 = vector.broadcast %cst_86 : f32 to vector<32x1xf32>
    %116 = arith.select %113, %114, %115 : vector<32x1xi1>, vector<32x1xf32>
    %117 = arith.truncf %109 : vector<32x128xf32> to vector<32x128xbf16>
    %cst_87 = arith.constant dense<0.000000e+00> : vector<32x128xf32>
    %118 = tpu.matmul %117, %97, %cst_87 {dimension_numbers = #tpu.dot_dimension_numbers<[1], [0], [0], [1], [0, 0, 1, 1], [], []>} : vector<32x128xbf16>, vector<128x128xbf16>, vector<32x128xf32> -> vector<32x128xf32>
    %119 = tpu.reciprocal %111 {approx = true} : vector<32x1xf32> -> vector<32x1xf32>
    %120 = arith.mulf %119, %116 : vector<32x1xf32>
    %121 = vector.broadcast %120 : vector<32x1xf32> to vector<32x128xf32>
    %122 = arith.mulf %118, %121 : vector<32x128xf32>
    %cst_88 = arith.constant 5.000000e-01 : f32
    %123 = vector.broadcast %cst_88 : f32 to vector<32x128xf32>
    %124 = arith.mulf %123, %122 : vector<32x128xf32>
    %cst_89 = arith.constant 4.471500e-02 : f32
    %125 = vector.broadcast %cst_89 : f32 to vector<32x128xf32>
    %126 = arith.mulf %125, %122 : vector<32x128xf32>
    %127 = arith.mulf %126, %122 : vector<32x128xf32>
    %128 = arith.mulf %127, %122 : vector<32x128xf32>
    %129 = arith.addf %122, %128 : vector<32x128xf32>
    %cst_90 = arith.constant 0.797884583 : f32
    %130 = vector.broadcast %cst_90 : f32 to vector<32x128xf32>
    %131 = arith.mulf %130, %129 : vector<32x128xf32>
    %132 = math.tanh %131 : vector<32x128xf32>
    %cst_91 = arith.constant 1.000000e+00 : f32
    %133 = vector.broadcast %cst_91 : f32 to vector<32x128xf32>
    %134 = arith.addf %133, %132 : vector<32x128xf32>
    %135 = arith.mulf %124, %134 : vector<32x128xf32>
    %136 = arith.truncf %135 : vector<32x128xf32> to vector<32x128xbf16>
    %c1_92 = arith.constant 1 : index
    %c0_93 = arith.constant 0 : index
    %c0_94 = arith.constant 0 : index
    %137 = vector.load %arg5[%c1_92, %c0_93, %c0_94] : memref<2x128x128xbf16, #tpu.memory_space<vmem>>, vector<1x128x128xbf16>
    %138 = vector.shape_cast %137 : vector<1x128x128xbf16> to vector<128x128xbf16>
    %cst_95 = arith.constant dense<0.000000e+00> : vector<32x128xf32>
    %139 = tpu.matmul %136, %138, %cst_95 {dimension_numbers = #tpu.dot_dimension_numbers<[1], [0], [0], [1], [0, 0, 1, 1], [], []>} : vector<32x128xbf16>, vector<128x128xbf16>, vector<32x128xf32> -> vector<32x128xf32>
    %c1_96 = arith.constant 1 : index
    %c0_97 = arith.constant 0 : index
    %c0_98 = arith.constant 0 : index
    %140 = vector.load %arg6[%c1_96, %c0_97, %c0_98] : memref<2x1x128xf32, #tpu.memory_space<vmem>>, vector<1x1x128xf32>
    %141 = vector.shape_cast %140 : vector<1x1x128xf32> to vector<1x128xf32>
    %142 = vector.broadcast %141 : vector<1x128xf32> to vector<32x128xf32>
    %143 = arith.addf %139, %142 : vector<32x128xf32>
    %c32_99 = arith.constant 32 : index
    %c0_100 = arith.constant 0 : index
    %144 = vector.load %arg20[%c32_99, %c0_100] : memref<64x128xf32, #tpu.memory_space<vmem>>, vector<32x128xf32>
    tpu.vector_store %arg20[%c32_99, %c0_100], %143 {strides = array<i32>} : memref<64x128xf32, #tpu.memory_space<vmem>>, vector<32x128xf32>,
    %c0_101 = arith.constant 0 : index
    %c0_102 = arith.constant 0 : index
    %145 = vector.load %arg20[%c0_101, %c0_102] : memref<64x128xf32, #tpu.memory_space<vmem>>, vector<32x128xf32>
    %146 = arith.truncf %145 : vector<32x128xf32> to vector<32x128xbf16>
    %c0_103 = arith.constant 0 : index
    %c0_104 = arith.constant 0 : index
    %c0_105 = arith.constant 0 : index
    %147 = vector.load %arg8[%c0_103, %c0_104, %c0_105] : memref<2x128x384xbf16, #tpu.memory_space<vmem>>, vector<1x128x384xbf16>
    %148 = vector.shape_cast %147 : vector<1x128x384xbf16> to vector<128x384xbf16>
    %c0_106 = arith.constant 0 : index
    %c0_107 = arith.constant 0 : index
    %c0_108 = arith.constant 0 : index
    %149 = vector.load %arg9[%c0_106, %c0_107, %c0_108] : memref<2x1x384xf32, #tpu.memory_space<vmem>>, vector<1x1x384xf32>
    %150 = vector.shape_cast %149 : vector<1x1x384xf32> to vector<1x384xf32>
    %cst_109 = arith.constant dense<0.000000e+00> : vector<32x384xf32>
    %151 = tpu.matmul %146, %148, %cst_109 {dimension_numbers = #tpu.dot_dimension_numbers<[1], [0], [0], [1], [0, 0, 1, 1], [], []>} : vector<32x128xbf16>, vector<128x384xbf16>, vector<32x384xf32> -> vector<32x384xf32>
    %152 = vector.broadcast %150 : vector<1x384xf32> to vector<32x384xf32>
    %153 = arith.addf %151, %152 : vector<32x384xf32>
    %154 = arith.truncf %153 : vector<32x384xf32> to vector<32x384xbf16>
    %c0_110 = arith.constant 0 : index
    %c0_111 = arith.constant 0 : index
    %155 = vector.load %arg17[%c0_110, %c0_111] : memref<64x384xbf16, #tpu.memory_space<vmem>>, vector<32x384xbf16>
    tpu.vector_store %arg17[%c0_110, %c0_111], %154 {strides = array<i32>} : memref<64x384xbf16, #tpu.memory_space<vmem>>, vector<32x384xbf16>,
    %c32_112 = arith.constant 32 : index
    %c0_113 = arith.constant 0 : index
    %156 = vector.load %arg20[%c32_112, %c0_113] : memref<64x128xf32, #tpu.memory_space<vmem>>, vector<32x128xf32>
    %157 = arith.truncf %156 : vector<32x128xf32> to vector<32x128xbf16>
    %c1_114 = arith.constant 1 : index
    %c0_115 = arith.constant 0 : index
    %c0_116 = arith.constant 0 : index
    %158 = vector.load %arg8[%c1_114, %c0_115, %c0_116] : memref<2x128x384xbf16, #tpu.memory_space<vmem>>, vector<1x128x384xbf16>
    %159 = vector.shape_cast %158 : vector<1x128x384xbf16> to vector<128x384xbf16>
    %c1_117 = arith.constant 1 : index
    %c0_118 = arith.constant 0 : index
    %c0_119 = arith.constant 0 : index
    %160 = vector.load %arg9[%c1_117, %c0_118, %c0_119] : memref<2x1x384xf32, #tpu.memory_space<vmem>>, vector<1x1x384xf32>
    %161 = vector.shape_cast %160 : vector<1x1x384xf32> to vector<1x384xf32>
    %cst_120 = arith.constant dense<0.000000e+00> : vector<32x384xf32>
    %162 = tpu.matmul %157, %159, %cst_120 {dimension_numbers = #tpu.dot_dimension_numbers<[1], [0], [0], [1], [0, 0, 1, 1], [], []>} : vector<32x128xbf16>, vector<128x384xbf16>, vector<32x384xf32> -> vector<32x384xf32>
    %163 = vector.broadcast %161 : vector<1x384xf32> to vector<32x384xf32>
    %164 = arith.addf %162, %163 : vector<32x384xf32>
    %165 = arith.truncf %164 : vector<32x384xf32> to vector<32x384xbf16>
    %c32_121 = arith.constant 32 : index
    %c0_122 = arith.constant 0 : index
    %166 = vector.load %arg17[%c32_121, %c0_122] : memref<64x384xbf16, #tpu.memory_space<vmem>>, vector<32x384xbf16>
    tpu.vector_store %arg17[%c32_121, %c0_122], %165 {strides = array<i32>} : memref<64x384xbf16, #tpu.memory_space<vmem>>, vector<32x384xbf16>,
    %c0_123 = arith.constant 0 : index
    %c0_124 = arith.constant 0 : index
    %167 = vector.load %arg17[%c0_123, %c0_124] : memref<64x384xbf16, #tpu.memory_space<vmem>>, vector<32x256xbf16>
    %c0_125 = arith.constant 0 : index
    %c0_126 = arith.constant 0 : index
    %c0_127 = arith.constant 0 : index
    %168 = vector.load %arg10[%c0_125, %c0_126, %c0_127] : memref<2x256x256xbf16, #tpu.memory_space<vmem>>, vector<1x256x256xbf16>
    %169 = vector.shape_cast %168 : vector<1x256x256xbf16> to vector<256x256xbf16>
    %cst_128 = arith.constant dense<0.000000e+00> : vector<32x256xf32>
    %170 = tpu.matmul %167, %169, %cst_128 {dimension_numbers = #tpu.dot_dimension_numbers<[1], [0], [0], [1], [0, 0, 1, 1], [], []>} : vector<32x256xbf16>, vector<256x256xbf16>, vector<32x256xf32> -> vector<32x256xf32>
    %171 = vector.extract_strided_slice %170 {offsets = [0, 0], sizes = [32, 128], strides = [1, 1]} : vector<32x256xf32> to vector<32x128xf32>
    %172 = arith.truncf %171 : vector<32x128xf32> to vector<32x128xbf16>
    %c0_129 = arith.constant 0 : index
    %c0_130 = arith.constant 0 : index
    %173 = vector.load %arg18[%c0_129, %c0_130] : memref<128x128xbf16, #tpu.memory_space<vmem>>, vector<32x128xbf16>
    tpu.vector_store %arg18[%c0_129, %c0_130], %172 {strides = array<i32>} : memref<128x128xbf16, #tpu.memory_space<vmem>>, vector<32x128xbf16>,
    %174 = vector.extract_strided_slice %170 {offsets = [0, 128], sizes = [32, 128], strides = [1, 1]} : vector<32x256xf32> to vector<32x128xf32>
    %175 = arith.truncf %174 : vector<32x128xf32> to vector<32x128xbf16>
    %c0_131 = arith.constant 0 : index
    %c0_132 = arith.constant 0 : index
    %176 = vector.load %arg19[%c0_131, %c0_132] : memref<128x128xbf16, #tpu.memory_space<vmem>>, vector<32x128xbf16>
    tpu.vector_store %arg19[%c0_131, %c0_132], %175 {strides = array<i32>} : memref<128x128xbf16, #tpu.memory_space<vmem>>, vector<32x128xbf16>,
    %c32_133 = arith.constant 32 : index
    %c0_134 = arith.constant 0 : index
    %177 = vector.load %arg17[%c32_133, %c0_134] : memref<64x384xbf16, #tpu.memory_space<vmem>>, vector<32x256xbf16>
    %c1_135 = arith.constant 1 : index
    %c0_136 = arith.constant 0 : index
    %c0_137 = arith.constant 0 : index
    %178 = vector.load %arg10[%c1_135, %c0_136, %c0_137] : memref<2x256x256xbf16, #tpu.memory_space<vmem>>, vector<1x256x256xbf16>
    %179 = vector.shape_cast %178 : vector<1x256x256xbf16> to vector<256x256xbf16>
    %cst_138 = arith.constant dense<0.000000e+00> : vector<32x256xf32>
    %180 = tpu.matmul %177, %179, %cst_138 {dimension_numbers = #tpu.dot_dimension_numbers<[1], [0], [0], [1], [0, 0, 1, 1], [], []>} : vector<32x256xbf16>, vector<256x256xbf16>, vector<32x256xf32> -> vector<32x256xf32>
    %181 = vector.extract_strided_slice %180 {offsets = [0, 0], sizes = [32, 128], strides = [1, 1]} : vector<32x256xf32> to vector<32x128xf32>
    %182 = arith.truncf %181 : vector<32x128xf32> to vector<32x128xbf16>
    %c32_139 = arith.constant 32 : index
    %c0_140 = arith.constant 0 : index
    %183 = vector.load %arg18[%c32_139, %c0_140] : memref<128x128xbf16, #tpu.memory_space<vmem>>, vector<32x128xbf16>
    tpu.vector_store %arg18[%c32_139, %c0_140], %182 {strides = array<i32>} : memref<128x128xbf16, #tpu.memory_space<vmem>>, vector<32x128xbf16>,
    %184 = vector.extract_strided_slice %180 {offsets = [0, 128], sizes = [32, 128], strides = [1, 1]} : vector<32x256xf32> to vector<32x128xf32>
    %185 = arith.truncf %184 : vector<32x128xf32> to vector<32x128xbf16>
    %c32_141 = arith.constant 32 : index
    %c0_142 = arith.constant 0 : index
    %186 = vector.load %arg19[%c32_141, %c0_142] : memref<128x128xbf16, #tpu.memory_space<vmem>>, vector<32x128xbf16>
    tpu.vector_store %arg19[%c32_141, %c0_142], %185 {strides = array<i32>} : memref<128x128xbf16, #tpu.memory_space<vmem>>, vector<32x128xbf16>,
    %c0_143 = arith.constant 0 : index
    %c256_144 = arith.constant 256 : index
    %187 = vector.load %arg17[%c0_143, %c256_144] : memref<64x384xbf16, #tpu.memory_space<vmem>>, vector<32x128xbf16>
    %c0_145 = arith.constant 0 : index
    %c0_146 = arith.constant 0 : index
    %188 = vector.load %arg18[%c0_145, %c0_146] : memref<128x128xbf16, #tpu.memory_space<vmem>>, vector<128x128xbf16>
    %c0_147 = arith.constant 0 : index
    %c0_148 = arith.constant 0 : index
    %189 = vector.load %arg19[%c0_147, %c0_148] : memref<128x128xbf16, #tpu.memory_space<vmem>>, vector<128x128xbf16>
    %cst_149 = arith.constant dense<0.000000e+00> : vector<32x128xf32>
    %190 = tpu.matmul %187, %188, %cst_149 {dimension_numbers = #tpu.dot_dimension_numbers<[1], [1], [0], [0], [0, 0, 1, 0], [], []>} : vector<32x128xbf16>, vector<128x128xbf16>, vector<32x128xf32> -> vector<32x128xf32>
    %c0_150 = arith.constant 0 : index
    %c0_151 = arith.constant 0 : index
    %191 = vector.load %arg1[%c0_150, %c0_151] : memref<64x128xi8, #tpu.memory_space<vmem>>, vector<32x128xi8>
    %192 = arith.sitofp %191 : vector<32x128xi8> to vector<32x128xf32>
    %cst_152 = arith.constant 0.000000e+00 : f32
    %193 = vector.broadcast %cst_152 : f32 to vector<32x128xf32>
    %194 = arith.cmpf ogt, %192, %193 : vector<32x128xf32>
    %cst_153 = arith.constant -1.000000e+30 : f32
    %195 = vector.broadcast %cst_153 : f32 to vector<32x128xf32>
    %196 = arith.select %194, %190, %195 : vector<32x128xi1>, vector<32x128xf32>
    %cst_154 = arith.constant dense<0xFF800000> : vector<32xf32>
    %197 = vector.multi_reduction <maximumf>, %196, %cst_154 [1] : vector<32x128xf32> to vector<32xf32>
    %198 = vector.shape_cast %197 : vector<32xf32> to vector<32x1xf32>
    %199 = vector.broadcast %198 : vector<32x1xf32> to vector<32x128xf32>
    %200 = arith.subf %196, %199 : vector<32x128xf32>
    %201 = math.exp %200 : vector<32x128xf32>
    %cst_155 = arith.constant dense<0.000000e+00> : vector<32xf32>
    %202 = vector.multi_reduction <add>, %201, %cst_155 [1] : vector<32x128xf32> to vector<32xf32>
    %203 = vector.shape_cast %202 : vector<32xf32> to vector<32x1xf32>
    %cst_156 = arith.constant -5.000000e+29 : f32
    %204 = vector.broadcast %cst_156 : f32 to vector<32x1xf32>
    %205 = arith.cmpf ogt, %198, %204 : vector<32x1xf32>
    %cst_157 = arith.constant 1.000000e+00 : f32
    %cst_158 = arith.constant 0.000000e+00 : f32
    %206 = vector.broadcast %cst_157 : f32 to vector<32x1xf32>
    %207 = vector.broadcast %cst_158 : f32 to vector<32x1xf32>
    %208 = arith.select %205, %206, %207 : vector<32x1xi1>, vector<32x1xf32>
    %209 = arith.truncf %201 : vector<32x128xf32> to vector<32x128xbf16>
    %cst_159 = arith.constant dense<0.000000e+00> : vector<32x128xf32>
    %210 = tpu.matmul %209, %189, %cst_159 {dimension_numbers = #tpu.dot_dimension_numbers<[1], [0], [0], [1], [0, 0, 1, 1], [], []>} : vector<32x128xbf16>, vector<128x128xbf16>, vector<32x128xf32> -> vector<32x128xf32>
    %211 = tpu.reciprocal %203 {approx = true} : vector<32x1xf32> -> vector<32x1xf32>
    %212 = arith.mulf %211, %208 : vector<32x1xf32>
    %213 = vector.broadcast %212 : vector<32x1xf32> to vector<32x128xf32>
    %214 = arith.mulf %210, %213 : vector<32x128xf32>
    %cst_160 = arith.constant 5.000000e-01 : f32
    %215 = vector.broadcast %cst_160 : f32 to vector<32x128xf32>
    %216 = arith.mulf %215, %214 : vector<32x128xf32>
    %cst_161 = arith.constant 4.471500e-02 : f32
    %217 = vector.broadcast %cst_161 : f32 to vector<32x128xf32>
    %218 = arith.mulf %217, %214 : vector<32x128xf32>
    %219 = arith.mulf %218, %214 : vector<32x128xf32>
    %220 = arith.mulf %219, %214 : vector<32x128xf32>
    %221 = arith.addf %214, %220 : vector<32x128xf32>
    %cst_162 = arith.constant 0.797884583 : f32
    %222 = vector.broadcast %cst_162 : f32 to vector<32x128xf32>
    %223 = arith.mulf %222, %221 : vector<32x128xf32>
    %224 = math.tanh %223 : vector<32x128xf32>
    %cst_163 = arith.constant 1.000000e+00 : f32
    %225 = vector.broadcast %cst_163 : f32 to vector<32x128xf32>
    %226 = arith.addf %225, %224 : vector<32x128xf32>
    %227 = arith.mulf %216, %226 : vector<32x128xf32>
    %228 = arith.truncf %227 : vector<32x128xf32> to vector<32x128xbf16>
    %c0_164 = arith.constant 0 : index
    %c0_165 = arith.constant 0 : index
    %c0_166 = arith.constant 0 : index
    %229 = vector.load %arg11[%c0_164, %c0_165, %c0_166] : memref<2x128x128xbf16, #tpu.memory_space<vmem>>, vector<1x128x128xbf16>
    %230 = vector.shape_cast %229 : vector<1x128x128xbf16> to vector<128x128xbf16>
    %cst_167 = arith.constant dense<0.000000e+00> : vector<32x128xf32>
    %231 = tpu.matmul %228, %230, %cst_167 {dimension_numbers = #tpu.dot_dimension_numbers<[1], [0], [0], [1], [0, 0, 1, 1], [], []>} : vector<32x128xbf16>, vector<128x128xbf16>, vector<32x128xf32> -> vector<32x128xf32>
    %c0_168 = arith.constant 0 : index
    %c0_169 = arith.constant 0 : index
    %c0_170 = arith.constant 0 : index
    %232 = vector.load %arg12[%c0_168, %c0_169, %c0_170] : memref<2x1x128xf32, #tpu.memory_space<vmem>>, vector<1x1x128xf32>
    %233 = vector.shape_cast %232 : vector<1x1x128xf32> to vector<1x128xf32>
    %234 = vector.broadcast %233 : vector<1x128xf32> to vector<32x128xf32>
    %235 = arith.addf %231, %234 : vector<32x128xf32>
    %c0_171 = arith.constant 0 : index
    %236 = memref.load %arg13[%c0_171] : memref<2xf32, #tpu.memory_space<smem>>
    %237 = vector.broadcast %236 : f32 to vector<32x128xf32>
    %238 = arith.mulf %237, %235 : vector<32x128xf32>
    %cst_172 = arith.constant 1.000000e+00 : f32
    %239 = arith.subf %cst_172, %236 : f32
    %c0_173 = arith.constant 0 : index
    %c0_174 = arith.constant 0 : index
    %240 = vector.load %arg20[%c0_173, %c0_174] : memref<64x128xf32, #tpu.memory_space<vmem>>, vector<32x128xf32>
    %241 = vector.broadcast %239 : f32 to vector<32x128xf32>
    %242 = arith.mulf %241, %240 : vector<32x128xf32>
    %243 = arith.addf %238, %242 : vector<32x128xf32>
    %244 = arith.truncf %243 : vector<32x128xf32> to vector<32x128xbf16>
    %c0_175 = arith.constant 0 : index
    %c0_176 = arith.constant 0 : index
    %c0_177 = arith.constant 0 : index
    %245 = vector.load %arg14[%c0_175, %c0_176, %c0_177] : memref<2x128x128xbf16, #tpu.memory_space<vmem>>, vector<1x128x128xbf16>
    %246 = vector.shape_cast %245 : vector<1x128x128xbf16> to vector<128x128xbf16>
    %cst_178 = arith.constant dense<0.000000e+00> : vector<32x128xf32>
    %247 = tpu.matmul %244, %246, %cst_178 {dimension_numbers = #tpu.dot_dimension_numbers<[1], [0], [0], [1], [0, 0, 1, 1], [], []>} : vector<32x128xbf16>, vector<128x128xbf16>, vector<32x128xf32> -> vector<32x128xf32>
    %c0_179 = arith.constant 0 : index
    %c0_180 = arith.constant 0 : index
    %c0_181 = arith.constant 0 : index
    %248 = vector.load %arg15[%c0_179, %c0_180, %c0_181] : memref<2x1x128xf32, #tpu.memory_space<vmem>>, vector<1x1x128xf32>
    %249 = vector.shape_cast %248 : vector<1x1x128xf32> to vector<1x128xf32>
    %250 = vector.broadcast %249 : vector<1x128xf32> to vector<32x128xf32>
    %251 = arith.addf %247, %250 : vector<32x128xf32>
    %c0_182 = arith.constant 0 : index
    %c0_183 = arith.constant 0 : index
    %252 = vector.load %arg16[%c0_182, %c0_183] : memref<64x128xf32, #tpu.memory_space<vmem>>, vector<32x128xf32>
    tpu.vector_store %arg16[%c0_182, %c0_183], %251 {strides = array<i32>} : memref<64x128xf32, #tpu.memory_space<vmem>>, vector<32x128xf32>,
    %c32_184 = arith.constant 32 : index
    %c256_185 = arith.constant 256 : index
    %253 = vector.load %arg17[%c32_184, %c256_185] : memref<64x384xbf16, #tpu.memory_space<vmem>>, vector<32x128xbf16>
    %c0_186 = arith.constant 0 : index
    %c0_187 = arith.constant 0 : index
    %254 = vector.load %arg18[%c0_186, %c0_187] : memref<128x128xbf16, #tpu.memory_space<vmem>>, vector<128x128xbf16>
    %c0_188 = arith.constant 0 : index
    %c0_189 = arith.constant 0 : index
    %255 = vector.load %arg19[%c0_188, %c0_189] : memref<128x128xbf16, #tpu.memory_space<vmem>>, vector<128x128xbf16>
    %cst_190 = arith.constant dense<0.000000e+00> : vector<32x128xf32>
    %256 = tpu.matmul %253, %254, %cst_190 {dimension_numbers = #tpu.dot_dimension_numbers<[1], [1], [0], [0], [0, 0, 1, 0], [], []>} : vector<32x128xbf16>, vector<128x128xbf16>, vector<32x128xf32> -> vector<32x128xf32>
    %c32_191 = arith.constant 32 : index
    %c0_192 = arith.constant 0 : index
    %257 = vector.load %arg1[%c32_191, %c0_192] : memref<64x128xi8, #tpu.memory_space<vmem>>, vector<32x128xi8>
    %258 = arith.sitofp %257 : vector<32x128xi8> to vector<32x128xf32>
    %cst_193 = arith.constant 0.000000e+00 : f32
    %259 = vector.broadcast %cst_193 : f32 to vector<32x128xf32>
    %260 = arith.cmpf ogt, %258, %259 : vector<32x128xf32>
    %cst_194 = arith.constant -1.000000e+30 : f32
    %261 = vector.broadcast %cst_194 : f32 to vector<32x128xf32>
    %262 = arith.select %260, %256, %261 : vector<32x128xi1>, vector<32x128xf32>
    %cst_195 = arith.constant dense<0xFF800000> : vector<32xf32>
    %263 = vector.multi_reduction <maximumf>, %262, %cst_195 [1] : vector<32x128xf32> to vector<32xf32>
    %264 = vector.shape_cast %263 : vector<32xf32> to vector<32x1xf32>
    %265 = vector.broadcast %264 : vector<32x1xf32> to vector<32x128xf32>
    %266 = arith.subf %262, %265 : vector<32x128xf32>
    %267 = math.exp %266 : vector<32x128xf32>
    %cst_196 = arith.constant dense<0.000000e+00> : vector<32xf32>
    %268 = vector.multi_reduction <add>, %267, %cst_196 [1] : vector<32x128xf32> to vector<32xf32>
    %269 = vector.shape_cast %268 : vector<32xf32> to vector<32x1xf32>
    %cst_197 = arith.constant -5.000000e+29 : f32
    %270 = vector.broadcast %cst_197 : f32 to vector<32x1xf32>
    %271 = arith.cmpf ogt, %264, %270 : vector<32x1xf32>
    %cst_198 = arith.constant 1.000000e+00 : f32
    %cst_199 = arith.constant 0.000000e+00 : f32
    %272 = vector.broadcast %cst_198 : f32 to vector<32x1xf32>
    %273 = vector.broadcast %cst_199 : f32 to vector<32x1xf32>
    %274 = arith.select %271, %272, %273 : vector<32x1xi1>, vector<32x1xf32>
    %275 = arith.truncf %267 : vector<32x128xf32> to vector<32x128xbf16>
    %cst_200 = arith.constant dense<0.000000e+00> : vector<32x128xf32>
    %276 = tpu.matmul %275, %255, %cst_200 {dimension_numbers = #tpu.dot_dimension_numbers<[1], [0], [0], [1], [0, 0, 1, 1], [], []>} : vector<32x128xbf16>, vector<128x128xbf16>, vector<32x128xf32> -> vector<32x128xf32>
    %277 = tpu.reciprocal %269 {approx = true} : vector<32x1xf32> -> vector<32x1xf32>
    %278 = arith.mulf %277, %274 : vector<32x1xf32>
    %279 = vector.broadcast %278 : vector<32x1xf32> to vector<32x128xf32>
    %280 = arith.mulf %276, %279 : vector<32x128xf32>
    %cst_201 = arith.constant 5.000000e-01 : f32
    %281 = vector.broadcast %cst_201 : f32 to vector<32x128xf32>
    %282 = arith.mulf %281, %280 : vector<32x128xf32>
    %cst_202 = arith.constant 4.471500e-02 : f32
    %283 = vector.broadcast %cst_202 : f32 to vector<32x128xf32>
    %284 = arith.mulf %283, %280 : vector<32x128xf32>
    %285 = arith.mulf %284, %280 : vector<32x128xf32>
    %286 = arith.mulf %285, %280 : vector<32x128xf32>
    %287 = arith.addf %280, %286 : vector<32x128xf32>
    %cst_203 = arith.constant 0.797884583 : f32
    %288 = vector.broadcast %cst_203 : f32 to vector<32x128xf32>
    %289 = arith.mulf %288, %287 : vector<32x128xf32>
    %290 = math.tanh %289 : vector<32x128xf32>
    %cst_204 = arith.constant 1.000000e+00 : f32
    %291 = vector.broadcast %cst_204 : f32 to vector<32x128xf32>
    %292 = arith.addf %291, %290 : vector<32x128xf32>
    %293 = arith.mulf %282, %292 : vector<32x128xf32>
    %294 = arith.truncf %293 : vector<32x128xf32> to vector<32x128xbf16>
    %c1_205 = arith.constant 1 : index
    %c0_206 = arith.constant 0 : index
    %c0_207 = arith.constant 0 : index
    %295 = vector.load %arg11[%c1_205, %c0_206, %c0_207] : memref<2x128x128xbf16, #tpu.memory_space<vmem>>, vector<1x128x128xbf16>
    %296 = vector.shape_cast %295 : vector<1x128x128xbf16> to vector<128x128xbf16>
    %cst_208 = arith.constant dense<0.000000e+00> : vector<32x128xf32>
    %297 = tpu.matmul %294, %296, %cst_208 {dimension_numbers = #tpu.dot_dimension_numbers<[1], [0], [0], [1], [0, 0, 1, 1], [], []>} : vector<32x128xbf16>, vector<128x128xbf16>, vector<32x128xf32> -> vector<32x128xf32>
    %c1_209 = arith.constant 1 : index
    %c0_210 = arith.constant 0 : index
    %c0_211 = arith.constant 0 : index
    %298 = vector.load %arg12[%c1_209, %c0_210, %c0_211] : memref<2x1x128xf32, #tpu.memory_space<vmem>>, vector<1x1x128xf32>
    %299 = vector.shape_cast %298 : vector<1x1x128xf32> to vector<1x128xf32>
    %300 = vector.broadcast %299 : vector<1x128xf32> to vector<32x128xf32>
    %301 = arith.addf %297, %300 : vector<32x128xf32>
    %c1_212 = arith.constant 1 : index
    %302 = memref.load %arg13[%c1_212] : memref<2xf32, #tpu.memory_space<smem>>
    %303 = vector.broadcast %302 : f32 to vector<32x128xf32>
    %304 = arith.mulf %303, %301 : vector<32x128xf32>
    %cst_213 = arith.constant 1.000000e+00 : f32
    %305 = arith.subf %cst_213, %302 : f32
    %c32_214 = arith.constant 32 : index
    %c0_215 = arith.constant 0 : index
    %306 = vector.load %arg20[%c32_214, %c0_215] : memref<64x128xf32, #tpu.memory_space<vmem>>, vector<32x128xf32>
    %307 = vector.broadcast %305 : f32 to vector<32x128xf32>
    %308 = arith.mulf %307, %306 : vector<32x128xf32>
    %309 = arith.addf %304, %308 : vector<32x128xf32>
    %310 = arith.truncf %309 : vector<32x128xf32> to vector<32x128xbf16>
    %c1_216 = arith.constant 1 : index
    %c0_217 = arith.constant 0 : index
    %c0_218 = arith.constant 0 : index
    %311 = vector.load %arg14[%c1_216, %c0_217, %c0_218] : memref<2x128x128xbf16, #tpu.memory_space<vmem>>, vector<1x128x128xbf16>
    %312 = vector.shape_cast %311 : vector<1x128x128xbf16> to vector<128x128xbf16>
    %cst_219 = arith.constant dense<0.000000e+00> : vector<32x128xf32>
    %313 = tpu.matmul %310, %312, %cst_219 {dimension_numbers = #tpu.dot_dimension_numbers<[1], [0], [0], [1], [0, 0, 1, 1], [], []>} : vector<32x128xbf16>, vector<128x128xbf16>, vector<32x128xf32> -> vector<32x128xf32>
    %c1_220 = arith.constant 1 : index
    %c0_221 = arith.constant 0 : index
    %c0_222 = arith.constant 0 : index
    %314 = vector.load %arg15[%c1_220, %c0_221, %c0_222] : memref<2x1x128xf32, #tpu.memory_space<vmem>>, vector<1x1x128xf32>
    %315 = vector.shape_cast %314 : vector<1x1x128xf32> to vector<1x128xf32>
    %316 = vector.broadcast %315 : vector<1x128xf32> to vector<32x128xf32>
    %317 = arith.addf %313, %316 : vector<32x128xf32>
    %c32_223 = arith.constant 32 : index
    %c0_224 = arith.constant 0 : index
    %318 = vector.load %arg16[%c32_223, %c0_224] : memref<64x128xf32, #tpu.memory_space<vmem>>, vector<32x128xf32>
    tpu.vector_store %arg16[%c32_223, %c0_224], %317 {strides = array<i32>} : memref<64x128xf32, #tpu.memory_space<vmem>>, vector<32x128xf32>,
    return
  }
}

</mosaic_0001>

<bundles_post_ra>
// kernel: tpu_custom_call.1
= control target key start
LH: loop header
LB: loop body
LE: loop exit
PB: predicated region body
PF: predicated region fallthrough
CT: control target
= control target key end

     0   :  { %s6958_s0 = inlined_call_operand.hbm [shape: f32[64,128], index: 0, kind: input, shape index: {}]   ;;  %s6959_s1 = inlined_call_operand.hbm [shape: s8[64,128], index: 1, kind: input, shape index: {}]   ;;  %s6960_s2 = inlined_call_operand.hbm [shape: bf16[2,128,384], index: 2, kind: input, shape index: {}]   ;;  %s6961_s3 = inlined_call_operand.hbm [shape: f32[2,1,384], index: 3, kind: input, shape index: {}]   ;;  %s6962_s4 = inlined_call_operand.hbm [shape: bf16[2,256,256], index: 4, kind: input, shape index: {}]   ;;  %s6963_s5 = inlined_call_operand.hbm [shape: bf16[2,128,128], index: 5, kind: input, shape index: {}]   ;;  %s6964_s6 = inlined_call_operand.vmem [shape: f32[2,1,128], index: 6, kind: input, shape index: {}]   ;;  %s6965_s7 = inlined_call_operand.hbm [shape: f32[2], index: 7, kind: input, shape index: {}]   ;;  %s6966_s8 = inlined_call_operand.hbm [shape: bf16[2,128,384], index: 8, kind: input, shape index: {}]   ;;  %s6967_s9 = inlined_call_operand.vmem [shape: f32[2,1,384], index: 9, kind: input, shape index: {}]   ;;  %s6968_s10 = inlined_call_operand.hbm [shape: bf16[2,256,256], index: 10, kind: input, shape index: {}]   ;;  %s6969_s11 = inlined_call_operand.hbm [shape: bf16[2,128,128], index: 11, kind: input, shape index: {}]   ;;  %s6970_s12 = inlined_call_operand.vmem [shape: f32[2,1,128], index: 12, kind: input, shape index: {}]   ;;  %s6971_s13 = inlined_call_operand.hbm [shape: f32[2], index: 13, kind: input, shape index: {}]   ;;  %s6972_s14 = inlined_call_operand.hbm [shape: bf16[2,128,128], index: 14, kind: input, shape index: {}]   ;;  %s6973_s15 = inlined_call_operand.vmem [shape: f32[2,1,128], index: 15, kind: input, shape index: {}]   ;;  %s6974_s16 = inlined_call_operand.hbm [shape: f32[64,128], index: 16, kind: output, shape index: {}]  }
   0x1   :  { %6975 = sst [smem:[#allocation38_spill]] %s6958_s0 }
   0x2   :  { %21 = vsyncpa [#allocation7], 0 }
   0x3   :  { %22 = vsyncpa [#allocation11], 0 }
   0x4   :  { %23 = vsyncpa [#allocation14], 0 }
   0x5   :  { %24 = vsyncpa [#allocation17], 0 }
   0x6   :  { %25 = vsyncpa [#allocation9], 0 }
   0x7   :  { %26 = vsyncpa [#allocation21], 0 }
   0x8   :  { %27 = vsyncpa [#allocation24], 0 }
   0x9   :  { %28 = vsyncpa [#allocation26], 0 }
   0xa   :  { %29 = vsyncpa [#allocation8], 0  ;;  %s47_s23 = sshll.u32 %s6959_s1, 4  ;;  %s6578_s24 = smov [#allocation10]   ;;  %s48_s23 = int_to_ptr.hbm [resolvable:$true] %s47_s23 }
   0xb   :  { %s49_s25 = sshll.u32 %s6578_s24, 4  ;;  %s73_s28 = sshll.u32 %s6961_s3, 4  ;;  %s50_s25 = int_to_ptr.vmem [resolvable:$true] %s49_s25  ;;  %s74_s28 = int_to_ptr.hbm [resolvable:$true] %s73_s28 }
   0xc   :  { %s6579_s29 = smov 128   ;;  %s6580_s30 = smov 8  }
   0xd   :  { %55 = dma.hbm_to_vmem [thread:$0]  %s48_s23, 256, %s50_s25, [#allocation11], %s6579_s29, %s6579_s29, %s6580_s30  }
   0xe   :  { %s6581_s0 = smov [#allocation13]   ;;  %s6582_s18 = smov 48  }
   0xf   :  { %s75_s17 = sshll.u32 %s6581_s0, 4  ;;  %s6583_s1 = smov 3   ;;  %s76_s17 = int_to_ptr.vmem [resolvable:$true] %s75_s17 }
  0x10   :  { %81 = dma.hbm_to_vmem [thread:$0]  %s74_s28, 96, %s76_s17, [#allocation14], %s6582_s18, %s6582_s18, %s6583_s1  }
  0x11   :  { %s99_s21 = sshll.u32 %s6963_s5, 4  ;;  %s6584_s22 = smov [#allocation16]   ;;  %s100_s21 = int_to_ptr.hbm [resolvable:$true] %s99_s21 }
  0x12   :  { %s101_s3 = sshll.u32 %s6584_s22, 4  ;;  %s138_s27 = sshll.u32 %s6968_s10, 4  ;;  %s102_s3 = int_to_ptr.vmem [resolvable:$true] %s101_s3  ;;  %s139_s27 = int_to_ptr.hbm [resolvable:$true] %s138_s27 }
  0x13   :  { %s6585_s23 = smov 64   ;;  %s6586_s25 = smov 4  }
  0x14   :  { %107 = dma.hbm_to_vmem [thread:$0]  %s100_s21, 2048, %s102_s3, [#allocation17], %s6585_s23, %s6585_s23, %s6586_s25  }
  0x15   :  { %s6587_s28 = smov [#allocation20]   ;;  %s6976_s5 = sld [smem:[#allocation38_spill]] }
  0x16   :  { %s140_s0 = sshll.u32 %s6587_s28, 4  ;;  %s60_s20 = sshll.u32 %s6960_s2, 4  ;;  %s141_s0 = int_to_ptr.vmem [resolvable:$true] %s140_s0  ;;  %s61_s20 = int_to_ptr.hbm [resolvable:$true] %s60_s20 }
  0x17   :  { %146 = dma.hbm_to_vmem [thread:$0]  %s139_s27, 8192, %s141_s0, [#allocation21], %s6579_s29, %s6579_s29, %s6580_s30  }
  0x18   :  { %s6588_s22 = smov [#allocation6]   ;;  %s6589_s21 = smov [#allocation12]  }
  0x19   :  { %s36_s24 = sshll.u32 %s6588_s22, 4  ;;  %s62_s3 = sshll.u32 %s6589_s21, 4  ;;  %s37_s24 = int_to_ptr.vmem [resolvable:$true] %s36_s24  ;;  %s63_s3 = int_to_ptr.vmem [resolvable:$true] %s62_s3 }
  0x1a   :  { %s6590_s26 = smov 192   ;;  %s6591_s28 = smov 12  }
  0x1b   :  { %s34_s1 = sshll.u32 %s6976_s5, 4  ;;  %s86_s0 = sshll.u32 %s6962_s4, 4  ;;  %s35_s1 = int_to_ptr.hbm [resolvable:$true] %s34_s1  ;;  %s87_s0 = int_to_ptr.hbm [resolvable:$true] %s86_s0 }
  0x1c   :  { %42 = dma.hbm_to_vmem [thread:$0]  %s35_s1, 1024, %s37_s24, [#allocation7], %s6579_s29, %s6579_s29, %s6580_s30  }
  0x1d   :  { %68 = dma.hbm_to_vmem [thread:$0]  %s61_s20, 6144, %s63_s3, [#allocation11], %s6590_s26, %s6590_s26, %s6591_s28  }
  0x1e   :  { %s6592_s2 = smov [#allocation15]   ;;  %s115_s19 = sshll.u32 %s6965_s7, 4  ;;  %s116_s19 = int_to_ptr.hbm [resolvable:$true] %s115_s19 }
  0x1f   :  { %s88_s18 = sshll.u32 %s6592_s2, 4  ;;  %s6593_s1 = smov [#allocation18]   ;;  %s89_s18 = int_to_ptr.vmem [resolvable:$true] %s88_s18 }
  0x20   :  { %94 = dma.hbm_to_vmem [thread:$0]  %s87_s0, 8192, %s89_s18, [#allocation14], %s6579_s29, %s6579_s29, %s6580_s30  }
  0x21   :  { %118 = dma.hbm_to_smem %s116_s19, 16, %s6593_s1, [#allocation9]  }
  0x22   :  { %s123_s24 = sshll.u32 %s6966_s8, 4  ;;  %s6594_s4 = smov [#allocation19]   ;;  %s124_s24 = int_to_ptr.hbm [resolvable:$true] %s123_s24 }
  0x23   :  { %s125_s21 = sshll.u32 %s6594_s4, 4  ;;  %s151_s27 = sshll.u32 %s6969_s11, 4  ;;  %s126_s21 = int_to_ptr.vmem [resolvable:$true] %s125_s21  ;;  %s152_s27 = int_to_ptr.hbm [resolvable:$true] %s151_s27 }
  0x24   :  { %131 = dma.hbm_to_vmem [thread:$0]  %s124_s24, 6144, %s126_s21, [#allocation17], %s6590_s26, %s6590_s26, %s6591_s28  }
  0x25   :  { %s6595_s7 = smov [#allocation22]   ;;  %s167_s5 = sshll.u32 %s6971_s13, 4  ;;  %s168_s5 = int_to_ptr.hbm [resolvable:$true] %s167_s5 }
  0x26   :  { %s153_s2 = sshll.u32 %s6595_s7, 4  ;;  %s175_s19 = sshll.u32 %s6972_s14, 4  ;;  %s154_s2 = int_to_ptr.vmem [resolvable:$true] %s153_s2  ;;  %s176_s19 = int_to_ptr.hbm [resolvable:$true] %s175_s19 }
  0x27   :  { %159 = dma.hbm_to_vmem [thread:$0]  %s152_s27, 2048, %s154_s2, [#allocation21], %s6585_s23, %s6585_s23, %s6586_s25  }
  0x28   :  { %s6596_s1 = smov [#allocation23]   ;;  %s6597_s11 = smov [#allocation25]  }
  0x29   :  { %170 = dma.hbm_to_smem %s168_s5, 16, %s6596_s1, [#allocation24]  }
  0x2a   :  { %s177_s26 = sshll.u32 %s6597_s11, 4  ;;  %s178_s26 = int_to_ptr.vmem [resolvable:$true] %s177_s26 }
  0x2b   :  { %183 = dma.hbm_to_vmem [thread:$0]  %s176_s19, 2048, %s178_s26, [#allocation26], %s6585_s23, %s6585_s23, %s6586_s25  }
  0x2c   :  { %6558 = dma.done.wait [#allocation7], 1024  }
  0x2d   :  { %6559 = vsyncadd [#allocation7], 4294966272 }
  0x2e   :  { %6560 = dma.done.wait [#allocation11], 6400  }
  0x2f   :  { %6561 = vsyncadd [#allocation11], 4294960896 }
  0x30   :  { %6562 = dma.done.wait [#allocation14], 8288  }
  0x31   :  { %6563 = vsyncadd [#allocation14], 4294959008 }
  0x32   :  { %6564 = dma.done.wait [#allocation17], 2048  }
  0x33   :  { %6565 = vsyncadd [#allocation17], 4294965248 }
  0x34   :  { %6566 = dma.done.wait [#allocation9], 16  }
  0x35   :  { %6567 = vsyncadd [#allocation9], 4294967280 }
  0x36   :  { %6568 = dma.done.wait [#allocation17], 6144  }
  0x37   :  { %6569 = vsyncadd [#allocation17], 4294961152 }
  0x38   :  { %6570 = dma.done.wait [#allocation21], 10240  }
  0x39   :  { %6571 = vsyncadd [#allocation21], 4294957056 }
  0x3a   :  { %6572 = dma.done.wait [#allocation24], 16  }
  0x3b   :  { %6573 = vsyncadd [#allocation24], 4294967280 }
  0x3c   :  { %6574 = dma.done.wait [#allocation26], 2048  }
  0x3d   :  { %6575 = vsyncadd [#allocation26], 4294965248 }
  0x3e   :  { %234 = sfence }
  0x3f   :  { %v4326_v0 = vld [vmem:[#allocation12 + $0xa8] sm:$0xf]  ;;  %v5707_v1 = vld [vmem:[#allocation12 + $0xb0] sm:$0xf0]  ;;  %v5706_v2 = vld [vmem:[#allocation12 + $0xac] sm:$0xf] }
  0x40   :  { %v4327_v3 = vor.u32 %v5707_v1, %v4326_v0  ;;  %v4328_v4 = vld [vmem:[#allocation12 + $0xb4] sm:$0xf0]  ;;  %v4314_v5 = vld [vmem:[#allocation12 + $0x90] sm:$0xf]  ;;  %v5704_v6 = vld [vmem:[#allocation12 + $0x98] sm:$0xf0] }
  0x41   :  { %v4331_v7 = vor.u32 %v5706_v2, %v4328_v4  ;;  %v5703_v8 = vld [vmem:[#allocation12 + $0x94] sm:$0xf]  ;;  %v4316_v9 = vld [vmem:[#allocation12 + $0x9c] sm:$0xf0]  ;;  %v4315_v10 = vor.u32 %v5704_v6, %v4314_v5  ;;  %v4302_v12 = vld [vmem:[#allocation12 + $0x78] sm:$0xf] }
  0x42   :  { %426 = vmatpush.bf16.msra.mxu0 %v4327_v3  ;;  %v4319_v11 = vor.u32 %v5703_v8, %v4316_v9  ;;  %v5701_v13 = vld [vmem:[#allocation12 + $0x80] sm:$0xf0]  ;;  %v5700_v14 = vld [vmem:[#allocation12 + $0x7c] sm:$0xf]  ;;  %v4304_v15 = vld [vmem:[#allocation12 + $0x84] sm:$0xf0] }
  0x43   :  { %445 = vmatpush.bf16.msra.mxu1 %v4331_v7  ;;  %v4422_v16 = vld [vmem:[#allocation12 + $0x168] sm:$0xf]  ;;  %v4303_v17 = vor.u32 %v5701_v13, %v4302_v12  ;;  %v5731_v18 = vld [vmem:[#allocation12 + $0x170] sm:$0xf0]  ;;  %v4307_v19 = vor.u32 %v5700_v14, %v4304_v15  ;;  %v4290_v20 = vld [vmem:[#allocation12 + $0x60] sm:$0xf] }
  0x44   :  { %v5698_v21 = vld [vmem:[#allocation12 + $0x68] sm:$0xf0]  ;;  %v4423_v22 = vor.u32 %v5731_v18, %v4422_v16  ;;  %v4410_v23 = vld [vmem:[#allocation12 + $0x150] sm:$0xf]  ;;  %v5697_v24 = vld [vmem:[#allocation12 + $0x64] sm:$0xf] }
  0x45   :  { %v4292_v25 = vld [vmem:[#allocation12 + $0x6c] sm:$0xf0]  ;;  %v5728_v26 = vld [vmem:[#allocation12 + $0x158] sm:$0xf0]  ;;  %v4291_v28 = vor.u32 %v5698_v21, %v4290_v20  ;;  %v4398_v29 = vld [vmem:[#allocation12 + $0x138] sm:$0xf] }
  0x46   :  { %427 = vmatpush.bf16.msra.mxu0 %v4315_v10  ;;  %675 = vmatpush.bf16.msra.mxu3 %v4423_v22  ;;  %v4411_v27 = vor.u32 %v5728_v26, %v4410_v23  ;;  %v5725_v30 = vld [vmem:[#allocation12 + $0x140] sm:$0xf0]  ;;  %v4295_v31 = vor.u32 %v5697_v24, %v4292_v25  ;;  %v4278_v32 = vld [vmem:[#allocation12 + $0x48] sm:$0xf]  ;;  %v5695_v33 = vld [vmem:[#allocation12 + $0x50] sm:$0xf0] }
  0x47   :  { %446 = vmatpush.bf16.msra.mxu1 %v4319_v11  ;;  %v5694_v34 = vld [vmem:[#allocation12 + $0x4c] sm:$0xf]  ;;  %v4280_v35 = vld [vmem:[#allocation12 + $0x54] sm:$0xf0]  ;;  %v4399_v36 = vor.u32 %v5725_v30, %v4398_v29  ;;  %v4279_v37 = vor.u32 %v5695_v33, %v4278_v32  ;;  %v4386_v38 = vld [vmem:[#allocation12 + $0x120] sm:$0xf] }
  0x48   :  { %v5722_v39 = vld [vmem:[#allocation12 + $0x128] sm:$0xf0]  ;;  %v4283_v40 = vor.u32 %v5694_v34, %v4280_v35  ;;  %v4266_v41 = vld [vmem:[#allocation12 + $0x30] sm:$0xf]  ;;  %v5692_v42 = vld [vmem:[#allocation12 + $0x38] sm:$0xf0] }
  0x49   :  { %v5691_v43 = vld [vmem:[#allocation12 + $0x34] sm:$0xf]  ;;  %v4268_v44 = vld [vmem:[#allocation12 + $0x3c] sm:$0xf0]  ;;  %v4387_v45 = vor.u32 %v5722_v39, %v4386_v38  ;;  %v4267_v46 = vor.u32 %v5692_v42, %v4266_v41  ;;  %v4374_v47 = vld [vmem:[#allocation12 + $0x108] sm:$0xf] }
  0x4a   :  { %428 = vmatpush.bf16.msra.mxu0 %v4303_v17  ;;  %676 = vmatpush.bf16.msra.mxu3 %v4411_v27  ;;  %v5719_v48 = vld [vmem:[#allocation12 + $0x110] sm:$0xf0]  ;;  %v4271_v49 = vor.u32 %v5691_v43, %v4268_v44  ;;  %v4254_v50 = vld [vmem:[#allocation12 + $0x18] sm:$0xf]  ;;  %v5689_v51 = vld [vmem:[#allocation12 + $0x20] sm:$0xf0] }
  0x4b   :  { %447 = vmatpush.bf16.msra.mxu1 %v4307_v19  ;;  %v5688_v52 = vld [vmem:[#allocation12 + $0x1c] sm:$0xf]  ;;  %v4256_v53 = vld [vmem:[#allocation12 + $0x24] sm:$0xf0]  ;;  %v4242_v54 = vld [vmem:[#allocation12] sm:$0xf]  ;;  %v4375_v56 = vor.u32 %v5719_v48, %v4374_v47  ;;  %v4255_v59 = vor.u32 %v5689_v51, %v4254_v50 }
  0x4c   :  { %v5686_v55 = vld [vmem:[#allocation12 + $0x8] sm:$0xf0]  ;;  %v4362_v57 = vld [vmem:[#allocation12 + $0xf0] sm:$0xf]  ;;  %v5716_v58 = vld [vmem:[#allocation12 + $0xf8] sm:$0xf0]  ;;  %v4259_v60 = vor.u32 %v5688_v52, %v4256_v53 }
  0x4d   :  { %v5685_v61 = vld [vmem:[#allocation12 + $0x4] sm:$0xf]  ;;  %v4244_v62 = vld [vmem:[#allocation12 + $0xc] sm:$0xf0]  ;;  %v5730_v63 = vld [vmem:[#allocation12 + $0x16c] sm:$0xf]  ;;  %v4363_v2 = vor.u32 %v5716_v58, %v4362_v57  ;;  %v4243_v3 = vor.u32 %v5686_v55, %v4242_v54 }
  0x4e   :  { %429 = vmatpush.bf16.msra.mxu0 %v4291_v28  ;;  %677 = vmatpush.bf16.msra.mxu3 %v4399_v36  ;;  %v4424_v0 = vld [vmem:[#allocation12 + $0x174] sm:$0xf0]  ;;  %v252_v1 = vld [vmem:[#allocation6] sm:$0xff]  ;;  %v5713_v6 = vld [vmem:[#allocation12 + $0xe0] sm:$0xf0]  ;;  %v4247_v7 = vor.u32 %v5685_v61, %v4244_v62  ;;  %s5651_s27 = sld [smem:[#allocation23 + $0x1]] }
  0x4f   :  { %448 = vmatpush.bf16.msra.mxu1 %v4295_v31  ;;  %v253_v4 = vld [vmem:[#allocation6 + $0x8] sm:$0xff]  ;;  %v4427_v8 = vor.u32 %v5730_v63, %v4424_v0  ;;  %v5727_v9 = vld [vmem:[#allocation12 + $0x154] sm:$0xf]  ;;  %v4412_v10 = vld [vmem:[#allocation12 + $0x15c] sm:$0xf0]  ;;  %s6600_s5 = smov [#allocation27]  }
  0x50   :  { %v4350_v5 = vld [vmem:[#allocation12 + $0xd8] sm:$0xf]  ;;  %v6743_v11 = vpack.c.bf16 %v253_v4, %v252_v1  ;;  %v4338_v13 = vld [vmem:[#allocation12 + $0xc0] sm:$0xf]  ;;  %v5710_v14 = vld [vmem:[#allocation12 + $0xc8] sm:$0xf0]  ;;  %v4415_v15 = vor.u32 %v5727_v9, %v4412_v10 }
  0x51   :  { %v4351_v12 = vor.u32 %v5713_v6, %v4350_v5  ;;  %v5724_v16 = vld [vmem:[#allocation12 + $0x13c] sm:$0xf]  ;;  %v4400_v17 = vld [vmem:[#allocation12 + $0x144] sm:$0xf0]  ;;  %v4339_v18 = vor.u32 %v5710_v14, %v4338_v13  ;;  %v499_v19 = vld [vmem:[#allocation6 + $0x20] sm:$0xff]  ;;  %s4218_s8 = sshll.u32 %s6600_s5, 4  ;;  %s4219_s8 = int_to_ptr.vmem [resolvable:$true] %s4218_s8 }
  0x52   :  { %430 = vmatpush.bf16.msra.mxu0 %v4279_v37  ;;  %678 = vmatpush.bf16.msra.mxu3 %v4387_v45  ;;  %v500_v20 = vld [vmem:[#allocation6 + $0x28] sm:$0xff]  ;;  %v4403_v21 = vor.u32 %v5724_v16, %v4400_v17  ;;  %v5721_v22 = vld [vmem:[#allocation12 + $0x124] sm:$0xf]  ;;  %v4388_v23 = vld [vmem:[#allocation12 + $0x12c] sm:$0xf0]  ;;  %s4220_s1 = sshll.u32 %s6974_s16, 4  ;;  %s4221_s1 = int_to_ptr.hbm [resolvable:$true] %s4220_s1 }
  0x53   :  { %449 = vmatpush.bf16.msra.mxu1 %v4283_v40  ;;  %v6747_v24 = vpack.c.bf16 %v500_v20, %v499_v19  ;;  %v4391_v25 = vor.u32 %v5721_v22, %v4388_v23  ;;  %v5718_v26 = vld [vmem:[#allocation12 + $0x10c] sm:$0xf]  ;;  %v4376_v27 = vld [vmem:[#allocation12 + $0x114] sm:$0xf0]  ;;  %v254_v28 = vld [vmem:[#allocation6 + $0x10] sm:$0xff] }
  0x54   :  { %v255_v29 = vld [vmem:[#allocation6 + $0x18] sm:$0xff]  ;;  %v4379_v30 = vor.u32 %v5718_v26, %v4376_v27  ;;  %v5715_v31 = vld [vmem:[#allocation12 + $0xf4] sm:$0xf]  ;;  %v4364_v32 = vld [vmem:[#allocation12 + $0xfc] sm:$0xf0]  ;;  %s4105_s0 = ssub.f32 1.0, %s5651_s27 }
  0x55   :  { %v6750_v33 = vpack.c.bf16 %v255_v29, %v254_v28  ;;  %v4367_v34 = vor.u32 %v5715_v31, %v4364_v32  ;;  %v5712_v35 = vld [vmem:[#allocation12 + $0xdc] sm:$0xf]  ;;  %v4352_v36 = vld [vmem:[#allocation12 + $0xe4] sm:$0xf0]  ;;  %v501_v37 = vld [vmem:[#allocation6 + $0x30] sm:$0xff] }
  0x56   :  { %431 = vmatpush.bf16.msra.mxu0 %v4267_v46  ;;  %679 = vmatpush.bf16.msra.mxu3 %v4375_v56  ;;  %v502_v38 = vld [vmem:[#allocation6 + $0x38] sm:$0xff]  ;;  %v4334_v39 = vld [vmem:[#allocation12 + $0xb0] sm:$0xf]  ;;  %v5708_v40 = vld [vmem:[#allocation12 + $0xb8] sm:$0xf0]  ;;  %v4355_v44 = vor.u32 %v5712_v35, %v4352_v36 }
  0x57   :  { %450 = vmatpush.bf16.msra.mxu1 %v4271_v49  ;;  %v4322_v41 = vld [vmem:[#allocation12 + $0x98] sm:$0xf]  ;;  %v4335_v42 = vor.u32 %v5708_v40, %v4334_v39  ;;  %v5705_v43 = vld [vmem:[#allocation12 + $0xa0] sm:$0xf0]  ;;  %v4430_v46 = vld [vmem:[#allocation12 + $0x170] sm:$0xf]  ;;  %v6754_v49 = vpack.c.bf16 %v502_v38, %v501_v37 }
  0x58   :  { %v5709_v45 = vld [vmem:[#allocation12 + $0xc4] sm:$0xf]  ;;  %v5732_v47 = vld [vmem:[#allocation12 + $0x178] sm:$0xf0]  ;;  %v4340_v48 = vld [vmem:[#allocation12 + $0xcc] sm:$0xf0]  ;;  %v4323_v50 = vor.u32 %v5705_v43, %v4322_v41 }
  0x59   :  { %464 = vmatpush.bf16.msra.mxu2 %v4335_v42  ;;  %v4431_v51 = vor.u32 %v5732_v47, %v4430_v46  ;;  %v4418_v52 = vld [vmem:[#allocation12 + $0x158] sm:$0xf]  ;;  %v5729_v53 = vld [vmem:[#allocation12 + $0x160] sm:$0xf0]  ;;  %v4310_v54 = vld [vmem:[#allocation12 + $0x80] sm:$0xf]  ;;  %v4343_v57 = vor.u32 %v5709_v45, %v4340_v48 }
  0x5a   :  { %432 = vmatpush.bf16.msra.mxu0 %v4255_v59  ;;  %680 = vmatpush.bf16.msra.mxu3 %v4363_v2  ;;  %v5702_v55 = vld [vmem:[#allocation12 + $0x88] sm:$0xf0]  ;;  %v4419_v56 = vor.u32 %v5729_v53, %v4418_v52  ;;  %v4406_v58 = vld [vmem:[#allocation12 + $0x140] sm:$0xf]  ;;  %v4298_v61 = vld [vmem:[#allocation12 + $0x68] sm:$0xf] }
  0x5b   :  { %451 = vmatpush.bf16.msra.mxu1 %v4259_v60  ;;  %v5726_v59 = vld [vmem:[#allocation12 + $0x148] sm:$0xf0]  ;;  %v4311_v60 = vor.u32 %v5702_v55, %v4310_v54  ;;  %v5699_v62 = vld [vmem:[#allocation12 + $0x70] sm:$0xf0]  ;;  %v4394_v0 = vld [vmem:[#allocation12 + $0x128] sm:$0xf] }
  0x5c   :  { %v4407_v63 = vor.u32 %v5726_v59, %v4406_v58  ;;  %v5723_v1 = vld [vmem:[#allocation12 + $0x130] sm:$0xf0]  ;;  %v4299_v2 = vor.u32 %v5699_v62, %v4298_v61  ;;  %v5768_v5 = vld [vmem:[#allocation15 + $0xf4] sm:$0xf0]  ;;  %v4508_v9 = vld [vmem:[#allocation15 + $0x78] sm:$0xf0] }
  0x5d   :  { %465 = vmatpush.bf16.msra.mxu2 %v4323_v50  ;;  %v4570_v4 = vld [vmem:[#allocation15 + $0xf0] sm:$0xf]  ;;  %v5696_v6 = vld [vmem:[#allocation12 + $0x58] sm:$0xf0]  ;;  %v4395_v10 = vor.u32 %v5723_v1, %v4394_v0  ;;  %v5766_v16 = vld [vmem:[#allocation15 + $0xe4] sm:$0xf0] }
  0x5e   :  { %433 = vmatpush.bf16.msra.mxu0 %v4243_v3  ;;  %681 = vmatpush.bf16.msra.mxu3 %v4351_v12  ;;  %v4286_v3 = vld [vmem:[#allocation12 + $0x50] sm:$0xf]  ;;  %v5720_v13 = vld [vmem:[#allocation12 + $0x118] sm:$0xf0]  ;;  %v5749_v17 = vld [vmem:[#allocation15 + $0x64] sm:$0xf] }
  0x5f   :  { %452 = vmatpush.bf16.msra.mxu1 %v4247_v7  ;;  %v4571_v7 = vor.u32 %v5768_v5, %v4570_v4  ;;  %v4382_v12 = vld [vmem:[#allocation12 + $0x110] sm:$0xf]  ;;  %v5693_v22 = vld [vmem:[#allocation12 + $0x40] sm:$0xf0]  ;;  %v4370_v26 = vld [vmem:[#allocation12 + $0xf8] sm:$0xf] }
  0x60   :  { %v4500_v20 = vld [vmem:[#allocation15 + $0x68] sm:$0xf0]  ;;  %v5717_v27 = vld [vmem:[#allocation12 + $0x100] sm:$0xf0]  ;;  %v4554_v28 = vld [vmem:[#allocation15 + $0xd0] sm:$0xf] }
  0x61   :  { %434 = vmatmul.bf16.vlgmr.msra.gmra.mxu0 %v6743_v11  ;;  %466 = vmatpush.bf16.msra.mxu2 %v4311_v60  ;;  %v4503_v23 = vor.u32 %v5749_v17, %v4500_v20  ;;  %v4262_v31 = vld [vmem:[#allocation12 + $0x20] sm:$0xf]  ;;  %v5690_v32 = vld [vmem:[#allocation12 + $0x28] sm:$0xf0]  ;;  %v4371_v35 = vor.u32 %v5717_v27, %v4370_v26  ;;  %v4250_v39 = vld [vmem:[#allocation12 + $0x8] sm:$0xf] }
  0x62   :  { %694 = vmatpush.bf16.msrb.mxu0 %v4427_v8  ;;  %453 = vmatmul.bf16.vlgmr.msra.gmra.mxu1 %v6743_v11  ;;  %v5751_v8 = vld [vmem:[#allocation15 + $0x74] sm:$0xf]  ;;  %v4358_v36 = vld [vmem:[#allocation12 + $0xe0] sm:$0xf]  ;;  %v5714_v37 = vld [vmem:[#allocation12 + $0xe8] sm:$0xf0]  ;;  %v4263_v38 = vor.u32 %v5690_v32, %v4262_v31 }
  0x63   :  { %682 = vmatpush.bf16.msra.mxu3 %v4339_v18  ;;  %713 = vmatpush.bf16.msrb.mxu1 %v4431_v51  ;;  %v4511_v14 = vor.u32 %v5751_v8, %v4508_v9  ;;  %v4287_v18 = vor.u32 %v5696_v6, %v4286_v3  ;;  %v5687_v40 = vld [vmem:[#allocation12 + $0x10] sm:$0xf0]  ;;  %v4359_v41 = vor.u32 %v5714_v37, %v4358_v36  ;;  %v5752_v43 = vld [vmem:[#allocation15 + $0x74] sm:$0xf0]  ;;  %v5767_v47 = vld [vmem:[#allocation15 + $0xf4] sm:$0xf] }
  0x64   :  { %v4506_v42 = vld [vmem:[#allocation15 + $0x70] sm:$0xf]  ;;  %v4251_v46 = vor.u32 %v5687_v40, %v4250_v39  ;;  %v4572_v48 = vld [vmem:[#allocation15 + $0xf8] sm:$0xf0]  ;;  %v4498_v52 = vld [vmem:[#allocation15 + $0x60] sm:$0xf] }
  0x65   :  { %467 = vmatpush.bf16.msra.mxu2 %v4299_v2  ;;  %v5711_v45 = vld [vmem:[#allocation12 + $0xd0] sm:$0xf0]  ;;  %v4507_v50 = vor.u32 %v5752_v43, %v4506_v42  ;;  %v5750_v53 = vld [vmem:[#allocation15 + $0x64] sm:$0xf0]  ;;  %v4575_v54 = vor.u32 %v5767_v47, %v4572_v48  ;;  %v5765_v55 = vld [vmem:[#allocation15 + $0xe4] sm:$0xf] }
  0x66   :  { %695 = vmatpush.bf16.msrb.mxu0 %v4415_v15  ;;  %683 = vmatmul.bf16.vlgmr.msra.gmra.mxu3 %v6747_v24  ;;  %v4562_v15 = vld [vmem:[#allocation15 + $0xe0] sm:$0xf]  ;;  %v4490_v58 = vld [vmem:[#allocation15 + $0x50] sm:$0xf]  ;;  %v5748_v59 = vld [vmem:[#allocation15 + $0x54] sm:$0xf0] }
  0x67   :  { %714 = vmatpush.bf16.msrb.mxu1 %v4419_v56  ;;  %983 = vmatpush.bf16.msrb.mxu3 %v4571_v7  ;;  %v4563_v19 = vor.u32 %v5766_v16, %v4562_v15  ;;  %v4564_v56 = vld [vmem:[#allocation15 + $0xe8] sm:$0xf0]  ;;  %v4491_v61 = vor.u32 %v5748_v59, %v4490_v58  ;;  %v5747_v62 = vld [vmem:[#allocation15 + $0x54] sm:$0xf]  ;;  %v4556_v2 = vld [vmem:[#allocation15 + $0xd8] sm:$0xf0] }
  0x68   :  { %v4567_v60 = vor.u32 %v5765_v55, %v4564_v56  ;;  %v5763_v0 = vld [vmem:[#allocation15 + $0xd4] sm:$0xf]  ;;  %v5746_v4 = vld [vmem:[#allocation15 + $0x44] sm:$0xf0]  ;;  %v4546_v5 = vld [vmem:[#allocation15 + $0xc0] sm:$0xf] }
  0x69   :  { %468 = vmatpush.bf16.msra.mxu2 %v4287_v18  ;;  %v4559_v3 = vor.u32 %v5763_v0, %v4556_v2  ;;  %v5762_v6 = vld [vmem:[#allocation15 + $0xc4] sm:$0xf0]  ;;  %v5745_v7 = vld [vmem:[#allocation15 + $0x44] sm:$0xf]  ;;  %v4484_v8 = vld [vmem:[#allocation15 + $0x48] sm:$0xf0] }
  0x6a   :  { %696 = vmatpush.bf16.msrb.mxu0 %v4403_v21  ;;  %v4274_v21 = vld [vmem:[#allocation12 + $0x38] sm:$0xf]  ;;  %v4547_v9 = vor.u32 %v5762_v6, %v4546_v5  ;;  %v5760_v17 = vld [vmem:[#allocation15 + $0xb4] sm:$0xf0]  ;;  %v4466_v26 = vld [vmem:[#allocation15 + $0x20] sm:$0xf] }
  0x6b   :  { %715 = vmatpush.bf16.msrb.mxu1 %v4407_v63  ;;  %984 = vmatpush.bf16.msrb.mxu3 %v4563_v19  ;;  %v4275_v29 = vor.u32 %v5693_v22, %v4274_v21  ;;  %v4492_v63 = vld [vmem:[#allocation15 + $0x58] sm:$0xf0]  ;;  %v4538_v15 = vld [vmem:[#allocation15 + $0xb0] sm:$0xf]  ;;  %v5743_v18 = vld [vmem:[#allocation15 + $0x34] sm:$0xf] }
  0x6c   :  { %v4495_v1 = vor.u32 %v5747_v62, %v4492_v63  ;;  %v4476_v19 = vld [vmem:[#allocation15 + $0x38] sm:$0xf0]  ;;  %v4539_v20 = vor.u32 %v5760_v17, %v4538_v15  ;;  %v5759_v22 = vld [vmem:[#allocation15 + $0xb4] sm:$0xf]  ;;  %v5742_v27 = vld [vmem:[#allocation15 + $0x24] sm:$0xf0] }
  0x6d   :  { %469 = vmatpush.bf16.msra.mxu2 %v4275_v29  ;;  %v4479_v21 = vor.u32 %v5743_v18, %v4476_v19  ;;  %v4467_v29 = vor.u32 %v5742_v27, %v4466_v26  ;;  %v5741_v31 = vld [vmem:[#allocation15 + $0x24] sm:$0xf]  ;;  %v4468_v32 = vld [vmem:[#allocation15 + $0x28] sm:$0xf0]  ;;  %v4458_v39 = vld [vmem:[#allocation15 + $0x10] sm:$0xf] }
  0x6e   :  { %697 = vmatpush.bf16.msrb.mxu0 %v4391_v25  ;;  %v4383_v25 = vor.u32 %v5720_v13, %v4382_v12  ;;  %v4548_v12 = vld [vmem:[#allocation15 + $0xc8] sm:$0xf0]  ;;  %v4474_v13 = vld [vmem:[#allocation15 + $0x30] sm:$0xf]  ;;  %v5757_v36 = vld [vmem:[#allocation15 + $0xa4] sm:$0xf] }
  0x6f   :  { %716 = vmatpush.bf16.msrb.mxu1 %v4395_v10  ;;  %v4487_v10 = vor.u32 %v5745_v7, %v4484_v8  ;;  %v4532_v37 = vld [vmem:[#allocation15 + $0xa8] sm:$0xf0]  ;;  %v5740_v40 = vld [vmem:[#allocation15 + $0x14] sm:$0xf0]  ;;  %v5755_v48 = vld [vmem:[#allocation15 + $0x94] sm:$0xf] }
  0x70   :  { %v4459_v42 = vor.u32 %v5740_v40, %v4458_v39  ;;  %v5756_v43 = vld [vmem:[#allocation15 + $0x94] sm:$0xf0]  ;;  %v5754_v56 = vld [vmem:[#allocation15 + $0x84] sm:$0xf0]  ;;  %v4452_v58 = vld [vmem:[#allocation15 + $0x8] sm:$0xf0] }
  0x71   :  { %439 = vmatmul.bf16.gmra.mxu0 %v6750_v33  ;;  %470 = vmatpush.bf16.msra.mxu2 %v4263_v38  ;;  %v4535_v38 = vor.u32 %v5757_v36, %v4532_v37  ;;  %v4516_v62 = vld [vmem:[#allocation15 + $0x88] sm:$0xf0]  ;;  %v4650_v0 = vld [vmem:[#allocation15 + $0x170] sm:$0xf]  ;;  %v4652_v5 = vld [vmem:[#allocation15 + $0x178] sm:$0xf0] }
  0x72   :  { %698 = vmatpush.bf16.msrb.mxu0 %v4379_v30  ;;  %458 = vmatmul.bf16.gmra.mxu1 %v6750_v33  ;;  %v5764_v30 = vld [vmem:[#allocation15 + $0xd4] sm:$0xf0]  ;;  %v4714_v2 = vld [vmem:[#allocation15 + $0x1f0] sm:$0xf]  ;;  %v5803_v7 = vld [vmem:[#allocation15 + $0x1f4] sm:$0xf] }
  0x73   :  { %717 = vmatpush.bf16.msrb.mxu1 %v4383_v25  ;;  %v4716_v8 = vld [vmem:[#allocation15 + $0x1f8] sm:$0xf0]  ;;  %v5785_v15 = vld [vmem:[#allocation15 + $0x164] sm:$0xf]  ;;  %v5784_v26 = vld [vmem:[#allocation15 + $0x154] sm:$0xf0] }
  0x74   :  { %v4700_v39 = vld [vmem:[#allocation15 + $0x1d8] sm:$0xf0] }
  0x75   :  { %471 = vmatpush.bf16.msra.mxu2 %v4251_v46 }
  0x76   :  { %699 = vmatpush.bf16.msrb.mxu0 %v4367_v34  ;;  %688 = vmatmul.bf16.gmra.mxu3 %v6754_v49  ;;  %v4555_v34 = vor.u32 %v5764_v30, %v4554_v28  ;;  %v4530_v28 = vld [vmem:[#allocation15 + $0xa0] sm:$0xf]  ;;  %v5758_v30 = vld [vmem:[#allocation15 + $0xa4] sm:$0xf0] }
  0x77   :  { %718 = vmatpush.bf16.msrb.mxu1 %v4371_v35  ;;  %v4471_v35 = vor.u32 %v5741_v31, %v4468_v32  ;;  %v5783_v32 = vld [vmem:[#allocation15 + $0x154] sm:$0xf] }
  0x78   :  { %985 = vmatpush.bf16.msrb.mxu3 %v4555_v34  ;;  %472 = vmatmul.bf16.vlgmr.msra.gmra.mxu2 %v6743_v11  ;;  %v4482_v11 = vld [vmem:[#allocation15 + $0x40] sm:$0xf]  ;;  %v4531_v34 = vor.u32 %v5758_v30, %v4530_v28  ;;  %v4698_v28 = vld [vmem:[#allocation15 + $0x1d0] sm:$0xf] }
  0x79   :  { %964 = vmatpush.bf16.msrb.mxu2 %v4507_v50  ;;  %v4524_v50 = vld [vmem:[#allocation15 + $0x98] sm:$0xf0] }
  0x7a   :  { %700 = vmatpush.bf16.msrb.mxu0 %v4355_v44  ;;  %v4346_v44 = vld [vmem:[#allocation12 + $0xc8] sm:$0xf] }
  0x7b   :  { %719 = vmatpush.bf16.msrb.mxu1 %v4359_v41  ;;  %v4347_v51 = vor.u32 %v5711_v45, %v4346_v44  ;;  %v4522_v41 = vld [vmem:[#allocation15 + $0x90] sm:$0xf]  ;;  %v5739_v44 = vld [vmem:[#allocation15 + $0x14] sm:$0xf]  ;;  %v4460_v45 = vld [vmem:[#allocation15 + $0x18] sm:$0xf0] }
  0x7c   :  { %986 = vmatpush.bf16.msrb.mxu3 %v4547_v9  ;;  %v4523_v46 = vor.u32 %v5756_v43, %v4522_v41  ;;  %v4463_v47 = vor.u32 %v5739_v44, %v4460_v45  ;;  %v6763_v9 = vld [vmem:[#allocation13] sm:$0x7]  ;;  %v5782_v43 = vld [vmem:[#allocation15 + $0x144] sm:$0xf0]  ;;  %v4690_v44 = vld [vmem:[#allocation15 + $0x1c0] sm:$0xf] }
  0x7d   :  { %v6766_v17 = vperm.slane %v6763_v9, 0 }
  0x7e   :  { %701 = vmatpush.bf16.msrb.mxu0 %v4343_v57  ;;  %v4499_v57 = vor.u32 %v5750_v53, %v4498_v52  ;;  %v4450_v52 = vld [vmem:[#allocation15] sm:$0xf]  ;;  %v5738_v53 = vld [vmem:[#allocation15 + $0x4] sm:$0xf0] }
  0x7f   :  { %720 = vmatpush.bf16.msrb.mxu1 %v4347_v51  ;;  %v4527_v51 = vor.u32 %v5755_v48, %v4524_v50  ;;  %v4451_v55 = vor.u32 %v5738_v53, %v4450_v52  ;;  %v5781_v48 = vld [vmem:[#allocation15 + $0x144] sm:$0xf]  ;;  %v4628_v50 = vld [vmem:[#allocation15 + $0x148] sm:$0xf0] }
  0x80   :  { %965 = vmatpush.bf16.msrb.mxu2 %v4499_v57  ;;  %987 = vmatpush.bf16.msrb.mxu3 %v4539_v20  ;;  %v5737_v57 = vld [vmem:[#allocation15 + $0x4] sm:$0xf]  ;;  %v4631_v52 = vor.u32 %v5781_v48, %v4628_v50  ;;  %v4596_v48 = vld [vmem:[#allocation15 + $0x108] sm:$0xf0] }
  0x81   :  { %702 = vmatmul.bf16.vlgmr.msrb.gmra.mxu0 %v6747_v24  ;;  %v5801_v20 = vld [vmem:[#allocation15 + $0x1e4] sm:$0xf] }
  0x82   :  { %1002 = vmatpush.bf16.msra.mxu0 %v4511_v14  ;;  %721 = vmatmul.bf16.vlgmr.msrb.gmra.mxu1 %v6747_v24  ;;  %v4483_v24 = vor.u32 %v5746_v4, %v4482_v11  ;;  %v5744_v14 = vld [vmem:[#allocation15 + $0x34] sm:$0xf0]  ;;  %v5787_v4 = vld [vmem:[#allocation15 + $0x174] sm:$0xf]  ;;  %v5797_v53 = vld [vmem:[#allocation15 + $0x1c4] sm:$0xf] }
  0x83   :  { %1021 = vmatpush.bf16.msra.mxu1 %v4575_v54  ;;  %v4475_v16 = vor.u32 %v5744_v14, %v4474_v13  ;;  %v4514_v54 = vld [vmem:[#allocation15 + $0x80] sm:$0xf]  ;;  %v5804_v11 = vld [vmem:[#allocation15 + $0x1f4] sm:$0xf0]  ;;  %v4655_v6 = vor.u32 %v5787_v4, %v4652_v5  ;;  %v5802_v14 = vld [vmem:[#allocation15 + $0x1e4] sm:$0xf0] }
  0x84   :  { %966 = vmatpush.bf16.msrb.mxu2 %v4491_v61  ;;  %988 = vmatpush.bf16.msrb.mxu3 %v4531_v34  ;;  %v4515_v59 = vor.u32 %v5754_v56, %v4514_v54  ;;  %v5753_v61 = vld [vmem:[#allocation15 + $0x84] sm:$0xf]  ;;  %v4636_v34 = vld [vmem:[#allocation15 + $0x158] sm:$0xf0]  ;;  %v4692_v54 = vld [vmem:[#allocation15 + $0x1c8] sm:$0xf0] }
  0x85   :  { %v4519_v63 = vor.u32 %v5753_v61, %v4516_v62  ;;  %v4618_v56 = vld [vmem:[#allocation15 + $0x130] sm:$0xf]  ;;  %v5796_v61 = vld [vmem:[#allocation15 + $0x1b4] sm:$0xf0]  ;;  %v5779_v62 = vld [vmem:[#allocation15 + $0x134] sm:$0xf] }
  0x86   :  { %1003 = vmatpush.bf16.msra.mxu0 %v4503_v23  ;;  %v4540_v23 = vld [vmem:[#allocation15 + $0xb8] sm:$0xf0] }
  0x87   :  { %1022 = vmatpush.bf16.msra.mxu1 %v4567_v60  ;;  %v4543_v25 = vor.u32 %v5759_v22, %v4540_v23  ;;  %v4455_v60 = vor.u32 %v5737_v57, %v4452_v58  ;;  %v6769_v22 = vperm.slane %v6763_v9, 1  ;;  %v5780_v57 = vld [vmem:[#allocation15 + $0x134] sm:$0xf0]  ;;  %v4682_v58 = vld [vmem:[#allocation15 + $0x1b0] sm:$0xf] }
  0x88   :  { %477 = vmatmul.bf16.gmra.mxu2 %v6750_v33  ;;  %v5761_v33 = vld [vmem:[#allocation15 + $0xc4] sm:$0xf]  ;;  %989 = vmatpush.bf16.msrb.mxu3 %v4523_v46  ;;  %v4684_v4 = vld [vmem:[#allocation15 + $0x1b8] sm:$0xf0] }
  0x89   :  { %967 = vmatpush.bf16.msrb.mxu2 %v4483_v24  ;;  %v4715_v24 = vor.u32 %v5804_v11, %v4714_v2  ;;  %v4683_v2 = vor.u32 %v5796_v61, %v4682_v58  ;;  %v5795_v11 = vld [vmem:[#allocation15 + $0x1b4] sm:$0xf] }
  0x8a   :  { %1004 = vmatpush.bf16.msra.mxu0 %v4495_v1  ;;  %v5788_v1 = vld [vmem:[#allocation15 + $0x174] sm:$0xf0] }
  0x8b   :  { %1023 = vmatpush.bf16.msra.mxu1 %v4559_v3  ;;  %v4651_v3 = vor.u32 %v5788_v1, %v4650_v0 }
  0x8c   :  { %990 = vmatpush.bf16.msrb.mxu3 %v4515_v59 }
  0x8d   :  { %968 = vmatpush.bf16.msrb.mxu2 %v4475_v16  ;;  %v4644_v16 = vld [vmem:[#allocation15 + $0x168] sm:$0xf0] }
  0x8e   :  { %1005 = vmatpush.bf16.msra.mxu0 %v4487_v10  ;;  %v4719_v10 = vor.u32 %v5803_v7, %v4716_v8  ;;  %v4647_v19 = vor.u32 %v5785_v15, %v4644_v16  ;;  %v5778_v7 = vld [vmem:[#allocation15 + $0x124] sm:$0xf0]  ;;  %v4674_v8 = vld [vmem:[#allocation15 + $0x1a0] sm:$0xf]  ;;  %v5793_v16 = vld [vmem:[#allocation15 + $0x1a4] sm:$0xf] }
  0x90   :  { %1292 = vmatpush.bf16.msra.mxu3 %v4715_v24  ;;  %v4687_v24 = vor.u32 %v5795_v11, %v4684_v4 }
  0x91   :  { %707 = vmatmul.bf16.gmra.mxu0 %v6754_v49  ;;  %969 = vmatpush.bf16.msrb.mxu2 %v4467_v29  ;;  %v5800_v29 = vld [vmem:[#allocation15 + $0x1d4] sm:$0xf0] }
  0x92   :  { %726 = vmatmul.bf16.gmra.mxu1 %v6754_v49  ;;  %v4551_v49 = vor.u32 %v5761_v33, %v4548_v12  ;;  %1006 = vmatpush.bf16.msra.mxu0 %v4479_v21  ;;  %v4642_v33 = vld [vmem:[#allocation15 + $0x160] sm:$0xf]  ;;  %v5786_v12 = vld [vmem:[#allocation15 + $0x164] sm:$0xf0]  ;;  %v4708_v21 = vld [vmem:[#allocation15 + $0x1e8] sm:$0xf0]  ;;  %v4699_v31 = vor.u32 %v5800_v29, %v4698_v28 }
  0x93   :  { %v4643_v13 = vor.u32 %v5786_v12, %v4642_v33  ;;  %v4711_v23 = vor.u32 %v5801_v20, %v4708_v21  ;;  %v5794_v12 = vld [vmem:[#allocation15 + $0x1a4] sm:$0xf0]  ;;  %v5776_v21 = vld [vmem:[#allocation15 + $0x114] sm:$0xf0]  ;;  %v5775_v29 = vld [vmem:[#allocation15 + $0x114] sm:$0xf] }
  0x94   :  { %1024 = vmatpush.bf16.msra.mxu1 %v4551_v49  ;;  %v4706_v49 = vld [vmem:[#allocation15 + $0x1e0] sm:$0xf] }
  0x95   :  { %970 = vmatpush.bf16.msrb.mxu2 %v4459_v42  ;;  %v4707_v18 = vor.u32 %v5802_v14, %v4706_v49  ;;  %v4626_v42 = vld [vmem:[#allocation15 + $0x140] sm:$0xf]  ;;  %v5777_v49 = vld [vmem:[#allocation15 + $0x124] sm:$0xf]  ;;  %v4675_v14 = vor.u32 %v5794_v12, %v4674_v8 }
  0x96   :  { %1007 = vmatpush.bf16.msra.mxu0 %v4471_v35  ;;  %v5799_v35 = vld [vmem:[#allocation15 + $0x1d4] sm:$0xf]  ;;  %v4627_v46 = vor.u32 %v5782_v43, %v4626_v42  ;;  %v5774_v42 = vld [vmem:[#allocation15 + $0x104] sm:$0xf0]  ;;  %v4658_v43 = vld [vmem:[#allocation15 + $0x180] sm:$0xf] }
  0x97   :  { %1293 = vmatpush.bf16.msra.mxu3 %v4707_v18  ;;  %v4703_v41 = vor.u32 %v5799_v35, %v4700_v39  ;;  %v4676_v18 = vld [vmem:[#allocation15 + $0x1a8] sm:$0xf0] }
  0x98   :  { %1025 = vmatpush.bf16.msra.mxu1 %v4543_v25  ;;  %v4634_v25 = vld [vmem:[#allocation15 + $0x150] sm:$0xf]  ;;  %v4679_v20 = vor.u32 %v5793_v16, %v4676_v18 }
  0x99   :  { %971 = vmatpush.bf16.msrb.mxu2 %v4451_v55  ;;  %v4635_v27 = vor.u32 %v5784_v26, %v4634_v25  ;;  %v4695_v55 = vor.u32 %v5797_v53, %v4692_v54  ;;  %v5792_v25 = vld [vmem:[#allocation15 + $0x194] sm:$0xf0]  ;;  %v5789_v54 = vld [vmem:[#allocation15 + $0x184] sm:$0xf] }
  0x9a   :  { %1008 = vmatpush.bf16.msra.mxu0 %v4463_v47  ;;  %v5798_v47 = vld [vmem:[#allocation15 + $0x1c4] sm:$0xf0] }
  0x9b   :  { %1294 = vmatpush.bf16.msra.mxu3 %v4699_v31  ;;  %v5791_v31 = vld [vmem:[#allocation15 + $0x194] sm:$0xf] }
  0x9c   :  { %1026 = vmatpush.bf16.msra.mxu1 %v4535_v38  ;;  %v4639_v38 = vor.u32 %v5783_v32, %v4636_v34 }
  0x9d   :  { %1273 = vmatpush.bf16.msra.mxu2 %v4651_v3 }
  0x9e   :  { %1009 = vmatpush.bf16.msra.mxu0 %v4455_v60  ;;  %v4619_v60 = vor.u32 %v5780_v57, %v4618_v56  ;;  %v4660_v57 = vld [vmem:[#allocation15 + $0x188] sm:$0xf0] }
  0x9f   :  { %v4663_v58 = vor.u32 %v5789_v54, %v4660_v57 }
  0xa0   :  { %1027 = vmatpush.bf16.msra.mxu1 %v4527_v51  ;;  %v4691_v51 = vor.u32 %v5798_v47, %v4690_v44  ;;  %v5773_v47 = vld [vmem:[#allocation15 + $0x104] sm:$0xf] }
  0xa1   :  { %1274 = vmatpush.bf16.msra.mxu2 %v4643_v13  ;;  %v4612_v13 = vld [vmem:[#allocation15 + $0x128] sm:$0xf0]  ;;  %v4599_v53 = vor.u32 %v5773_v47, %v4596_v48 }
  0xa2   :  { %1311 = vmatpush.bf16.msrb.mxu0 %v4655_v6  ;;  %1295 = vmatpush.bf16.msra.mxu3 %v4691_v51  ;;  %v4610_v6 = vld [vmem:[#allocation15 + $0x120] sm:$0xf]  ;;  %v4615_v15 = vor.u32 %v5777_v49, %v4612_v13 }
  0xa3   :  { %v4611_v33 = vor.u32 %v5778_v7, %v4610_v6 }
  0xa4   :  { %1028 = vmatpush.bf16.msra.mxu1 %v4519_v63  ;;  %v4620_v63 = vld [vmem:[#allocation15 + $0x138] sm:$0xf0] }
  0xa5   :  { %1275 = vmatpush.bf16.msra.mxu2 %v4635_v27  ;;  %v4623_v3 = vor.u32 %v5779_v62, %v4620_v63 }
  0xa6   :  { %1312 = vmatpush.bf16.msrb.mxu0 %v4647_v19  ;;  %1296 = vmatpush.bf16.msra.mxu3 %v4683_v2  ;;  %v4602_v19 = vld [vmem:[#allocation15 + $0x110] sm:$0xf] }
  0xa7   :  { %v4603_v27 = vor.u32 %v5776_v21, %v4602_v19 }
  0xa8   :  { %1330 = vmatpush.bf16.msrb.mxu1 %v4719_v10 }
  0xa9   :  { %1276 = vmatpush.bf16.msra.mxu2 %v4627_v46  ;;  %v5790_v46 = vld [vmem:[#allocation15 + $0x184] sm:$0xf0] }
  0xaa   :  { %1313 = vmatpush.bf16.msrb.mxu0 %v4639_v38  ;;  %1297 = vmatpush.bf16.msra.mxu3 %v4675_v14 }
  0xac   :  { %1331 = vmatpush.bf16.msrb.mxu1 %v4711_v23  ;;  %v4666_v23 = vld [vmem:[#allocation15 + $0x190] sm:$0xf] }
  0xad   :  { %1277 = vmatpush.bf16.msra.mxu2 %v4619_v60  ;;  %v4667_v28 = vor.u32 %v5792_v25, %v4666_v23  ;;  %v539_v60 = vld [vmem:[#allocation13 + $0x3] sm:$0x7] }
  0xae   :  { %1314 = vmatpush.bf16.msrb.mxu0 %v4631_v52  ;;  %v4659_v52 = vor.u32 %v5790_v46, %v4658_v43 }
  0xaf   :  { %1298 = vmatpush.bf16.msra.mxu3 %v4667_v28 }
  0xb0   :  { %1332 = vmatpush.bf16.msrb.mxu1 %v4703_v41  ;;  %v4594_v41 = vld [vmem:[#allocation15 + $0x100] sm:$0xf] }
  0xb1   :  { %1278 = vmatpush.bf16.msra.mxu2 %v4611_v33 }
  0xb2   :  { %1315 = vmatpush.bf16.msrb.mxu0 %v4623_v3  ;;  %v542_v3 = vperm.slane %v539_v60, 1 }
  0xb3   :  { %1299 = vmatpush.bf16.msra.mxu3 %v4659_v52 }
  0xb4   :  { %1333 = vmatpush.bf16.msrb.mxu1 %v4695_v55 }
  0xb5   :  { %1279 = vmatpush.bf16.msra.mxu2 %v4603_v27 }
  0xb6   :  { %1316 = vmatpush.bf16.msrb.mxu0 %v4615_v15 }
  0xb8   :  { %1334 = vmatpush.bf16.msrb.mxu1 %v4687_v24 }
  0xbc   :  { %1335 = vmatpush.bf16.msrb.mxu1 %v4679_v20  ;;  %v543_v20 = vperm.slane %v539_v60, 2 }
  0xde   :  { %v435_v30 = vpop.f32.mrf.mxu0 }
  0xdf   :  { %v436_v36 = vadd.f32 %v435_v30, %v6766_v17  ;;  %v454_v37 = vpop.f32.mrf.mxu1  ;;  %v4604_v30 = vld [vmem:[#allocation15 + $0x118] sm:$0xf0] }
  0xe0   :  { %v455_v40 = vadd.f32 %v454_v37, %v6769_v22  ;;  %v4607_v35 = vor.u32 %v5775_v29, %v4604_v30 }
  0xe2   :  { %v483_v45 = vpack.c.bf16 %v455_v40, %v436_v36  ;;  %v4668_v36 = vld [vmem:[#allocation15 + $0x198] sm:$0xf0]  ;;  %1317 = vmatpush.bf16.msrb.mxu0 %v4607_v35 }
  0xe3   :  { %v4671_v38 = vor.u32 %v5791_v31, %v4668_v36  ;;  %v294_v31 = vperm.slane %v6763_v9, 2 }
  0xe4   :  { %491 = vst [vmem:[#allocation2] sm:$0xff] %v483_v45  ;;  %v4595_v45 = vor.u32 %v5774_v42, %v4594_v41 }
  0xe5   :  { %1336 = vmatpush.bf16.msrb.mxu1 %v4671_v38 }
  0xe6   :  { %v437_v59 = vpop.f32.mrf.mxu0  ;;  %1280 = vmatpush.bf16.msra.mxu2 %v4595_v45  ;;  %1318 = vmatpush.bf16.msrb.mxu0 %v4599_v53 }
  0xe7   :  { %v438_v0 = vadd.f32 %v437_v59, %v6766_v17  ;;  %v456_v1 = vpop.f32.mrf.mxu1 }
  0xe8   :  { %v457_v5 = vadd.f32 %v456_v1, %v6769_v22  ;;  %v541_v1 = vperm.slane %v539_v60, 0 }
  0xe9   :  { %v684_v61 = vpop.f32.mrf.mxu3  ;;  %1337 = vmatpush.bf16.msrb.mxu1 %v4663_v58 }
  0xea   :  { %v485_v10 = vpack.c.bf16 %v457_v5, %v438_v0  ;;  %v685_v11 = vadd.f32 %v684_v61, %v541_v1 }
  0xeb   :  { %v4434_v39 = vld [vmem:[#allocation2] sm:$0xf]  ;;  %v5733_v40 = vld [vmem:[#allocation2 + $0x4] sm:$0xf] }
  0xec   :  { %493 = vst [vmem:[#allocation2 + $0xc] sm:$0xff] %v485_v10 }
  0xee   :  { %v440_v26 = vpop.f32.mrf.mxu0 }
  0xef   :  { %v441_v32 = vadd.f32 %v440_v26, %v6766_v17  ;;  %v459_v34 = vpop.f32.mrf.mxu1 }
  0xf0   :  { %v460_v37 = vadd.f32 %v459_v34, %v6769_v22 }
  0xf1   :  { %v686_v24 = vpop.f32.mrf.mxu3 }
  0xf2   :  { %v487_v44 = vpack.c.bf16 %v460_v37, %v441_v32  ;;  %v687_v49 = vadd.f32 %v686_v24, %v541_v1 }
  0xf3   :  { %v5734_v50 = vld [vmem:[#allocation2 + $0x8] sm:$0xf0]  ;;  %v4436_v51 = vld [vmem:[#allocation2 + $0xc] sm:$0xf0] }
  0xf4   :  { %495 = vst [vmem:[#allocation2 + $0x18] sm:$0xff] %v487_v44  ;;  %v4435_v55 = vor.u32 %v5734_v50, %v4434_v39  ;;  %v4439_v56 = vor.u32 %v5733_v40, %v4436_v51 }
  0xf6   :  { %972 = vmatmul.bf16.vlgmr.msrb.gmra.mxu2 %v4435_v55  ;;  %991 = vmatmul.bf16.vlgmr.msrb.gmra.mxu3 %v4439_v56  ;;  %v442_v59 = vpop.f32.mrf.mxu0 }
  0xf7   :  { %1010 = vmatmul.bf16.vlgmr.msra.gmra.mxu0 %v4435_v55  ;;  %1029 = vmatmul.bf16.vlgmr.msra.gmra.mxu1 %v4439_v56  ;;  %v443_v62 = vadd.f32 %v442_v59, %v6766_v17  ;;  %v461_v63 = vpop.f32.mrf.mxu1 }
  0xf8   :  { %v462_v0 = vadd.f32 %v461_v63, %v6769_v22 }
  0xf9   :  { %v689_v15 = vpop.f32.mrf.mxu3 }
  0xfa   :  { %v489_v2 = vpack.c.bf16 %v462_v0, %v443_v62  ;;  %v690_v16 = vadd.f32 %v689_v15, %v541_v1 }
  0xfb   :  { %v4442_v7 = vld [vmem:[#allocation2 + $0x18] sm:$0xf]  ;;  %v5735_v8 = vld [vmem:[#allocation2 + $0x1c] sm:$0xf]  ;;  %v473_v37 = vpop.f32.mrf.mxu2 }
  0xfc   :  { %497 = vst [vmem:[#allocation2 + $0x24] sm:$0xff] %v489_v2  ;;  %v474_v40 = vadd.f32 %v473_v37, %v294_v31 }
  0xfe   :  { %v703_v4 = vpop.f32.mrf.mxu0  ;;  %v484_v42 = vpack.c.bf16 %v474_v40, %v474_v40 }
  0xff   :  { %v704_v5 = vadd.f32 %v703_v4, %v542_v3  ;;  %v722_v28 = vpop.f32.mrf.mxu1  ;;  %v6598_v4 = vmov 0  }
 0x100   :  { %v723_v32 = vadd.f32 %v722_v28, %v543_v20  ;;  %492 = vst [vmem:[#allocation2 + $0x8] sm:$0xf] %v484_v42 }
 0x101   :  { %v732_v6 = vpack.c.bf16 %v704_v5, %v685_v11  ;;  %v691_v34 = vpop.f32.mrf.mxu3  ;;  %242 = vst [vmem:[#allocation3 + $0x38] sm:$0xf] %v6598_v4 }
 0x102   :  { %v733_v35 = vpack.c.bf16 %v723_v32, %v723_v32  ;;  %v692_v38 = vadd.f32 %v691_v34, %v541_v1  ;;  %243 = vst [vmem:[#allocation3 + $0x3c] sm:$0xf] %v6598_v4 }
 0x103   :  { %740 = vst [vmem:[#allocation2 + $0x30] sm:$0xff] %v732_v6  ;;  %v5736_v10 = vld [vmem:[#allocation2 + $0x20] sm:$0xf0]  ;;  %v4444_v33 = vld [vmem:[#allocation2 + $0x24] sm:$0xf0]  ;;  %v475_v45 = vpop.f32.mrf.mxu2 }
 0x104   :  { %v4443_v12 = vor.u32 %v5736_v10, %v4442_v7  ;;  %v4447_v17 = vor.u32 %v5735_v8, %v4444_v33  ;;  %741 = vst [vmem:[#allocation2 + $0x38] sm:$0xf] %v733_v35  ;;  %v476_v46 = vadd.f32 %v475_v45, %v294_v31 }
 0x105   :  { %236 = vst [vmem:[#allocation3 + $0x20] sm:$0xf] %v6598_v4 }
 0x106   :  { %977 = vmatmul.bf16.gmra.mxu2 %v4443_v12  ;;  %996 = vmatmul.bf16.gmra.mxu3 %v4447_v17  ;;  %v705_v22 = vpop.f32.mrf.mxu0  ;;  %v486_v48 = vpack.c.bf16 %v476_v46, %v476_v46  ;;  %237 = vst [vmem:[#allocation3 + $0x24] sm:$0xf] %v6598_v4 }
 0x107   :  { %1015 = vmatmul.bf16.gmra.mxu0 %v4443_v12  ;;  %1034 = vmatmul.bf16.gmra.mxu1 %v4447_v17  ;;  %v706_v13 = vadd.f32 %v705_v22, %v542_v3  ;;  %v724_v43 = vpop.f32.mrf.mxu1  ;;  %238 = vst [vmem:[#allocation3 + $0x28] sm:$0xf] %v6598_v4 }
 0x108   :  { %v725_v44 = vadd.f32 %v724_v43, %v543_v20  ;;  %494 = vst [vmem:[#allocation2 + $0x14] sm:$0xf] %v486_v48 }
 0x109   :  { %v734_v14 = vpack.c.bf16 %v706_v13, %v687_v49  ;;  %239 = vst [vmem:[#allocation3 + $0x2c] sm:$0xf] %v6598_v4  ;;  %v5814_v12 = vld [vmem:[#allocation3 + $0x38] sm:$0xff] }
 0x10a   :  { %v4578_v23 = vld [vmem:[#allocation2 + $0x30] sm:$0xf]  ;;  %v5769_v26 = vld [vmem:[#allocation2 + $0x34] sm:$0xf]  ;;  %v735_v9 = vpack.c.bf16 %v725_v44, %v725_v44  ;;  %240 = vst [vmem:[#allocation3 + $0x30] sm:$0xf] %v6598_v4  ;;  %1461 = vmatpush.bf16.xpose.msrb.mxu2 %v5814_v12 }
 0x10b   :  { %742 = vst [vmem:[#allocation2 + $0x3c] sm:$0xff] %v734_v14  ;;  %v478_v58 = vpop.f32.mrf.mxu2  ;;  %v5840_v17 = vld [vmem:[#allocation3 + $0x38] sm:$0xff] }
 0x10c   :  { %743 = vst [vmem:[#allocation2 + $0x44] sm:$0xf] %v735_v9  ;;  %v479_v59 = vadd.f32 %v478_v58, %v294_v31  ;;  %1839 = vmatpush.bf16.xpose.msra.mxu1 %v5840_v17 }
 0x10d   :  { %241 = vst [vmem:[#allocation3 + $0x34] sm:$0xf] %v6598_v4  ;;  %v5811_v43 = vld [vmem:[#allocation3 + $0x20] sm:$0xff] }
 0x10e   :  { %v708_v18 = vpop.f32.mrf.mxu0  ;;  %v488_v60 = vpack.c.bf16 %v479_v59, %v479_v59  ;;  %244 = vst [vmem:[#allocation4 + $0x20] sm:$0xf] %v6598_v4  ;;  %v5837_v44 = vld [vmem:[#allocation3 + $0x20] sm:$0xff] }
 0x10f   :  { %v709_v19 = vadd.f32 %v708_v18, %v542_v3  ;;  %v727_v53 = vpop.f32.mrf.mxu1  ;;  %245 = vst [vmem:[#allocation4 + $0x24] sm:$0xf] %v6598_v4 }
 0x110   :  { %v728_v56 = vadd.f32 %v727_v53, %v543_v20  ;;  %496 = vst [vmem:[#allocation2 + $0x20] sm:$0xf] %v488_v60 }
 0x111   :  { %v736_v21 = vpack.c.bf16 %v709_v19, %v690_v16  ;;  %246 = vst [vmem:[#allocation4 + $0x28] sm:$0xf] %v6598_v4 }
 0x112   :  { %v5770_v25 = vld [vmem:[#allocation2 + $0x38] sm:$0xf0]  ;;  %v4580_v27 = vld [vmem:[#allocation2 + $0x3c] sm:$0xf0]  ;;  %v737_v57 = vpack.c.bf16 %v728_v56, %v728_v56  ;;  %247 = vst [vmem:[#allocation4 + $0x2c] sm:$0xf] %v6598_v4 }
 0x113   :  { %744 = vst [vmem:[#allocation2 + $0x48] sm:$0xff] %v736_v21  ;;  %v4579_v29 = vor.u32 %v5770_v25, %v4578_v23  ;;  %v4583_v30 = vor.u32 %v5769_v26, %v4580_v27  ;;  %v480_v0 = vpop.f32.mrf.mxu2 }
 0x114   :  { %745 = vst [vmem:[#allocation2 + $0x50] sm:$0xf] %v737_v57  ;;  %v481_v1 = vadd.f32 %v480_v0, %v294_v31  ;;  %v5813_v19 = vld [vmem:[#allocation3 + $0x30] sm:$0xff] }
 0x115   :  { %248 = vst [vmem:[#allocation4 + $0x30] sm:$0xf] %v6598_v4  ;;  %1462 = vmatpush.bf16.xpose.msrb.mxu2 %v5813_v19 }
 0x116   :  { %1281 = vmatmul.bf16.vlgmr.msra.gmra.mxu2 %v4579_v29  ;;  %1300 = vmatmul.bf16.vlgmr.msra.gmra.mxu3 %v4583_v30  ;;  %v710_v36 = vpop.f32.mrf.mxu0  ;;  %v490_v2 = vpack.c.bf16 %v481_v1, %v481_v1  ;;  %249 = vst [vmem:[#allocation4 + $0x34] sm:$0xf] %v6598_v4  ;;  %v5819_v46 = vld [vmem:[#allocation4 + $0x20] sm:$0xff] }
 0x117   :  { %1319 = vmatmul.bf16.vlgmr.msrb.gmra.mxu0 %v4579_v29  ;;  %1338 = vmatmul.bf16.vlgmr.msrb.gmra.mxu1 %v4583_v30  ;;  %v711_v39 = vadd.f32 %v710_v36, %v542_v3  ;;  %v729_v61 = vpop.f32.mrf.mxu1  ;;  %250 = vst [vmem:[#allocation4 + $0x38] sm:$0xf] %v6598_v4  ;;  %v5812_v29 = vld [vmem:[#allocation3 + $0x28] sm:$0xff] }
 0x118   :  { %v730_v62 = vadd.f32 %v729_v61, %v543_v20  ;;  %498 = vst [vmem:[#allocation2 + $0x2c] sm:$0xf] %v490_v2  ;;  %v5839_v20 = vld [vmem:[#allocation3 + $0x30] sm:$0xff]  ;;  %v5838_v30 = vld [vmem:[#allocation3 + $0x28] sm:$0xff] }
 0x119   :  { %v738_v41 = vpack.c.bf16 %v711_v39, %v692_v38  ;;  %251 = vst [vmem:[#allocation4 + $0x3c] sm:$0xf] %v6598_v4  ;;  %1840 = vmatpush.bf16.xpose.msra.mxu1 %v5839_v20  ;;  %v5820_v42 = vld [vmem:[#allocation4 + $0x28] sm:$0xff] }
 0x11a   :  { %v4586_v47 = vld [vmem:[#allocation2 + $0x48] sm:$0xf]  ;;  %v5771_v51 = vld [vmem:[#allocation2 + $0x4c] sm:$0xf]  ;;  %v739_v63 = vpack.c.bf16 %v730_v62, %v730_v62 }
 0x11b   :  { %746 = vst [vmem:[#allocation2 + $0x54] sm:$0xff] %v738_v41 }
 0x11c   :  { %747 = vst [vmem:[#allocation2 + $0x5c] sm:$0xf] %v739_v63 }
 0x11d   :  { %v5821_v36 = vld [vmem:[#allocation4 + $0x30] sm:$0xff]  ;;  %1463 = vmatpush.bf16.xpose.msrb.mxu2 %v5812_v29 }
 0x120   :  { %v5822_v32 = vld [vmem:[#allocation4 + $0x38] sm:$0xff] }
 0x121   :  { %1583 = vmatpush.bf16.msrb.mxu3 %v5822_v32  ;;  %1841 = vmatpush.bf16.xpose.msra.mxu1 %v5838_v30  ;;  %v5848_v12 = vld [vmem:[#allocation4 + $0x38] sm:$0xff] }
 0x122   :  { %v5772_v50 = vld [vmem:[#allocation2 + $0x50] sm:$0xf0]  ;;  %v4588_v52 = vld [vmem:[#allocation2 + $0x54] sm:$0xf0] }
 0x123   :  { %v4587_v54 = vor.u32 %v5772_v50, %v4586_v47  ;;  %v4591_v55 = vor.u32 %v5771_v51, %v4588_v52 }
 0x125   :  { %1584 = vmatpush.bf16.msrb.mxu3 %v5821_v36  ;;  %1464 = vmatpush.bf16.xpose.msrb.mxu2 %v5811_v43  ;;  %v4726_v36 = vld [vmem:[#allocation2 + $0x20] sm:$0xf] }
 0x126   :  { %1286 = vmatmul.bf16.gmra.mxu2 %v4587_v54  ;;  %1305 = vmatmul.bf16.gmra.mxu3 %v4591_v55 }
 0x127   :  { %1324 = vmatmul.bf16.gmra.mxu0 %v4587_v54  ;;  %1343 = vmatmul.bf16.gmra.mxu1 %v4591_v55 }
 0x129   :  { %1585 = vmatpush.bf16.msrb.mxu3 %v5820_v42  ;;  %1842 = vmatpush.bf16.xpose.msra.mxu1 %v5837_v44  ;;  %v1480_v42 = vld [vmem:[#allocation10] sm:$0xff] }
 0x12a   :  { %v1481_v44 = vunpack.c.0.s8 %v1480_v42 }
 0x12d   :  { %1586 = vmatpush.bf16.msrb.mxu3 %v5819_v46 }
 0x174   :  { %v1011_v3 = vpop.f32.mrf.mxu0  ;;  %v1030_v11 = vpop.f32.mrf.mxu1 }
 0x175   :  { %v1031_v8 = vadd.f32 %v1030_v11, %v1011_v3 }
 0x179   :  { %v973_v5 = vpop.f32.mrf.mxu2  ;;  %v992_v24 = vpop.f32.mrf.mxu3 }
 0x17a   :  { %v993_v13 = vadd.f32 %v992_v24, %v973_v5 }
 0x17c   :  { %v1013_v6 = vpop.f32.mrf.mxu0  ;;  %v1032_v7 = vpop.f32.mrf.mxu1 }
 0x17d   :  { %v1033_v10 = vadd.f32 %v1032_v7, %v1013_v6 }
 0x17f   :  { %v6058_v33 = vpack.c.bf16 %v1033_v10, %v1031_v8 }
 0x181   :  { %6059 = vst [vmem:[#allocation4] sm:$0xff] %v6058_v33   ;;  %v975_v22 = vpop.f32.mrf.mxu2  ;;  %v994_v49 = vpop.f32.mrf.mxu3 }
 0x182   :  { %v995_v14 = vadd.f32 %v994_v49, %v975_v22 }
 0x184   :  { %v6048_v15 = vpack.c.bf16 %v995_v14, %v993_v13  ;;  %v1016_v16 = vpop.f32.mrf.mxu0  ;;  %v1035_v18 = vpop.f32.mrf.mxu1  ;;  %v5847_v13 = vld [vmem:[#allocation4 + $0x30] sm:$0xff]  ;;  %v5846_v14 = vld [vmem:[#allocation4 + $0x28] sm:$0xff] }
 0x185   :  { %v1036_v27 = vadd.f32 %v1035_v18, %v1016_v16  ;;  %v5845_v18 = vld [vmem:[#allocation4 + $0x20] sm:$0xff] }
 0x186   :  { %6049 = vst [vmem:[#allocation3] sm:$0xff] %v6048_v15  }
 0x188   :  { %v5815_v17 = vld [vmem:[#allocation4] sm:$0xff] }
 0x189   :  { %v978_v21 = vpop.f32.mrf.mxu2  ;;  %v997_v23 = vpop.f32.mrf.mxu3  ;;  %v5841_v32 = vld [vmem:[#allocation4] sm:$0xff] }
 0x18a   :  { %v998_v37 = vadd.f32 %v997_v23, %v978_v21  ;;  %v4826_v23 = vld [vmem:[#allocation2 + $0x38] sm:$0xf] }
 0x18c   :  { %v1018_v25 = vpop.f32.mrf.mxu0  ;;  %v1037_v26 = vpop.f32.mrf.mxu1 }
 0x18d   :  { %v1038_v28 = vadd.f32 %v1037_v26, %v1018_v25  ;;  %v5807_v20 = vld [vmem:[#allocation3] sm:$0xff] }
 0x18e   :  { %v5833_v21 = vld [vmem:[#allocation3] sm:$0xff] }
 0x18f   :  { %v6063_v31 = vpack.c.bf16 %v1038_v28, %v1036_v27  ;;  %v5831_v25 = vld [vmem:[#allocation2 + $0x40] sm:$0xf0]  ;;  %v4722_v27 = vld [vmem:[#allocation2 + $0x8] sm:$0xf]  ;;  %v5805_v28 = vld [vmem:[#allocation2 + $0x10] sm:$0xf0] }
 0x190   :  { %v4827_v29 = vor.u32 %v5831_v25, %v4826_v23  ;;  %v4723_v30 = vor.u32 %v5805_v28, %v4722_v27 }
 0x191   :  { %6126 = vst [vmem:[#allocation4 + $0x8] sm:$0xff] %v6063_v31   ;;  %v980_v34 = vpop.f32.mrf.mxu2  ;;  %v999_v35 = vpop.f32.mrf.mxu3 }
 0x192   :  { %v1000_v38 = vadd.f32 %v999_v35, %v980_v34  ;;  %v4830_v34 = vld [vmem:[#allocation2 + $0x50] sm:$0xf]  ;;  %v5832_v35 = vld [vmem:[#allocation2 + $0x58] sm:$0xf0] }
 0x194   :  { %v6053_v39 = vpack.c.bf16 %v1000_v38, %v998_v37  ;;  %v1320_v40 = vpop.f32.mrf.mxu0  ;;  %v1339_v41 = vpop.f32.mrf.mxu1  ;;  %v5806_v37 = vld [vmem:[#allocation2 + $0x28] sm:$0xf0]  ;;  %v4831_v38 = vor.u32 %v5832_v35, %v4830_v34 }
 0x195   :  { %v1340_v50 = vadd.f32 %v1339_v41, %v1320_v40  ;;  %v1858_v40 = vld [vmem:[#allocation10 + $0x8] sm:$0xff] }
 0x196   :  { %6125 = vst [vmem:[#allocation3 + $0x8] sm:$0xff] %v6053_v39   ;;  %v4727_v39 = vor.u32 %v5806_v37, %v4726_v36  ;;  %v1859_v41 = vunpack.c.0.s8 %v1858_v40 }
 0x198   :  { %v5816_v33 = vld [vmem:[#allocation4 + $0x8] sm:$0xff]  ;;  %v1863_v43 = vcvt.s32.f32 %v1859_v41 }
 0x199   :  { %v1282_v9 = vpop.f32.mrf.mxu2  ;;  %v1301_v45 = vpop.f32.mrf.mxu3  ;;  %v5842_v31 = vld [vmem:[#allocation4 + $0x8] sm:$0xff] }
 0x19a   :  { %v1302_v55 = vadd.f32 %v1301_v45, %v1282_v9  ;;  %vm1867_vm0 = vcmp.gt.f32.partialorder %v1863_v43, 0.0  ;;  %v1860_v9 = vunpack.c.1.s8 %v1858_v40  ;;  %v1485_v45 = vcvt.s32.f32 %v1481_v44 }
 0x19c   :  { %v1322_v47 = vpop.f32.mrf.mxu0  ;;  %v1341_v48 = vpop.f32.mrf.mxu1  ;;  %vm1489_vm1 = vcmp.gt.f32.partialorder %v1485_v45, 0.0  ;;  %v5830_v45 = vld [vmem:[#allocation16 + $0x38] sm:$0xff] }
 0x19d   :  { %v1342_v51 = vadd.f32 %v1341_v48, %v1322_v47  ;;  %v5808_v15 = vld [vmem:[#allocation3 + $0x8] sm:$0xff]  ;;  %v1864_v48 = vcvt.s32.f32 %v1860_v9  ;;  %1720 = vmatpush.bf16.msra.mxu0 %v5830_v45 }
 0x19e   :  { %v5834_v16 = vld [vmem:[#allocation3 + $0x8] sm:$0xff] }
 0x19f   :  { %v6078_v52 = vpack.c.bf16 %v1342_v51, %v1340_v50  ;;  %v1482_v50 = vunpack.c.1.s8 %v1480_v42  ;;  %vm1868_vm2 = vcmp.gt.f32.partialorder %v1864_v48, 0.0  ;;  %v5827_v48 = vld [vmem:[#allocation16 + $0x20] sm:$0xff] }
 0x1a1   :  { %6129 = vst [vmem:[#allocation4 + $0x10] sm:$0xff] %v6078_v52   ;;  %v1284_v53 = vpop.f32.mrf.mxu2  ;;  %v1303_v54 = vpop.f32.mrf.mxu3 }
 0x1a2   :  { %v1304_v56 = vadd.f32 %v1303_v54, %v1284_v53  ;;  %v1486_v53 = vcvt.s32.f32 %v1482_v50  ;;  %v5826_v50 = vld [vmem:[#allocation16 + $0x18] sm:$0xff] }
 0x1a4   :  { %v6068_v57 = vpack.c.bf16 %v1304_v56, %v1302_v55  ;;  %v1325_v58 = vpop.f32.mrf.mxu0  ;;  %v1344_v59 = vpop.f32.mrf.mxu1  ;;  %v1861_v56 = vunpack.c.2.s8 %v1858_v40  ;;  %vm1490_vm3 = vcmp.gt.f32.partialorder %v1486_v53, 0.0  ;;  %v5824_v53 = vld [vmem:[#allocation16 + $0x8] sm:$0xff] }
 0x1a5   :  { %v1345_v0 = vadd.f32 %v1344_v59, %v1325_v58 }
 0x1a6   :  { %6127 = vst [vmem:[#allocation3 + $0x10] sm:$0xff] %v6068_v57   ;;  %v1483_v57 = vunpack.c.2.s8 %v1480_v42  ;;  %v1865_v59 = vcvt.s32.f32 %v1861_v56  ;;  %v5823_v56 = vld [vmem:[#allocation16] sm:$0xff] }
 0x1a8   :  { %v5817_v7 = vld [vmem:[#allocation4 + $0x10] sm:$0xff]  ;;  %vm1869_vm4 = vcmp.gt.f32.partialorder %v1865_v59, 0.0 }
 0x1a9   :  { %v1287_v60 = vpop.f32.mrf.mxu2  ;;  %v1306_v61 = vpop.f32.mrf.mxu3  ;;  %v5843_v26 = vld [vmem:[#allocation4 + $0x10] sm:$0xff] }
 0x1aa   :  { %v1307_v4 = vadd.f32 %v1306_v61, %v1287_v60  ;;  %v1487_v61 = vcvt.s32.f32 %v1483_v57  ;;  %v6599_v57 = vmov 0.0  }
 0x1ac   :  { %v1327_v62 = vpop.f32.mrf.mxu0  ;;  %v1346_v63 = vpop.f32.mrf.mxu1  ;;  %vm1491_vm5 = vcmp.gt.f32.partialorder %v1487_v61, 0.0 }
 0x1ad   :  { %v1347_v1 = vadd.f32 %v1346_v63, %v1327_v62  ;;  %v5809_v22 = vld [vmem:[#allocation3 + $0x10] sm:$0xff]  ;;  %v1484_v63 = vunpack.c.3.s8 %v1480_v42 }
 0x1ae   :  { %v5835_v49 = vld [vmem:[#allocation3 + $0x10] sm:$0xff] }
 0x1af   :  { %v6083_v2 = vpack.c.bf16 %v1347_v1, %v1345_v0 }
 0x1b1   :  { %6130 = vst [vmem:[#allocation4 + $0x18] sm:$0xff] %v6083_v2   ;;  %v1289_v3 = vpop.f32.mrf.mxu2  ;;  %v1308_v11 = vpop.f32.mrf.mxu3 }
 0x1b2   :  { %v1309_v5 = vadd.f32 %v1308_v11, %v1289_v3  ;;  %v1488_v3 = vcvt.s32.f32 %v1484_v63  ;;  %v1862_v11 = vunpack.c.3.s8 %v1858_v40 }
 0x1b4   :  { %v6073_v24 = vpack.c.bf16 %v1309_v5, %v1307_v4  ;;  %vm1492_vm6 = vcmp.gt.f32.partialorder %v1488_v3, 0.0  ;;  %v1866_v5 = vcvt.s32.f32 %v1862_v11  ;;  %v5855_v11 = vld [vmem:[#allocation16 + $0x70] sm:$0xff] }
 0x1b6   :  { %6128 = vst [vmem:[#allocation3 + $0x18] sm:$0xff] %v6073_v24   ;;  %vm1870_vm7 = vcmp.gt.f32.partialorder %v1866_v5, 0.0 }
 0x1b8   :  { %v5818_v6 = vld [vmem:[#allocation4 + $0x18] sm:$0xff] }
 0x1b9   :  { %1587 = vmatpush.bf16.msrb.mxu3 %v5818_v6  ;;  %v5844_v19 = vld [vmem:[#allocation4 + $0x18] sm:$0xff] }
 0x1bd   :  { %v5810_v8 = vld [vmem:[#allocation3 + $0x18] sm:$0xff]  ;;  %1588 = vmatpush.bf16.msrb.mxu3 %v5817_v7 }
 0x1be   :  { %v5836_v10 = vld [vmem:[#allocation3 + $0x18] sm:$0xff]  ;;  %1465 = vmatpush.bf16.xpose.msrb.mxu2 %v5810_v8 }
 0x1bf   :  { %1843 = vmatpush.bf16.xpose.msra.mxu1 %v5836_v10 }
 0x1c1   :  { %1589 = vmatpush.bf16.msrb.mxu3 %v5816_v33 }
 0x1c5   :  { %1590 = vmatpush.bf16.msrb.mxu3 %v5815_v17 }
 0x1c6   :  { %1466 = vmatpush.bf16.xpose.msrb.mxu2 %v5809_v22 }
 0x1c7   :  { %1844 = vmatpush.bf16.xpose.msra.mxu1 %v5835_v49 }
 0x1c9   :  { %1961 = vmatpush.bf16.msra.mxu3 %v5848_v12 }
 0x1cd   :  { %1962 = vmatpush.bf16.msra.mxu3 %v5847_v13 }
 0x1ce   :  { %1467 = vmatpush.bf16.xpose.msrb.mxu2 %v5808_v15 }
 0x1cf   :  { %1845 = vmatpush.bf16.xpose.msra.mxu1 %v5834_v16 }
 0x1d1   :  { %1963 = vmatpush.bf16.msra.mxu3 %v5846_v14 }
 0x1d5   :  { %1964 = vmatpush.bf16.msra.mxu3 %v5845_v18 }
 0x1d6   :  { %1468 = vmatpush.bf16.xpose.msrb.mxu2 %v5807_v20 }
 0x1d7   :  { %1846 = vmatpush.bf16.xpose.msra.mxu1 %v5833_v21 }
 0x1d9   :  { %1965 = vmatpush.bf16.msra.mxu3 %v5844_v19 }
 0x1dd   :  { %1966 = vmatpush.bf16.msra.mxu3 %v5843_v26  ;;  %1469 = vmatmul.bf16.vlgmr.msrb.gmra.mxu2 %v4723_v30 }
 0x1de   :  { %1847 = vmatmul.bf16.vlgmr.msra.gmra.mxu1 %v4827_v29 }
 0x1e1   :  { %1967 = vmatpush.bf16.msra.mxu3 %v5842_v31 }
 0x1e5   :  { %1968 = vmatpush.bf16.msra.mxu3 %v5841_v32 }
 0x1ed   :  { %1474 = vmatmul.bf16.gmra.mxu2 %v4727_v39 }
 0x1ee   :  { %1852 = vmatmul.bf16.gmra.mxu1 %v4831_v38 }
 0x25b   :  { %v1848_v46 = vpop.f32.mrf.mxu1 }
 0x25c   :  { %v1871_v47 = vsel %vm1867_vm0, %v1848_v46, -1e+30  ;;  %v5829_v46 = vld [vmem:[#allocation16 + $0x30] sm:$0xff] }
 0x25d   :  { %1875 = vmax.xlane.f32.xlu2 %v1871_v47  ;;  %1721 = vmatpush.bf16.msra.mxu0 %v5829_v46 }
 0x260   :  { %v1470_v51 = vpop.f32.mrf.mxu2 }
 0x261   :  { %v1493_v52 = vsel %vm1489_vm1, %v1470_v51, -1e+30 }
 0x262   :  { %1497 = vmax.xlane.f32.xlu0 %v1493_v52 }
 0x263   :  { %v1850_v54 = vpop.f32.mrf.mxu1 }
 0x264   :  { %v1872_v55 = vsel %vm1868_vm2, %v1850_v54, -1e+30 }
 0x265   :  { %1877 = vmax.xlane.f32.xlu2 %v1872_v55 }
 0x268   :  { %v1472_v58 = vpop.f32.mrf.mxu2 }
 0x269   :  { %v1494_v60 = vsel %vm1490_vm3, %v1472_v58, -1e+30 }
 0x26a   :  { %1499 = vmax.xlane.f32.xlu0 %v1494_v60 }
 0x26b   :  { %v1853_v62 = vpop.f32.mrf.mxu1 }
 0x26c   :  { %v1873_v0 = vsel %vm1869_vm4, %v1853_v62, -1e+30  ;;  %v5856_v62 = vld [vmem:[#allocation16 + $0x78] sm:$0xff] }
 0x270   :  { %v1475_v1 = vpop.f32.mrf.mxu2 }
 0x271   :  { %v1495_v2 = vsel %vm1491_vm5, %v1475_v1, -1e+30 }
 0x272   :  { %1879 = vmax.xlane.f32.xlu0 %v1873_v0  ;;  %1501 = vmax.xlane.f32.xlu1 %v1495_v2 }
 0x273   :  { %v1855_v6 = vpop.f32.mrf.mxu1 }
 0x274   :  { %v1874_v7 = vsel %vm1870_vm7, %v1855_v6, -1e+30 }
 0x278   :  { %v1477_v4 = vpop.f32.mrf.mxu2 }
 0x279   :  { %v1496_v24 = vsel %vm1492_vm6, %v1477_v4, -1e+30 }
 0x27a   :  { %1503 = vmax.xlane.f32.xlu1 %v1496_v24 }
 0x282   :  { %1881 = vmax.xlane.f32.xlu1 %v1874_v7 }
 0x2d0   :  { %v6785_v17 = vpop.xlane.xlu2 %1875 }
 0x2d1   :  { %v1883_v14 = vsub.f32 %v1871_v47, %v6785_v17  ;;  %v5828_v47 = vld [vmem:[#allocation16 + $0x28] sm:$0xff]  ;;  %vm1903_vm12 = vcmp.gt.f32.partialorder %v6785_v17, -5e+29 }
 0x2d2   :  { %1722 = vmatpush.bf16.msra.mxu0 %v5828_v47 }
 0x2d3   :  { %v1887_v16 = vmul.f32 1.442695, %v1883_v14  ;;  %v5853_v14 = vld [vmem:[#allocation16 + $0x60] sm:$0xff] }
 0x2d5   :  { %v6780_v8 = vpop.xlane.xlu0 %1497 }
 0x2d6   :  { %v1505_v10 = vsub.f32 %v1493_v52, %v6780_v8  ;;  %1723 = vmatpush.bf16.msra.mxu0 %v5827_v48  ;;  %v5825_v52 = vld [vmem:[#allocation16 + $0x10] sm:$0xff]  ;;  %vm1525_vm8 = vcmp.gt.f32.partialorder %v6780_v8, -5e+29  ;;  %v5854_v8 = vld [vmem:[#allocation16 + $0x68] sm:$0xff] }
 0x2d7   :  { %v1529_v58 = vsel %vm1525_vm8, 1.0, %v6599_v57 }
 0x2d8   :  { %v1509_v33 = vmul.f32 1.442695, %v1505_v10  ;;  %v6792_v20 = vpop.xlane.xlu2 %1877 }
 0x2d9   :  { %v1884_v25 = vsub.f32 %v1872_v55, %v6792_v20  ;;  %vm1904_vm13 = vcmp.gt.f32.partialorder %v6792_v20, -5e+29 }
 0x2da   :  { %6174 = vpow2.f32 %v1509_v33  ;;  %1724 = vmatpush.bf16.msra.mxu0 %v5826_v50  ;;  %v5849_v50 = vld [vmem:[#allocation16 + $0x40] sm:$0xff] }
 0x2db   :  { %v1889_v29 = vmul.f32 1.442695, %v1884_v25  ;;  %v5852_v25 = vld [vmem:[#allocation16 + $0x58] sm:$0xff] }
 0x2dd   :  { %v6783_v12 = vpop.xlane.xlu0 %1499 }
 0x2de   :  { %v1506_v22 = vsub.f32 %v1494_v60, %v6783_v12  ;;  %1725 = vmatpush.bf16.msra.mxu0 %v5825_v52  ;;  %vm1526_vm9 = vcmp.gt.f32.partialorder %v6783_v12, -5e+29 }
 0x2df   :  { %v1530_v3 = vsel %vm1526_vm9, 1.0, %v6599_v57 }
 0x2e0   :  { %v6175_v49 = vpop.eup %6174  ;;  %v1511_v13 = vmul.f32 1.442695, %v1506_v22 }
 0x2e1   :  { %1517 = vadd.xlane.f32.xlu2 %v6175_v49 }
 0x2e2   :  { %6176 = vpow2.f32 %v1511_v13  ;;  %1726 = vmatpush.bf16.msra.mxu0 %v5824_v53  ;;  %v1907_v53 = vsel %vm1903_vm12, 1.0, %v6599_v57 }
 0x2e3   :  { %6178 = vpow2.f32 %v1887_v16 }
 0x2e5   :  { %v6789_v15 = vpop.xlane.xlu1 %1501  ;;  %v6797_v27 = vpop.xlane.xlu0 %1879 }
 0x2e6   :  { %v1507_v18 = vsub.f32 %v1495_v2, %v6789_v15  ;;  %v1885_v34 = vsub.f32 %v1873_v0, %v6797_v27  ;;  %1727 = vmatpush.bf16.msra.mxu0 %v5823_v56  ;;  %vm1527_vm10 = vcmp.gt.f32.partialorder %v6789_v15, -5e+29  ;;  %vm1905_vm14 = vcmp.gt.f32.partialorder %v6797_v27, -5e+29 }
 0x2e7   :  { %v1531_v13 = vsel %vm1527_vm10, 1.0, %v6599_v57 }
 0x2e8   :  { %v6177_v19 = vpop.eup %6176  ;;  %v1513_v21 = vmul.f32 1.442695, %v1507_v18  ;;  %v1891_v35 = vmul.f32 1.442695, %v1885_v34 }
 0x2e9   :  { %1519 = vadd.xlane.f32.xlu0 %v6177_v19  ;;  %v1533_v23 = vpack.c.bf16 %v6177_v19, %v6175_v49  ;;  %v6179_v30 = vpop.eup %6178 }
 0x2ea   :  { %6180 = vpow2.f32 %v1513_v21  ;;  %2100 = vmatpush.bf16.msrb.mxu0 %v5856_v62 }
 0x2eb   :  { %1591 = vmatmul.bf16.vlgmr.msrb.gmra.mxu3 %v1533_v23 }
 0x2ed   :  { %v6795_v26 = vpop.xlane.xlu1 %1503 }
 0x2ee   :  { %v1508_v28 = vsub.f32 %v1496_v24, %v6795_v26  ;;  %2101 = vmatpush.bf16.msrb.mxu0 %v5855_v11  ;;  %vm1528_vm11 = vcmp.gt.f32.partialorder %v6795_v26, -5e+29 }
 0x2ef   :  { %v1532_v34 = vsel %vm1528_vm11, 1.0, %v6599_v57 }
 0x2f0   :  { %v1515_v31 = vmul.f32 1.442695, %v1508_v28  ;;  %v6181_v32 = vpop.eup %6180 }
 0x2f1   :  { %1895 = vadd.xlane.f32.xlu0 %v6179_v30  ;;  %1521 = vadd.xlane.f32.xlu1 %v6181_v32 }
 0x2f2   :  { %6182 = vpow2.f32 %v1515_v31  ;;  %2102 = vmatpush.bf16.msrb.mxu0 %v5854_v8  ;;  %v5851_v31 = vld [vmem:[#allocation16 + $0x50] sm:$0xff] }
 0x2f3   :  { %6184 = vpow2.f32 %v1889_v29 }
 0x2f4   :  { %6186 = vpow2.f32 %v1891_v35 }
 0x2f5   :  { %v6801_v36 = vpop.xlane.xlu1 %1881 }
 0x2f6   :  { %v1886_v37 = vsub.f32 %v1874_v7, %v6801_v36  ;;  %2103 = vmatpush.bf16.msrb.mxu0 %v5853_v14  ;;  %vm1906_vm15 = vcmp.gt.f32.partialorder %v6801_v36, -5e+29 }
 0x2f8   :  { %v6183_v38 = vpop.eup %6182  ;;  %v1893_v39 = vmul.f32 1.442695, %v1886_v37 }
 0x2f9   :  { %v6185_v40 = vpop.eup %6184  ;;  %1523 = vadd.xlane.f32.xlu2 %v6183_v38  ;;  %v1534_v41 = vpack.c.bf16 %v6183_v38, %v6181_v32 }
 0x2fa   :  { %6188 = vpow2.f32 %v1893_v39  ;;  %1897 = vadd.xlane.f32.xlu1 %v6185_v40  ;;  %v6187_v42 = vpop.eup %6186  ;;  %v1911_v44 = vpack.c.bf16 %v6185_v40, %v6179_v30  ;;  %2104 = vmatpush.bf16.msrb.mxu0 %v5852_v25 }
 0x2fb   :  { %1596 = vmatmul.bf16.gmra.mxu3 %v1534_v41  ;;  %v5850_v41 = vld [vmem:[#allocation16 + $0x48] sm:$0xff] }
 0x2fe   :  { %2105 = vmatpush.bf16.msrb.mxu0 %v5851_v31  ;;  %v5879_v31 = vld [vmem:[#allocation19 + $0xb0] sm:$0xf0] }
 0x300   :  { %v6189_v43 = vpop.eup %6188 }
 0x301   :  { %1899 = vadd.xlane.f32.xlu2 %v6187_v42  ;;  %1901 = vadd.xlane.f32.xlu0 %v6189_v43  ;;  %v1912_v9 = vpack.c.bf16 %v6189_v43, %v6187_v42 }
 0x302   :  { %2106 = vmatpush.bf16.msrb.mxu0 %v5850_v41 }
 0x306   :  { %2107 = vmatpush.bf16.msrb.mxu0 %v5849_v50 }
 0x30b   :  { %1969 = vmatmul.bf16.vlgmr.msra.gmra.mxu3 %v1911_v44 }
 0x31b   :  { %1974 = vmatmul.bf16.gmra.mxu3 %v1912_v9 }
 0x354   :  { %v1518_v51 = vpop.xlane.xlu2 %1517 }
 0x355   :  { %6190 = vrcp.f32 %v1518_v51 }
 0x35b   :  { %v6191_v55 = vpop.eup %6190 }
 0x35c   :  { %v1520_v54 = vpop.xlane.xlu0 %1519  ;;  %v1606_v59 = vmul.f32 %v6191_v55, %v1529_v58 }
 0x35d   :  { %6192 = vrcp.f32 %v1520_v54 }
 0x363   :  { %v6193_v1 = vpop.eup %6192 }
 0x364   :  { %v1522_v63 = vpop.xlane.xlu1 %1521  ;;  %v1607_v5 = vmul.f32 %v6193_v1, %v1530_v3  ;;  %v1896_v15 = vpop.xlane.xlu0 %1895  ;;  %v1908_v3 = vsel %vm1904_vm13, 1.0, %v6599_v57 }
 0x365   :  { %6194 = vrcp.f32 %v1522_v63 }
 0x36b   :  { %v6195_v12 = vpop.eup %6194 }
 0x36c   :  { %v1524_v10 = vpop.xlane.xlu2 %1523  ;;  %v1608_v18 = vmul.f32 %v6195_v12, %v1531_v13 }
 0x36d   :  { %6196 = vrcp.f32 %v1524_v10  ;;  %v1898_v44 = vpop.xlane.xlu1 %1897 }
 0x36e   :  { %v1592_v60 = vpop.f32.mrf.mxu3 }
 0x36f   :  { %v1610_v61 = vmul.f32 %v1606_v59, %v1592_v60 }
 0x371   :  { %v1618_v0 = vmul.f32 0.044715, %v1610_v61  ;;  %v1614_v46 = vmul.f32 0.5, %v1610_v61 }
 0x373   :  { %v1622_v2 = vmul.f32 %v1618_v0, %v1610_v61  ;;  %v6197_v30 = vpop.eup %6196 }
 0x374   :  { %v1609_v37 = vmul.f32 %v6197_v30, %v1532_v34  ;;  %v1902_v10 = vpop.xlane.xlu0 %1901  ;;  %v5015_v30 = vld [vmem:[#allocation19 + $0xa8] sm:$0xf] }
 0x375   :  { %v1626_v4 = vmul.f32 %v1622_v2, %v1610_v61 }
 0x376   :  { %v1594_v24 = vpop.f32.mrf.mxu3 }
 0x377   :  { %v1630_v6 = vadd.f32 %v1626_v4, %v1610_v61  ;;  %v1611_v7 = vmul.f32 %v1607_v5, %v1594_v24  ;;  %v1900_v61 = vpop.xlane.xlu2 %1899 }
 0x379   :  { %v1619_v33 = vmul.f32 0.044715, %v1611_v7  ;;  %v1634_v22 = vmul.f32 0.7978846, %v1630_v6  ;;  %v1615_v47 = vmul.f32 0.5, %v1611_v7 }
 0x37b   :  { %v1623_v49 = vmul.f32 %v1619_v33, %v1611_v7  ;;  %6198 = vtanh.f32 %v1634_v22 }
 0x37d   :  { %v1627_v16 = vmul.f32 %v1623_v49, %v1611_v7 }
 0x37e   :  { %v1597_v19 = vpop.f32.mrf.mxu3 }
 0x37f   :  { %v6810_v21 = vmul.f32 %v1608_v18, %v1597_v19  ;;  %v1631_v23 = vadd.f32 %v1627_v16, %v1611_v7  ;;  %v1909_v18 = vsel %vm1905_vm14, 1.0, %v6599_v57 }
 0x381   :  { %v1620_v28 = vmul.f32 0.044715, %v6810_v21  ;;  %v1635_v29 = vmul.f32 0.7978846, %v1631_v23  ;;  %v6199_v35 = vpop.eup %6198  ;;  %v1616_v22 = vmul.f32 0.5, %v6810_v21 }
 0x382   :  { %v1642_v42 = vadd.f32 1.0, %v6199_v35 }
 0x383   :  { %6200 = vtanh.f32 %v1635_v29  ;;  %v1624_v32 = vmul.f32 %v1620_v28, %v6810_v21 }
 0x384   :  { %6202 = vrcp.f32 %v1896_v15  ;;  %v1646_v54 = vmul.f32 %v1642_v42, %v1614_v46  ;;  %v5880_v42 = vld [vmem:[#allocation19 + $0xb8] sm:$0xf0]  ;;  %v5875_v46 = vld [vmem:[#allocation19 + $0x94] sm:$0xf] }
 0x385   :  { %v1628_v38 = vmul.f32 %v1624_v32, %v6810_v21  ;;  %6204 = vrcp.f32 %v1898_v44  ;;  %v5878_v32 = vld [vmem:[#allocation19 + $0xac] sm:$0xf]  ;;  %v5876_v44 = vld [vmem:[#allocation19 + $0x98] sm:$0xf0] }
 0x386   :  { %v1599_v39 = vpop.f32.mrf.mxu3 }
 0x387   :  { %v1613_v26 = vmul.f32 %v1609_v37, %v1599_v39  ;;  %v1632_v40 = vadd.f32 %v1628_v38, %v6810_v21  ;;  %v5016_v37 = vor.u32 %v5879_v31, %v5015_v30  ;;  %v1910_v39 = vsel %vm1906_vm15, 1.0, %v6599_v57  ;;  %v4969_v30 = vld [vmem:[#allocation19 + $0x54] sm:$0xf0] }
 0x389   :  { %v6201_v43 = vpop.eup %6200  ;;  %v1621_v9 = vmul.f32 0.044715, %v1613_v26  ;;  %v1636_v52 = vmul.f32 0.7978846, %v1632_v40  ;;  %v1617_v49 = vmul.f32 0.5, %v1613_v26  ;;  %2297 = vmatpush.bf16.msra.mxu2 %v5016_v37 }
 0x38a   :  { %v6203_v45 = vpop.eup %6202  ;;  %v1643_v48 = vadd.f32 1.0, %v6201_v43  ;;  %v5023_v40 = vld [vmem:[#allocation19 + $0xb0] sm:$0xf] }
 0x38b   :  { %v1625_v51 = vmul.f32 %v1621_v9, %v1613_v26  ;;  %v1984_v56 = vmul.f32 %v6203_v45, %v1907_v53  ;;  %6206 = vtanh.f32 %v1636_v52  ;;  %v6205_v1 = vpop.eup %6204  ;;  %v5003_v43 = vld [vmem:[#allocation19 + $0x90] sm:$0xf]  ;;  %v5024_v9 = vor.u32 %v5880_v42, %v5023_v40 }
 0x38c   :  { %v1647_v55 = vmul.f32 %v1643_v48, %v1615_v47  ;;  %v1985_v5 = vmul.f32 %v6205_v1, %v1908_v3  ;;  %v5004_v45 = vor.u32 %v5876_v44, %v5003_v43  ;;  %v5005_v47 = vld [vmem:[#allocation19 + $0x9c] sm:$0xf0]  ;;  %v5011_v48 = vld [vmem:[#allocation19 + $0x98] sm:$0xf] }
 0x38d   :  { %v1629_v58 = vmul.f32 %v1625_v51, %v1613_v26  ;;  %v5008_v53 = vor.u32 %v5875_v46, %v5005_v47  ;;  %v4999_v1 = vld [vmem:[#allocation19 + $0x80] sm:$0xf]  ;;  %v4955_v46 = vld [vmem:[#allocation19 + $0x30] sm:$0xf]  ;;  %v5864_v47 = vld [vmem:[#allocation19 + $0x38] sm:$0xf0] }
 0x38e   :  { %v1970_v59 = vpop.f32.mrf.mxu3  ;;  %v1650_v60 = vpack.c.bf16 %v1647_v55, %v1646_v54  ;;  %v5877_v54 = vld [vmem:[#allocation19 + $0xa0] sm:$0xf0]  ;;  %v4991_v55 = vld [vmem:[#allocation19 + $0x78] sm:$0xf]  ;;  %2298 = vmatpush.bf16.msra.mxu2 %v5004_v45 }
 0x38f   :  { %v6820_v17 = vmul.f32 %v1984_v56, %v1970_v59  ;;  %v1633_v62 = vadd.f32 %v1629_v58, %v1613_v26  ;;  %v5017_v26 = vld [vmem:[#allocation19 + $0xb4] sm:$0xf0]  ;;  %v5873_v56 = vld [vmem:[#allocation19 + $0x80] sm:$0xf0]  ;;  %v5012_v59 = vor.u32 %v5877_v54, %v5011_v48  ;;  %v5863_v48 = vld [vmem:[#allocation19 + $0x34] sm:$0xf] }
 0x390   :  { %1728 = vmatmul.bf16.vlgmr.msra.gmra.mxu0 %v1650_v60  ;;  %v5020_v41 = vor.u32 %v5878_v32, %v5017_v26  ;;  %v5872_v60 = vld [vmem:[#allocation19 + $0x7c] sm:$0xf] }
 0x391   :  { %v1996_v63 = vmul.f32 0.044715, %v6820_v17  ;;  %v1637_v0 = vmul.f32 0.7978846, %v1633_v62  ;;  %v6207_v11 = vpop.eup %6206  ;;  %2335 = vmatpush.bf16.msra.mxu0 %v5024_v9  ;;  %v4993_v62 = vld [vmem:[#allocation19 + $0x84] sm:$0xf0] }
 0x392   :  { %v1644_v20 = vadd.f32 1.0, %v6207_v11  ;;  %2316 = vmatpush.bf16.msrb.mxu3 %v5020_v41  ;;  %v4979_v11 = vld [vmem:[#allocation19 + $0x60] sm:$0xf] }
 0x393   :  { %v2000_v2 = vmul.f32 %v1996_v63, %v6820_v17  ;;  %6208 = vtanh.f32 %v1637_v0  ;;  %v4992_v0 = vor.u32 %v5873_v56, %v4991_v55  ;;  %v4943_v56 = vld [vmem:[#allocation19 + $0x18] sm:$0xf] }
 0x394   :  { %6210 = vrcp.f32 %v1900_v61  ;;  %v1648_v19 = vmul.f32 %v1644_v20, %v1616_v22  ;;  %v4996_v20 = vor.u32 %v5872_v60, %v4993_v62  ;;  %v4981_v22 = vld [vmem:[#allocation19 + $0x6c] sm:$0xf0]  ;;  %v4945_v60 = vld [vmem:[#allocation19 + $0x24] sm:$0xf0]  ;;  %v4951_v62 = vld [vmem:[#allocation19 + $0x20] sm:$0xf] }
 0x395   :  { %v2004_v4 = vmul.f32 %v2000_v2, %v6820_v17  ;;  %6212 = vrcp.f32 %v1902_v10  ;;  %v5874_v2 = vld [vmem:[#allocation19 + $0x88] sm:$0xf0]  ;;  %2336 = vmatpush.bf16.msra.mxu0 %v5012_v59  ;;  %2299 = vmatpush.bf16.msra.mxu2 %v4992_v0  ;;  %v5860_v59 = vld [vmem:[#allocation19 + $0x1c] sm:$0xf] }
 0x396   :  { %v1972_v24 = vpop.f32.mrf.mxu3  ;;  %2317 = vmatpush.bf16.msrb.mxu3 %v5008_v53  ;;  %v5865_v53 = vld [vmem:[#allocation19 + $0x40] sm:$0xf0] }
 0x397   :  { %v2008_v6 = vadd.f32 %v2004_v4, %v6820_v17  ;;  %v6828_v7 = vmul.f32 %v1985_v5, %v1972_v24  ;;  %v5870_v4 = vld [vmem:[#allocation19 + $0x68] sm:$0xf0]  ;;  %v1992_v24 = vmul.f32 0.5, %v6820_v17  ;;  %v5867_v17 = vld [vmem:[#allocation19 + $0x50] sm:$0xf0] }
 0x399   :  { %v6209_v8 = vpop.eup %6208  ;;  %v1997_v33 = vmul.f32 0.044715, %v6828_v7  ;;  %v2012_v14 = vmul.f32 0.7978846, %v2008_v6 }
 0x39a   :  { %v6211_v12 = vpop.eup %6210  ;;  %v1645_v13 = vadd.f32 1.0, %v6209_v8  ;;  %v1993_v8 = vmul.f32 0.5, %v6828_v7  ;;  %2318 = vmatpush.bf16.msrb.mxu3 %v4996_v20 }
 0x39b   :  { %v2001_v16 = vmul.f32 %v1997_v33, %v6828_v7  ;;  %v1986_v15 = vmul.f32 %v6211_v12, %v1909_v18  ;;  %6214 = vtanh.f32 %v2012_v14  ;;  %v6213_v38 = vpop.eup %6212  ;;  %v5000_v33 = vor.u32 %v5874_v2, %v4999_v1  ;;  %v5869_v12 = vld [vmem:[#allocation19 + $0x64] sm:$0xf]  ;;  %v5871_v18 = vld [vmem:[#allocation19 + $0x70] sm:$0xf0]  ;;  %v4931_v1 = vld [vmem:[#allocation19] sm:$0xf] }
 0x39c   :  { %v1649_v23 = vmul.f32 %v1645_v13, %v1617_v49  ;;  %v1987_v51 = vmul.f32 %v6213_v38, %v1910_v39  ;;  %v4980_v14 = vor.u32 %v5870_v4, %v4979_v11  ;;  %v5858_v2 = vld [vmem:[#allocation19 + $0x8] sm:$0xf0]  ;;  %v4933_v4 = vld [vmem:[#allocation19 + $0xc] sm:$0xf0] }
 0x39d   :  { %v2005_v25 = vmul.f32 %v2001_v16, %v6828_v7  ;;  %v4987_v16 = vld [vmem:[#allocation19 + $0x68] sm:$0xf]  ;;  %2337 = vmatpush.bf16.msra.mxu0 %v5000_v33  ;;  %v4932_v11 = vor.u32 %v5858_v2, %v4931_v1  ;;  %v5884_v2 = vld [vmem:[#allocation19 + $0xdc] sm:$0xf] }
 0x39e   :  { %v1975_v27 = vpop.f32.mrf.mxu3  ;;  %v1651_v28 = vpack.c.bf16 %v1649_v23, %v1648_v19  ;;  %2300 = vmatpush.bf16.msra.mxu2 %v4980_v14  ;;  %v5112_v33 = vld [vmem:[#allocation19 + $0x168] sm:$0xf] }
 0x39f   :  { %v6837_v29 = vmul.f32 %v1986_v15, %v1975_v27  ;;  %v2009_v21 = vadd.f32 %v2005_v25, %v6828_v7  ;;  %v4967_v25 = vld [vmem:[#allocation19 + $0x48] sm:$0xf]  ;;  %v4984_v27 = vor.u32 %v5869_v12, %v4981_v22  ;;  %v4988_v7 = vor.u32 %v5871_v18, %v4987_v16  ;;  %v5903_v22 = vld [vmem:[#allocation19 + $0x170] sm:$0xf0] }
 0x3a0   :  { %1733 = vmatmul.bf16.gmra.mxu0 %v1651_v28  ;;  %v4968_v32 = vor.u32 %v5867_v17, %v4967_v25  ;;  %v5113_v14 = vor.u32 %v5903_v22, %v5112_v33  ;;  %v5899_v18 = vld [vmem:[#allocation19 + $0x154] sm:$0xf]  ;;  %v5900_v17 = vld [vmem:[#allocation19 + $0x158] sm:$0xf0]  ;;  %v5030_v22 = vld [vmem:[#allocation19 + $0xcc] sm:$0xf0] }
 0x3a1   :  { %v1998_v34 = vmul.f32 0.044715, %v6837_v29  ;;  %v2013_v35 = vmul.f32 0.7978846, %v2009_v21  ;;  %v6215_v50 = vpop.eup %6214  ;;  %v5866_v21 = vld [vmem:[#allocation19 + $0x4c] sm:$0xf]  ;;  %2319 = vmatpush.bf16.msrb.mxu3 %v4984_v27  ;;  %2338 = vmatpush.bf16.msra.mxu0 %v4988_v7 }
 0x3a2   :  { %v2020_v3 = vadd.f32 1.0, %v6215_v50  ;;  %v4972_v38 = vor.u32 %v5866_v21, %v4969_v30  ;;  %2301 = vmatpush.bf16.msra.mxu2 %v4968_v32  ;;  %v1994_v41 = vmul.f32 0.5, %v6837_v29  ;;  %v4956_v50 = vor.u32 %v5864_v47, %v4955_v46  ;;  %2546 = vmatpush.bf16.msrb.mxu1 %v5113_v14  ;;  %v5901_v27 = vld [vmem:[#allocation19 + $0x160] sm:$0xf0]  ;;  %v5896_v21 = vld [vmem:[#allocation19 + $0x13c] sm:$0xf] }
 0x3a3   :  { %6216 = vtanh.f32 %v2013_v35  ;;  %v2002_v36 = vmul.f32 %v1998_v34, %v6837_v29  ;;  %v4975_v34 = vld [vmem:[#allocation19 + $0x50] sm:$0xf]  ;;  %v5868_v35 = vld [vmem:[#allocation19 + $0x58] sm:$0xf0]  ;;  %v5090_v30 = vld [vmem:[#allocation19 + $0x144] sm:$0xf0] }
 0x3a4   :  { %v2024_v19 = vmul.f32 %v2020_v3, %v1992_v24  ;;  %v4976_v39 = vor.u32 %v5868_v35, %v4975_v34  ;;  %v5857_v3 = vld [vmem:[#allocation19 + $0x4] sm:$0xf]  ;;  %v5859_v24 = vld [vmem:[#allocation19 + $0x10] sm:$0xf0]  ;;  %v5093_v32 = vor.u32 %v5896_v21, %v5090_v30  ;;  %v5096_v35 = vld [vmem:[#allocation19 + $0x140] sm:$0xf] }
 0x3a5   :  { %v2006_v52 = vmul.f32 %v2002_v36, %v6837_v29  ;;  %2320 = vmatpush.bf16.msrb.mxu3 %v4972_v38  ;;  %v5897_v34 = vld [vmem:[#allocation19 + $0x140] sm:$0xf0]  ;;  %v5890_v46 = vld [vmem:[#allocation19 + $0x10c] sm:$0xf]  ;;  %v5066_v47 = vld [vmem:[#allocation19 + $0x114] sm:$0xf0] }
 0x3a6   :  { %v1977_v58 = vpop.f32.mrf.mxu3  ;;  %2339 = vmatpush.bf16.msra.mxu0 %v4976_v39  ;;  %2302 = vmatpush.bf16.msra.mxu2 %v4956_v50  ;;  %v5069_v50 = vor.u32 %v5890_v46, %v5066_v47 }
 0x3a7   :  { %v1991_v61 = vmul.f32 %v1987_v51, %v1977_v58  ;;  %v2010_v63 = vadd.f32 %v2006_v52, %v6837_v29  ;;  %v4957_v51 = vld [vmem:[#allocation19 + $0x3c] sm:$0xf0]  ;;  %v4963_v52 = vld [vmem:[#allocation19 + $0x38] sm:$0xf]  ;;  %v5861_v58 = vld [vmem:[#allocation19 + $0x20] sm:$0xf0] }
 0x3a8   :  { %v4960_v54 = vor.u32 %v5863_v48, %v4957_v51  ;;  %v4964_v55 = vor.u32 %v5865_v53, %v4963_v52  ;;  %v4944_v29 = vor.u32 %v5861_v58, %v4943_v56  ;;  %v5064_v48 = vld [vmem:[#allocation19 + $0x108] sm:$0xf]  ;;  %v5891_v51 = vld [vmem:[#allocation19 + $0x110] sm:$0xf0]  ;;  %v5072_v52 = vld [vmem:[#allocation19 + $0x110] sm:$0xf] }
 0x3a9   :  { %v6217_v5 = vpop.eup %6216  ;;  %v1999_v6 = vmul.f32 0.044715, %v1991_v61  ;;  %v2014_v13 = vmul.f32 0.7978846, %v2010_v63  ;;  %v1995_v42 = vmul.f32 0.5, %v1991_v61  ;;  %v4948_v63 = vor.u32 %v5860_v59, %v4945_v60 }
 0x3aa   :  { %v2021_v10 = vadd.f32 1.0, %v6217_v5  ;;  %2321 = vmatpush.bf16.msrb.mxu3 %v4960_v54  ;;  %2340 = vmatpush.bf16.msra.mxu0 %v4964_v55  ;;  %v4939_v5 = vld [vmem:[#allocation19 + $0x8] sm:$0xf]  ;;  %v5892_v53 = vld [vmem:[#allocation19 + $0x118] sm:$0xf0]  ;;  %v5065_v54 = vor.u32 %v5891_v51, %v5064_v48 }
 0x3ab   :  { %v2003_v49 = vmul.f32 %v1999_v6, %v1991_v61  ;;  %6218 = vtanh.f32 %v2014_v13  ;;  %2303 = vmatpush.bf16.msra.mxu2 %v4944_v29  ;;  %v4936_v6 = vor.u32 %v5857_v3, %v4933_v4  ;;  %v4940_v20 = vor.u32 %v5859_v24, %v4939_v5  ;;  %v5904_v13 = vld [vmem:[#allocation19 + $0x178] sm:$0xf0]  ;;  %v5887_v58 = vld [vmem:[#allocation19 + $0xf4] sm:$0xf]  ;;  %v5054_v59 = vld [vmem:[#allocation19 + $0xfc] sm:$0xf0] }
 0x3ac   :  { %v2025_v23 = vmul.f32 %v2021_v10, %v1993_v8  ;;  %v5902_v8 = vld [vmem:[#allocation19 + $0x16c] sm:$0xf]  ;;  %v5114_v10 = vld [vmem:[#allocation19 + $0x174] sm:$0xf0]  ;;  %v5073_v55 = vor.u32 %v5892_v53, %v5072_v52  ;;  %v5052_v29 = vld [vmem:[#allocation19 + $0xf0] sm:$0xf]  ;;  %v5057_v60 = vor.u32 %v5887_v58, %v5054_v59 }
 0x3ad   :  { %v2007_v15 = vmul.f32 %v2003_v49, %v1991_v61  ;;  %v5117_v12 = vor.u32 %v5902_v8, %v5114_v10  ;;  %v5120_v49 = vld [vmem:[#allocation19 + $0x170] sm:$0xf]  ;;  %v5042_v3 = vld [vmem:[#allocation19 + $0xe4] sm:$0xf0]  ;;  %v5885_v5 = vld [vmem:[#allocation19 + $0xe0] sm:$0xf0] }
 0x3ae   :  { %v2028_v28 = vpack.c.bf16 %v2025_v23, %v2024_v19  ;;  %2322 = vmatpush.bf16.msrb.mxu3 %v4948_v63  ;;  %v5121_v16 = vor.u32 %v5904_v13, %v5120_v49  ;;  %v5102_v19 = vld [vmem:[#allocation19 + $0x15c] sm:$0xf0]  ;;  %v5100_v23 = vld [vmem:[#allocation19 + $0x150] sm:$0xf]  ;;  %v5889_v63 = vld [vmem:[#allocation19 + $0x100] sm:$0xf0]  ;;  %v5045_v4 = vor.u32 %v5884_v2, %v5042_v3 }
 0x3af   :  { %v2011_v31 = vadd.f32 %v2007_v15, %v1991_v61  ;;  %v5862_v61 = vld [vmem:[#allocation19 + $0x28] sm:$0xf0]  ;;  %2304 = vmatpush.bf16.msra.mxu2 %v4932_v11  ;;  %v5105_v25 = vor.u32 %v5899_v18, %v5102_v19  ;;  %v5108_v15 = vld [vmem:[#allocation19 + $0x158] sm:$0xf]  ;;  %v5048_v24 = vld [vmem:[#allocation19 + $0xe0] sm:$0xf] }
 0x3b0   :  { %2108 = vmatmul.bf16.vlgmr.msrb.gmra.mxu0 %v2028_v28  ;;  %v4952_v0 = vor.u32 %v5862_v61, %v4951_v62  ;;  %v5101_v28 = vor.u32 %v5900_v17, %v5100_v23  ;;  %v5109_v7 = vor.u32 %v5901_v27, %v5108_v15  ;;  %v5888_v62 = vld [vmem:[#allocation19 + $0xf8] sm:$0xf0]  ;;  %v5060_v61 = vld [vmem:[#allocation19 + $0xf8] sm:$0xf]  ;;  %v5028_v49 = vld [vmem:[#allocation19 + $0xc0] sm:$0xf] }
 0x3b1   :  { %v2015_v37 = vmul.f32 0.7978846, %v2011_v31  ;;  %v6219_v26 = vpop.eup %6218  ;;  %v5088_v31 = vld [vmem:[#allocation19 + $0x138] sm:$0xf]  ;;  %v5061_v1 = vor.u32 %v5889_v63, %v5060_v61  ;;  %v5882_v18 = vld [vmem:[#allocation19 + $0xc8] sm:$0xf0] }
 0x3b2   :  { %v2022_v40 = vadd.f32 1.0, %v6219_v26  ;;  %2341 = vmatpush.bf16.msra.mxu0 %v4952_v0  ;;  %2323 = vmatpush.bf16.msrb.mxu3 %v4936_v6  ;;  %v5089_v38 = vor.u32 %v5897_v34, %v5088_v31  ;;  %v5893_v26 = vld [vmem:[#allocation19 + $0x124] sm:$0xf]  ;;  %v5053_v0 = vor.u32 %v5888_v62, %v5052_v29  ;;  %v5040_v11 = vld [vmem:[#allocation19 + $0xd8] sm:$0xf] }
 0x3b3   :  { %6220 = vtanh.f32 %v2015_v37  ;;  %2565 = vmatpush.bf16.msrb.mxu2 %v5117_v12  ;;  %2547 = vmatpush.bf16.msrb.mxu1 %v5101_v28  ;;  %v5898_v37 = vld [vmem:[#allocation19 + $0x148] sm:$0xf0]  ;;  %v5041_v8 = vor.u32 %v5885_v5, %v5040_v11  ;;  %v5881_v12 = vld [vmem:[#allocation19 + $0xc4] sm:$0xf]  ;;  %v5036_v19 = vld [vmem:[#allocation19 + $0xc8] sm:$0xf] }
 0x3b4   :  { %v2026_v44 = vmul.f32 %v2022_v40, %v1994_v41  ;;  %v5097_v39 = vor.u32 %v5898_v37, %v5096_v35  ;;  %v5078_v40 = vld [vmem:[#allocation19 + $0x12c] sm:$0xf0]  ;;  %v5886_v6 = vld [vmem:[#allocation19 + $0xe8] sm:$0xf0]  ;;  %v5883_v23 = vld [vmem:[#allocation19 + $0xd0] sm:$0xf0] }
 0x3b5   :  { %v5081_v41 = vor.u32 %v5893_v26, %v5078_v40  ;;  %v5049_v10 = vor.u32 %v5886_v6, %v5048_v24  ;;  %v5037_v17 = vor.u32 %v5883_v23, %v5036_v19  ;;  %v5196_v31 = vld [vmem:[#allocation20 + $0x70] sm:$0xf]  ;;  %v5940_v37 = vld [vmem:[#allocation20 + $0xf4] sm:$0xf0]  ;;  %v5938_v59 = vld [vmem:[#allocation20 + $0xe4] sm:$0xf0] }
 0x3b6   :  { %2342 = vmatpush.bf16.msra.mxu0 %v4940_v20  ;;  %2584 = vmatpush.bf16.msra.mxu3 %v5121_v16  ;;  %v6168_v20 = vld [vmem:[%s6964_s6] ss:$0 sm:$0xff]  ;;  %v5033_v16 = vor.u32 %v5881_v12, %v5030_v22  ;;  %v5260_v34 = vld [vmem:[#allocation20 + $0xf0] sm:$0xf]  ;;  %v5921_v29 = vld [vmem:[#allocation20 + $0x64] sm:$0xf] }
 0x3b7   :  { %2566 = vmatpush.bf16.msrb.mxu2 %v5105_v25  ;;  %2548 = vmatpush.bf16.msrb.mxu1 %v5089_v38  ;;  %v5029_v25 = vor.u32 %v5882_v18, %v5028_v49  ;;  %v5923_v38 = vld [vmem:[#allocation20 + $0x74] sm:$0xf]  ;;  %v5261_v40 = vor.u32 %v5940_v37, %v5260_v34  ;;  %v5937_v63 = vld [vmem:[#allocation20 + $0xe4] sm:$0xf]  ;;  %v5180_v2 = vld [vmem:[#allocation20 + $0x50] sm:$0xf] }
 0x3b8   :  { %v5920_v3 = vld [vmem:[#allocation20 + $0x54] sm:$0xf0]  ;;  %v5244_v11 = vld [vmem:[#allocation20 + $0xd0] sm:$0xf]  ;;  %v5919_v24 = vld [vmem:[#allocation20 + $0x54] sm:$0xf] }
 0x3b9   :  { %v6221_v36 = vpop.eup %6220  ;;  %v5936_v5 = vld [vmem:[#allocation20 + $0xd4] sm:$0xf0]  ;;  %v5182_v6 = vld [vmem:[#allocation20 + $0x58] sm:$0xf0]  ;;  %v5172_v22 = vld [vmem:[#allocation20 + $0x40] sm:$0xf] }
 0x3ba   :  { %v2023_v43 = vadd.f32 1.0, %v6221_v36  ;;  %2585 = vmatpush.bf16.msra.mxu3 %v5109_v7  ;;  %v5076_v36 = vld [vmem:[#allocation19 + $0x120] sm:$0xf]  ;;  %v5918_v49 = vld [vmem:[#allocation20 + $0x44] sm:$0xf0] }
 0x3bb   :  { %2567 = vmatpush.bf16.msrb.mxu2 %v5093_v32  ;;  %v5924_v32 = vld [vmem:[#allocation20 + $0x74] sm:$0xf0]  ;;  %v5173_v18 = vor.u32 %v5918_v49, %v5172_v22  ;;  %v5934_v19 = vld [vmem:[#allocation20 + $0xc4] sm:$0xf0]  ;;  %v5917_v23 = vld [vmem:[#allocation20 + $0x44] sm:$0xf] }
 0x3bc   :  { %v2027_v9 = vmul.f32 %v2023_v43, %v1995_v42  ;;  %v5894_v42 = vld [vmem:[#allocation19 + $0x128] sm:$0xf0]  ;;  %v5084_v43 = vld [vmem:[#allocation19 + $0x128] sm:$0xf]  ;;  %v5197_v35 = vor.u32 %v5924_v32, %v5196_v31  ;;  %v5164_v31 = vld [vmem:[#allocation20 + $0x30] sm:$0xf] }
 0x3bd   :  { %v5916_v32 = vld [vmem:[#allocation20 + $0x34] sm:$0xf0]  ;;  %v5228_v34 = vld [vmem:[#allocation20 + $0xb0] sm:$0xf] }
 0x3be   :  { %v2029_v45 = vpack.c.bf16 %v2027_v9, %v2026_v44  ;;  %2586 = vmatpush.bf16.msra.mxu3 %v5097_v39  ;;  %v5895_v44 = vld [vmem:[#allocation19 + $0x130] sm:$0xf0]  ;;  %v5077_v9 = vor.u32 %v5894_v42, %v5076_v36  ;;  %v5198_v39 = vld [vmem:[#allocation20 + $0x78] sm:$0xf0]  ;;  %2835 = vmatpush.bf16.msrb.mxu0 %v5197_v35  ;;  %v5165_v35 = vor.u32 %v5916_v32, %v5164_v31  ;;  %v5932_v37 = vld [vmem:[#allocation20 + $0xb4] sm:$0xf0] }
 0x3bf   :  { %2568 = vmatpush.bf16.msrb.mxu2 %v5081_v41  ;;  %v5201_v36 = vor.u32 %v5923_v38, %v5198_v39  ;;  %v5939_v41 = vld [vmem:[#allocation20 + $0xf4] sm:$0xf]  ;;  %v5262_v42 = vld [vmem:[#allocation20 + $0xf8] sm:$0xf0] }
 0x3c0   :  { %2113 = vmatmul.bf16.gmra.mxu0 %v2029_v45  ;;  %v5085_v45 = vor.u32 %v5895_v44, %v5084_v43  ;;  %2549 = vmatpush.bf16.msrb.mxu1 %v5077_v9  ;;  %v5265_v43 = vor.u32 %v5939_v41, %v5262_v42  ;;  %v6169_v44 = vld [vmem:[%s6964_s6 + $0x1] ss:$0 sm:$0xff]  ;;  %v5915_v38 = vld [vmem:[#allocation20 + $0x34] sm:$0xf]  ;;  %v5166_v39 = vld [vmem:[#allocation20 + $0x38] sm:$0xf0] }
 0x3c1   :  { %v5230_v41 = vld [vmem:[#allocation20 + $0xb8] sm:$0xf0] }
 0x3c2   :  { %2587 = vmatpush.bf16.msra.mxu3 %v5085_v45  ;;  %v5342_v31 = vld [vmem:[#allocation20 + $0x178] sm:$0xf0] }
 0x3c3   :  { %2569 = vmatpush.bf16.msrb.mxu2 %v5069_v50 }
 0x3c4   :  { %2550 = vmatpush.bf16.msrb.mxu1 %v5065_v54  ;;  %v5188_v54 = vld [vmem:[#allocation20 + $0x60] sm:$0xf] }
 0x3c6   :  { %2588 = vmatpush.bf16.msra.mxu3 %v5073_v55  ;;  %v5922_v55 = vld [vmem:[#allocation20 + $0x64] sm:$0xf0] }
 0x3c7   :  { %2570 = vmatpush.bf16.msrb.mxu2 %v5057_v60  ;;  %v5189_v58 = vor.u32 %v5922_v55, %v5188_v54  ;;  %v5190_v60 = vld [vmem:[#allocation20 + $0x68] sm:$0xf0] }
 0x3c8   :  { %2551 = vmatpush.bf16.msrb.mxu1 %v5053_v0  ;;  %v5193_v61 = vor.u32 %v5921_v29, %v5190_v60  ;;  %v5254_v0 = vld [vmem:[#allocation20 + $0xe8] sm:$0xf0]  ;;  %v5148_v29 = vld [vmem:[#allocation20 + $0x10] sm:$0xf]  ;;  %v5912_v60 = vld [vmem:[#allocation20 + $0x14] sm:$0xf0] }
 0x3c9   :  { %2836 = vmatpush.bf16.msrb.mxu0 %v5189_v58  ;;  %v5222_v58 = vld [vmem:[#allocation20 + $0xa8] sm:$0xf0] }
 0x3ca   :  { %2589 = vmatpush.bf16.msra.mxu3 %v5061_v1  ;;  %v5257_v1 = vor.u32 %v5937_v63, %v5254_v0  ;;  %v5928_v63 = vld [vmem:[#allocation20 + $0x94] sm:$0xf0]  ;;  %v5911_v0 = vld [vmem:[#allocation20 + $0x14] sm:$0xf] }
 0x3cb   :  { %2571 = vmatpush.bf16.msrb.mxu2 %v5045_v4  ;;  %v5181_v4 = vor.u32 %v5920_v3, %v5180_v2 }
 0x3cc   :  { %2552 = vmatpush.bf16.msrb.mxu1 %v5041_v8  ;;  %v5185_v8 = vor.u32 %v5919_v24, %v5182_v6  ;;  %v5140_v24 = vld [vmem:[#allocation20] sm:$0xf]  ;;  %v5910_v6 = vld [vmem:[#allocation20 + $0x4] sm:$0xf0] }
 0x3cd   :  { %2837 = vmatpush.bf16.msrb.mxu0 %v5181_v4  ;;  %v5214_v4 = vld [vmem:[#allocation20 + $0x98] sm:$0xf0] }
 0x3ce   :  { %2590 = vmatpush.bf16.msra.mxu3 %v5049_v10  ;;  %v5935_v10 = vld [vmem:[#allocation20 + $0xd4] sm:$0xf] }
 0x3cf   :  { %2572 = vmatpush.bf16.msrb.mxu2 %v5033_v16  ;;  %v5236_v16 = vld [vmem:[#allocation20 + $0xc0] sm:$0xf] }
 0x3d0   :  { %2553 = vmatpush.bf16.msrb.mxu1 %v5029_v25  ;;  %v5174_v25 = vld [vmem:[#allocation20 + $0x48] sm:$0xf0] }
 0x3d1   :  { %2838 = vmatpush.bf16.msrb.mxu0 %v5173_v18  ;;  %v5206_v18 = vld [vmem:[#allocation20 + $0x88] sm:$0xf0] }
 0x3d2   :  { %2591 = vmatpush.bf16.msra.mxu3 %v5037_v17  ;;  %v5237_v17 = vor.u32 %v5934_v19, %v5236_v16  ;;  %v5925_v16 = vld [vmem:[#allocation20 + $0x84] sm:$0xf]  ;;  %v2161_v19 = vld [vmem:[%s6967_s9] sm:$0x7] }
 0x3d3   :  { %v6881_v32 = vperm.slane %v2161_v19, 2 }
 0x3d4   :  { %2854 = vmatpush.bf16.msra.mxu1 %v5261_v40  ;;  %v5169_v40 = vor.u32 %v5915_v38, %v5166_v39  ;;  %v5406_v38 = vld [vmem:[#allocation20 + $0x1f8] sm:$0xf0] }
 0x3d5   :  { %2839 = vmatpush.bf16.msrb.mxu0 %v5165_v35 }
 0x40d   :  { %v1729_v56 = vpop.f32.mrf.mxu0 }
 0x40e   :  { %v6851_v13 = vadd.f32 %v6168_v20, %v1729_v56  ;;  %v5252_v56 = vld [vmem:[#allocation20 + $0xe0] sm:$0xf] }
 0x40f   :  { %v5253_v62 = vor.u32 %v5938_v59, %v5252_v56  ;;  %v5929_v56 = vld [vmem:[#allocation20 + $0xa4] sm:$0xf] }
 0x410   :  { %v5225_v59 = vor.u32 %v5929_v56, %v5222_v58 }
 0x411   :  { %2855 = vmatpush.bf16.msra.mxu1 %v5253_v62  ;;  %v5212_v62 = vld [vmem:[#allocation20 + $0x90] sm:$0xf] }
 0x412   :  { %v5213_v2 = vor.u32 %v5928_v63, %v5212_v62  ;;  %v5972_v63 = vld [vmem:[#allocation20 + $0x1d4] sm:$0xf0] }
 0x415   :  { %v1731_v33 = vpop.f32.mrf.mxu0 }
 0x416   :  { %v6853_v14 = vadd.f32 %v6168_v20, %v1731_v33  ;;  %v5246_v33 = vld [vmem:[#allocation20 + $0xd8] sm:$0xf0] }
 0x417   :  { %v5249_v12 = vor.u32 %v5935_v10, %v5246_v33  ;;  %v5926_v10 = vld [vmem:[#allocation20 + $0x84] sm:$0xf0]  ;;  %v5909_v33 = vld [vmem:[#allocation20 + $0x4] sm:$0xf] }
 0x418   :  { %v2127_v15 = vpack.c.bf16 %v6853_v14, %v6851_v13 }
 0x41a   :  { %2305 = vmatmul.bf16.vlgmr.msra.gmra.mxu2 %v2127_v15  ;;  %2324 = vmatmul.bf16.vlgmr.msrb.gmra.mxu3 %v2127_v15 }
 0x41b   :  { %2343 = vmatmul.bf16.vlgmr.msra.gmra.mxu0 %v2127_v15  ;;  %2873 = vmatpush.bf16.msra.mxu2 %v5201_v36  ;;  %v5177_v15 = vor.u32 %v5917_v23, %v5174_v25  ;;  %v5931_v36 = vld [vmem:[#allocation20 + $0xb4] sm:$0xf]  ;;  %v5209_v23 = vor.u32 %v5925_v16, %v5206_v18  ;;  %v5340_v25 = vld [vmem:[#allocation20 + $0x170] sm:$0xf]  ;;  %v5970_v18 = vld [vmem:[#allocation20 + $0x1c4] sm:$0xf0] }
 0x41c   :  { %2892 = vmatpush.bf16.msrb.mxu3 %v5265_v43  ;;  %v5233_v42 = vor.u32 %v5931_v36, %v5230_v41  ;;  %v5156_v43 = vld [vmem:[#allocation20 + $0x20] sm:$0xf]  ;;  %v5958_v41 = vld [vmem:[#allocation20 + $0x164] sm:$0xf0] }
 0x41d   :  { %v1734_v27 = vpop.f32.mrf.mxu0  ;;  %v5332_v36 = vld [vmem:[#allocation20 + $0x160] sm:$0xf] }
 0x41e   :  { %v6857_v7 = vadd.f32 %v6168_v20, %v1734_v27  ;;  %v5933_v27 = vld [vmem:[#allocation20 + $0xc4] sm:$0xf] }
 0x41f   :  { %2874 = vmatpush.bf16.msra.mxu2 %v5193_v61  ;;  %v5149_v61 = vor.u32 %v5912_v60, %v5148_v29  ;;  %v5956_v29 = vld [vmem:[#allocation20 + $0x154] sm:$0xf0]  ;;  %v5388_v60 = vld [vmem:[#allocation20 + $0x1d0] sm:$0xf] }
 0x420   :  { %2893 = vmatpush.bf16.msrb.mxu3 %v5257_v1  ;;  %v5150_v1 = vld [vmem:[#allocation20 + $0x18] sm:$0xf0] }
 0x421   :  { %v5153_v3 = vor.u32 %v5911_v0, %v5150_v1  ;;  %v5955_v0 = vld [vmem:[#allocation20 + $0x154] sm:$0xf]  ;;  %v5389_v1 = vor.u32 %v5972_v63, %v5388_v60  ;;  %v5302_v63 = vld [vmem:[#allocation20 + $0x128] sm:$0xf0] }
 0x423   :  { %2875 = vmatpush.bf16.msra.mxu2 %v5185_v8  ;;  %v5141_v8 = vor.u32 %v5910_v6, %v5140_v24 }
 0x424   :  { %2894 = vmatpush.bf16.msrb.mxu3 %v5249_v12  ;;  %v5142_v12 = vld [vmem:[#allocation20 + $0x8] sm:$0xf0] }
 0x425   :  { %v1736_v28 = vpop.f32.mrf.mxu0  ;;  %v5145_v49 = vor.u32 %v5909_v33, %v5142_v12  ;;  %v5954_v33 = vld [vmem:[#allocation20 + $0x144] sm:$0xf0]  ;;  %v5380_v12 = vld [vmem:[#allocation20 + $0x1c0] sm:$0xf] }
 0x426   :  { %v6859_v21 = vadd.f32 %v6168_v20, %v1736_v28  ;;  %v5245_v20 = vor.u32 %v5936_v5, %v5244_v11  ;;  %v5238_v28 = vld [vmem:[#allocation20 + $0xc8] sm:$0xf0]  ;;  %v5927_v11 = vld [vmem:[#allocation20 + $0x94] sm:$0xf] }
 0x427   :  { %2876 = vmatpush.bf16.msra.mxu2 %v5177_v15  ;;  %v5217_v5 = vor.u32 %v5927_v11, %v5214_v4  ;;  %v5404_v15 = vld [vmem:[#allocation20 + $0x1f0] sm:$0xf]  ;;  %v5390_v11 = vld [vmem:[#allocation20 + $0x1d8] sm:$0xf0] }
 0x428   :  { %v2128_v30 = vpack.c.bf16 %v6859_v21, %v6857_v7  ;;  %2856 = vmatpush.bf16.msra.mxu1 %v5245_v20  ;;  %v5204_v20 = vld [vmem:[#allocation20 + $0x80] sm:$0xf] }
 0x429   :  { %v5205_v22 = vor.u32 %v5926_v10, %v5204_v20  ;;  %v5316_v10 = vld [vmem:[#allocation20 + $0x140] sm:$0xf] }
 0x42a   :  { %2310 = vmatmul.bf16.gmra.mxu2 %v2128_v30  ;;  %2329 = vmatmul.bf16.gmra.mxu3 %v2128_v30  ;;  %v5317_v16 = vor.u32 %v5954_v33, %v5316_v10  ;;  %v5964_v10 = vld [vmem:[#allocation20 + $0x194] sm:$0xf0]  ;;  %v5947_v33 = vld [vmem:[#allocation20 + $0x114] sm:$0xf] }
 0x42b   :  { %2348 = vmatmul.bf16.gmra.mxu0 %v2128_v30  ;;  %v5241_v30 = vor.u32 %v5933_v27, %v5238_v28  ;;  %2877 = vmatpush.bf16.msra.mxu2 %v5169_v40  ;;  %v5976_v28 = vld [vmem:[#allocation20 + $0x1f4] sm:$0xf0]  ;;  %v6885_v40 = vperm.slane %v2161_v19, 1 }
 0x42c   :  { %2857 = vmatpush.bf16.msra.mxu1 %v5237_v17  ;;  %v5960_v17 = vld [vmem:[#allocation20 + $0x174] sm:$0xf0] }
 0x42d   :  { %v2109_v26 = vpop.f32.mrf.mxu0  ;;  %2895 = vmatpush.bf16.msrb.mxu3 %v5241_v30  ;;  %v5341_v27 = vor.u32 %v5960_v17, %v5340_v25  ;;  %v5959_v30 = vld [vmem:[#allocation20 + $0x174] sm:$0xf]  ;;  %v5381_v17 = vor.u32 %v5970_v18, %v5380_v12  ;;  %v5294_v12 = vld [vmem:[#allocation20 + $0x118] sm:$0xf0] }
 0x42e   :  { %v6866_v45 = vadd.f32 %v6169_v44, %v2109_v26  ;;  %v5229_v26 = vor.u32 %v5932_v37, %v5228_v34  ;;  %v5405_v34 = vor.u32 %v5976_v28, %v5404_v15  ;;  %v5345_v35 = vor.u32 %v5959_v30, %v5342_v31  ;;  %v5975_v37 = vld [vmem:[#allocation20 + $0x1f4] sm:$0xf]  ;;  %v5382_v28 = vld [vmem:[#allocation20 + $0x1c8] sm:$0xf0] }
 0x42f   :  { %v5409_v39 = vor.u32 %v5975_v37, %v5406_v38  ;;  %v5372_v37 = vld [vmem:[#allocation20 + $0x1b0] sm:$0xf]  ;;  %v5297_v18 = vor.u32 %v5947_v33, %v5294_v12 }
 0x430   :  { %2858 = vmatpush.bf16.msra.mxu1 %v5229_v26  ;;  %v6883_v26 = vperm.slane %v2161_v19, 0  ;;  %v5953_v19 = vld [vmem:[#allocation20 + $0x144] sm:$0xf] }
 0x431   :  { %2896 = vmatpush.bf16.msrb.mxu3 %v5233_v42 }
 0x435   :  { %v2111_v9 = vpop.f32.mrf.mxu0  ;;  %2897 = vmatpush.bf16.msrb.mxu3 %v5225_v59  ;;  %v5324_v59 = vld [vmem:[#allocation20 + $0x150] sm:$0xf] }
 0x436   :  { %v6868_v46 = vadd.f32 %v6169_v44, %v2111_v9  ;;  %v5220_v9 = vld [vmem:[#allocation20 + $0xa0] sm:$0xf] }
 0x438   :  { %v2374_v47 = vpack.c.bf16 %v6868_v46, %v6866_v45 }
 0x439   :  { %2898 = vmatpush.bf16.msrb.mxu3 %v5217_v5 }
 0x43a   :  { %2554 = vmatmul.bf16.vlgmr.msrb.gmra.mxu1 %v2374_v47  ;;  %2573 = vmatmul.bf16.vlgmr.msrb.gmra.mxu2 %v2374_v47 }
 0x43b   :  { %2592 = vmatmul.bf16.vlgmr.msra.gmra.mxu3 %v2374_v47 }
 0x43d   :  { %v2114_v48 = vpop.f32.mrf.mxu0  ;;  %2899 = vmatpush.bf16.msrb.mxu3 %v5209_v23  ;;  %v5318_v23 = vld [vmem:[#allocation20 + $0x148] sm:$0xf0] }
 0x43e   :  { %v6872_v51 = vadd.f32 %v6169_v44, %v2114_v48  ;;  %v5930_v48 = vld [vmem:[#allocation20 + $0xa4] sm:$0xf0]  ;;  %v5321_v15 = vor.u32 %v5953_v19, %v5318_v23  ;;  %v5963_v19 = vld [vmem:[#allocation20 + $0x194] sm:$0xf]  ;;  %v5358_v23 = vld [vmem:[#allocation20 + $0x198] sm:$0xf0] }
 0x43f   :  { %v5221_v54 = vor.u32 %v5930_v48, %v5220_v9  ;;  %v5974_v9 = vld [vmem:[#allocation20 + $0x1e4] sm:$0xf0] }
 0x441   :  { %2859 = vmatpush.bf16.msra.mxu1 %v5221_v54  ;;  %3201 = vmatpush.bf16.msra.mxu3 %v5409_v39  ;;  %v5973_v54 = vld [vmem:[#allocation20 + $0x1e4] sm:$0xf]  ;;  %v5968_v39 = vld [vmem:[#allocation20 + $0x1b4] sm:$0xf0] }
 0x445   :  { %v2116_v50 = vpop.f32.mrf.mxu0  ;;  %2860 = vmatpush.bf16.msra.mxu1 %v5213_v2  ;;  %v5326_v2 = vld [vmem:[#allocation20 + $0x158] sm:$0xf0] }
 0x446   :  { %v6874_v52 = vadd.f32 %v6169_v44, %v2116_v50  ;;  %v5914_v44 = vld [vmem:[#allocation20 + $0x24] sm:$0xf0]  ;;  %v5913_v50 = vld [vmem:[#allocation20 + $0x24] sm:$0xf]  ;;  %v5329_v24 = vor.u32 %v5955_v0, %v5326_v2 }
 0x447   :  { %v5157_v47 = vor.u32 %v5914_v44, %v5156_v43  ;;  %v5333_v43 = vor.u32 %v5958_v41, %v5332_v36  ;;  %v5396_v44 = vld [vmem:[#allocation20 + $0x1e0] sm:$0xf]  ;;  %v5951_v36 = vld [vmem:[#allocation20 + $0x134] sm:$0xf]  ;;  %v5310_v41 = vld [vmem:[#allocation20 + $0x138] sm:$0xf0] }
 0x448   :  { %v2375_v53 = vpack.c.bf16 %v6874_v52, %v6872_v51 }
 0x449   :  { %2840 = vmatpush.bf16.msrb.mxu0 %v5157_v47  ;;  %2861 = vmatpush.bf16.msra.mxu1 %v5205_v22  ;;  %v5957_v47 = vld [vmem:[#allocation20 + $0x164] sm:$0xf] }
 0x44a   :  { %2559 = vmatmul.bf16.gmra.mxu1 %v2375_v53  ;;  %2578 = vmatmul.bf16.gmra.mxu2 %v2375_v53 }
 0x44b   :  { %2597 = vmatmul.bf16.gmra.mxu3 %v2375_v53  ;;  %v5158_v53 = vld [vmem:[#allocation20 + $0x28] sm:$0xf0] }
 0x44c   :  { %v5161_v55 = vor.u32 %v5913_v50, %v5158_v53  ;;  %v5397_v50 = vor.u32 %v5974_v9, %v5396_v44  ;;  %v5334_v53 = vld [vmem:[#allocation20 + $0x168] sm:$0xf0]  ;;  %v5373_v44 = vor.u32 %v5968_v39, %v5372_v37  ;;  %v5313_v9 = vor.u32 %v5951_v36, %v5310_v41  ;;  %v5962_v39 = vld [vmem:[#allocation20 + $0x184] sm:$0xf0]  ;;  %v5945_v36 = vld [vmem:[#allocation20 + $0x104] sm:$0xf] }
 0x44d   :  { %2841 = vmatpush.bf16.msrb.mxu0 %v5149_v61  ;;  %3163 = vmatpush.bf16.msrb.mxu1 %v5405_v34  ;;  %v5337_v56 = vor.u32 %v5957_v47, %v5334_v53  ;;  %v5325_v61 = vor.u32 %v5956_v29, %v5324_v59  ;;  %v5308_v34 = vld [vmem:[#allocation20 + $0x130] sm:$0xf]  ;;  %v5967_v47 = vld [vmem:[#allocation20 + $0x1b4] sm:$0xf]  ;;  %v5286_v41 = vld [vmem:[#allocation20 + $0x108] sm:$0xf0] }
 0x44e   :  { %2878 = vmatpush.bf16.msra.mxu2 %v5161_v55  ;;  %v5398_v55 = vld [vmem:[#allocation20 + $0x1e8] sm:$0xf0] }
 0x44f   :  { %v5401_v58 = vor.u32 %v5973_v54, %v5398_v55  ;;  %v5300_v55 = vld [vmem:[#allocation20 + $0x120] sm:$0xf] }
 0x451   :  { %2842 = vmatpush.bf16.msrb.mxu0 %v5141_v8  ;;  %3164 = vmatpush.bf16.msrb.mxu1 %v5397_v50 }
 0x452   :  { %2879 = vmatpush.bf16.msra.mxu2 %v5153_v3  ;;  %3202 = vmatpush.bf16.msra.mxu3 %v5401_v58  ;;  %v5971_v3 = vld [vmem:[#allocation20 + $0x1d4] sm:$0xf]  ;;  %v5364_v58 = vld [vmem:[#allocation20 + $0x1a0] sm:$0xf] }
 0x453   :  { %v5393_v6 = vor.u32 %v5971_v3, %v5390_v11  ;;  %v5965_v3 = vld [vmem:[#allocation20 + $0x1a4] sm:$0xf]  ;;  %v5366_v11 = vld [vmem:[#allocation20 + $0x1a8] sm:$0xf0] }
 0x455   :  { %3144 = vmatpush.bf16.msra.mxu0 %v5341_v27  ;;  %3165 = vmatpush.bf16.msrb.mxu1 %v5389_v1  ;;  %v5969_v27 = vld [vmem:[#allocation20 + $0x1c4] sm:$0xf] }
 0x456   :  { %2880 = vmatpush.bf16.msra.mxu2 %v5145_v49  ;;  %3203 = vmatpush.bf16.msra.mxu3 %v5393_v6  ;;  %v5385_v30 = vor.u32 %v5969_v27, %v5382_v28  ;;  %v5948_v6 = vld [vmem:[#allocation20 + $0x114] sm:$0xf0] }
 0x459   :  { %3145 = vmatpush.bf16.msra.mxu0 %v5333_v43  ;;  %3166 = vmatpush.bf16.msrb.mxu1 %v5381_v17 }
 0x45a   :  { %3182 = vmatpush.bf16.msrb.mxu2 %v5345_v35  ;;  %v5952_v35 = vld [vmem:[#allocation20 + $0x134] sm:$0xf0]  ;;  %3204 = vmatpush.bf16.msra.mxu3 %v5385_v30  ;;  %v5284_v30 = vld [vmem:[#allocation20 + $0x100] sm:$0xf] }
 0x45b   :  { %v5309_v38 = vor.u32 %v5952_v35, %v5308_v34  ;;  %v5348_v34 = vld [vmem:[#allocation20 + $0x180] sm:$0xf] }
 0x45d   :  { %3146 = vmatpush.bf16.msra.mxu0 %v5325_v61  ;;  %3167 = vmatpush.bf16.msrb.mxu1 %v5373_v44  ;;  %v5949_v61 = vld [vmem:[#allocation20 + $0x124] sm:$0xf] }
 0x45e   :  { %3183 = vmatpush.bf16.msrb.mxu2 %v5337_v56  ;;  %v5950_v56 = vld [vmem:[#allocation20 + $0x124] sm:$0xf0]  ;;  %v5305_v2 = vor.u32 %v5949_v61, %v5302_v63 }
 0x45f   :  { %v5301_v60 = vor.u32 %v5950_v56, %v5300_v55 }
 0x461   :  { %3147 = vmatpush.bf16.msra.mxu0 %v5317_v16 }
 0x462   :  { %3184 = vmatpush.bf16.msrb.mxu2 %v5329_v24  ;;  %v5292_v24 = vld [vmem:[#allocation20 + $0x110] sm:$0xf] }
 0x465   :  { %3148 = vmatpush.bf16.msra.mxu0 %v5309_v38 }
 0x466   :  { %3185 = vmatpush.bf16.msrb.mxu2 %v5321_v15  ;;  %v5361_v15 = vor.u32 %v5963_v19, %v5358_v23 }
 0x469   :  { %3149 = vmatpush.bf16.msra.mxu0 %v5301_v60  ;;  %v5025_v60 = vld [vmem:[%s6967_s9 + $0x3] sm:$0x7]  ;;  %s3610_s9 = sld [smem:[#allocation23]] }
 0x46a   :  { %3186 = vmatpush.bf16.msrb.mxu2 %v5313_v9  ;;  %v5349_v9 = vor.u32 %v5962_v39, %v5348_v34  ;;  %v2412_v63 = vperm.slane %v5025_v60, 0 }
 0x46e   :  { %3187 = vmatpush.bf16.msrb.mxu2 %v5305_v2 }
 0x46f   :  { %s3616_s21 = ssub.f32 1.0, %s3610_s9 }
 0x472   :  { %3188 = vmatpush.bf16.msrb.mxu2 %v5297_v18 }
 0x498   :  { %v2344_v42 = vpop.f32.mrf.mxu0 }
 0x499   :  { %v2345_v48 = vadd.f32 %v2344_v42, %v6881_v32 }
 0x49b   :  { %v2355_v62 = vpack.c.bf16 %v2345_v48, %v2345_v48  ;;  %v5374_v48 = vld [vmem:[#allocation20 + $0x1b8] sm:$0xf0] }
 0x49c   :  { %v5377_v54 = vor.u32 %v5967_v47, %v5374_v48  ;;  %v5961_v47 = vld [vmem:[#allocation20 + $0x184] sm:$0xf] }
 0x49d   :  { %2363 = vst [vmem:[#allocation2 + $0x8] sm:$0xf] %v2355_v62  ;;  %v2306_v4 = vpop.f32.mrf.mxu2  ;;  %v2325_v5 = vpop.f32.mrf.mxu3  ;;  %v5966_v62 = vld [vmem:[#allocation20 + $0x1a4] sm:$0xf0] }
 0x49e   :  { %v2307_v20 = vadd.f32 %v2306_v4, %v6883_v26  ;;  %v2326_v8 = vadd.f32 %v2325_v5, %v6885_v40  ;;  %3205 = vmatpush.bf16.msra.mxu3 %v5377_v54  ;;  %v5365_v1 = vor.u32 %v5966_v62, %v5364_v58  ;;  %v5369_v5 = vor.u32 %v5965_v3, %v5366_v11  ;;  %v5350_v54 = vld [vmem:[#allocation20 + $0x188] sm:$0xf0] }
 0x49f   :  { %v5353_v56 = vor.u32 %v5961_v47, %v5350_v54 }
 0x4a0   :  { %v2354_v22 = vpack.c.bf16 %v2326_v8, %v2307_v20  ;;  %v2346_v49 = vpop.f32.mrf.mxu0  ;;  %3168 = vmatpush.bf16.msrb.mxu1 %v5365_v1  ;;  %v5356_v20 = vld [vmem:[#allocation20 + $0x190] sm:$0xf]  ;;  %v5293_v8 = vor.u32 %v5948_v6, %v5292_v24  ;;  %v2414_v1 = vperm.slane %v5025_v60, 2 }
 0x4a1   :  { %v2347_v25 = vadd.f32 %v2346_v49, %v6881_v32  ;;  %v5357_v16 = vor.u32 %v5964_v10, %v5356_v20 }
 0x4a2   :  { %2362 = vst [vmem:[#allocation2] sm:$0xff] %v2354_v22  ;;  %3206 = vmatpush.bf16.msra.mxu3 %v5369_v5  ;;  %3150 = vmatpush.bf16.msra.mxu0 %v5293_v8 }
 0x4a3   :  { %v2357_v31 = vpack.c.bf16 %v2347_v25, %v2347_v25 }
 0x4a4   :  { %3169 = vmatpush.bf16.msrb.mxu1 %v5357_v16 }
 0x4a5   :  { %2365 = vst [vmem:[#allocation2 + $0x14] sm:$0xf] %v2357_v31  ;;  %v2308_v42 = vpop.f32.mrf.mxu2  ;;  %v2327_v43 = vpop.f32.mrf.mxu3  ;;  %v5946_v31 = vld [vmem:[#allocation20 + $0x104] sm:$0xf0] }
 0x4a6   :  { %v2309_v50 = vadd.f32 %v2308_v42, %v6883_v26  ;;  %v2328_v53 = vadd.f32 %v2327_v43, %v6885_v40  ;;  %v5285_v38 = vor.u32 %v5946_v31, %v5284_v30  ;;  %3207 = vmatpush.bf16.msra.mxu3 %v5361_v15 }
 0x4a8   :  { %v2356_v59 = vpack.c.bf16 %v2328_v53, %v2309_v50  ;;  %v2349_v29 = vpop.f32.mrf.mxu0  ;;  %3151 = vmatpush.bf16.msra.mxu0 %v5285_v38  ;;  %v5289_v53 = vor.u32 %v5945_v36, %v5286_v41  ;;  %3170 = vmatpush.bf16.msrb.mxu1 %v5349_v9 }
 0x4a9   :  { %v2350_v0 = vadd.f32 %v2349_v29, %v6881_v32  ;;  %v5124_v27 = vld [vmem:[#allocation2] sm:$0xf]  ;;  %v5905_v28 = vld [vmem:[#allocation2 + $0x4] sm:$0xf] }
 0x4aa   :  { %2364 = vst [vmem:[#allocation2 + $0xc] sm:$0xff] %v2356_v59  ;;  %3189 = vmatpush.bf16.msrb.mxu2 %v5289_v53  ;;  %3208 = vmatpush.bf16.msra.mxu3 %v5353_v56 }
 0x4ab   :  { %v2359_v4 = vpack.c.bf16 %v2350_v0, %v2350_v0  ;;  %v2413_v0 = vperm.slane %v5025_v60, 1  ;;  %v6002_v60 = vld [vmem:[#allocation22 + $0x38] sm:$0xff] }
 0x4ad   :  { %2367 = vst [vmem:[#allocation2 + $0x20] sm:$0xf] %v2359_v4  ;;  %v2311_v22 = vpop.f32.mrf.mxu2  ;;  %v2330_v49 = vpop.f32.mrf.mxu3 }
 0x4ae   :  { %v2312_v25 = vadd.f32 %v2311_v22, %v6883_v26  ;;  %v2331_v17 = vadd.f32 %v2330_v49, %v6885_v40 }
 0x4b0   :  { %v2358_v35 = vpack.c.bf16 %v2331_v17, %v2312_v25  ;;  %v2351_v37 = vpop.f32.mrf.mxu0 }
 0x4b1   :  { %v2352_v42 = vadd.f32 %v2351_v37, %v6881_v32  ;;  %v5906_v43 = vld [vmem:[#allocation2 + $0x8] sm:$0xf0]  ;;  %v5126_v44 = vld [vmem:[#allocation2 + $0xc] sm:$0xf0] }
 0x4b2   :  { %2366 = vst [vmem:[#allocation2 + $0x18] sm:$0xff] %v2358_v35  ;;  %v5125_v48 = vor.u32 %v5906_v43, %v5124_v27  ;;  %v5129_v50 = vor.u32 %v5905_v28, %v5126_v44 }
 0x4b3   :  { %v2361_v55 = vpack.c.bf16 %v2352_v42, %v2352_v42 }
 0x4b4   :  { %2843 = vmatmul.bf16.vlgmr.msrb.gmra.mxu0 %v5125_v48  ;;  %2862 = vmatmul.bf16.vlgmr.msra.gmra.mxu1 %v5129_v50 }
 0x4b5   :  { %2369 = vst [vmem:[#allocation2 + $0x2c] sm:$0xf] %v2361_v55  ;;  %2881 = vmatmul.bf16.vlgmr.msra.gmra.mxu2 %v5125_v48  ;;  %2900 = vmatmul.bf16.vlgmr.msrb.gmra.mxu3 %v5129_v50  ;;  %v2313_v32 = vpop.f32.mrf.mxu2  ;;  %v2332_v58 = vpop.f32.mrf.mxu3 }
 0x4b6   :  { %v2314_v59 = vadd.f32 %v2313_v32, %v6883_v26  ;;  %v2333_v29 = vadd.f32 %v2332_v58, %v6885_v40  ;;  %3591 = vmatpush.bf16.msra.mxu2 %v6002_v60 }
 0x4b7   :  { %v2555_v62 = vpop.f32.mrf.mxu1 }
 0x4b8   :  { %v2360_v61 = vpack.c.bf16 %v2333_v29, %v2314_v59  ;;  %v2556_v3 = vadd.f32 %v2555_v62, %v2412_v63 }
 0x4b9   :  { %v5132_v40 = vld [vmem:[#allocation2 + $0x18] sm:$0xf]  ;;  %v5907_v8 = vld [vmem:[#allocation2 + $0x1c] sm:$0xf] }
 0x4ba   :  { %2368 = vst [vmem:[#allocation2 + $0x24] sm:$0xff] %v2360_v61 }
 0x4bd   :  { %v2574_v2 = vpop.f32.mrf.mxu2 }
 0x4be   :  { %v2575_v11 = vadd.f32 %v2574_v2, %v2413_v0  ;;  %v2593_v4 = vpop.f32.mrf.mxu3 }
 0x4bf   :  { %v2594_v5 = vadd.f32 %v2593_v4, %v2414_v1  ;;  %v2557_v26 = vpop.f32.mrf.mxu1 }
 0x4c0   :  { %v2603_v24 = vpack.c.bf16 %v2575_v11, %v2556_v3  ;;  %v2558_v49 = vadd.f32 %v2557_v26, %v2412_v63 }
 0x4c1   :  { %v2604_v6 = vpack.c.bf16 %v2594_v5, %v2594_v5  ;;  %v5908_v20 = vld [vmem:[#allocation2 + $0x20] sm:$0xf0]  ;;  %v5134_v10 = vld [vmem:[#allocation2 + $0x24] sm:$0xf0] }
 0x4c2   :  { %2611 = vst [vmem:[#allocation2 + $0x30] sm:$0xff] %v2603_v24  ;;  %v5133_v33 = vor.u32 %v5908_v20, %v5132_v40  ;;  %v5137_v12 = vor.u32 %v5907_v8, %v5134_v10  ;;  %v5999_v24 = vld [vmem:[#allocation22 + $0x20] sm:$0xff]  ;;  %v5998_v20 = vld [vmem:[#allocation22 + $0x18] sm:$0xff] }
 0x4c3   :  { %2612 = vst [vmem:[#allocation2 + $0x38] sm:$0xf] %v2604_v6  ;;  %v5985_v6 = vld [vmem:[#allocation3 + $0x30] sm:$0xff] }
 0x4c4   :  { %2848 = vmatmul.bf16.gmra.mxu0 %v5133_v33  ;;  %2867 = vmatmul.bf16.gmra.mxu1 %v5137_v12 }
 0x4c5   :  { %2886 = vmatmul.bf16.gmra.mxu2 %v5133_v33  ;;  %2905 = vmatmul.bf16.gmra.mxu3 %v5137_v12  ;;  %v2576_v22 = vpop.f32.mrf.mxu2 }
 0x4c6   :  { %v2577_v16 = vadd.f32 %v2576_v22, %v2413_v0  ;;  %v2595_v18 = vpop.f32.mrf.mxu3 }
 0x4c7   :  { %v2596_v19 = vadd.f32 %v2595_v18, %v2414_v1  ;;  %v2560_v17 = vpop.f32.mrf.mxu1  ;;  %v5997_v18 = vld [vmem:[#allocation22 + $0x10] sm:$0xff] }
 0x4c8   :  { %v2605_v23 = vpack.c.bf16 %v2577_v16, %v2558_v49  ;;  %v2561_v27 = vadd.f32 %v2560_v17, %v2412_v63 }
 0x4c9   :  { %v2606_v25 = vpack.c.bf16 %v2596_v19, %v2596_v19  ;;  %v5268_v35 = vld [vmem:[#allocation2 + $0x30] sm:$0xf]  ;;  %v5941_v39 = vld [vmem:[#allocation2 + $0x34] sm:$0xf]  ;;  %v5984_v19 = vld [vmem:[#allocation3 + $0x28] sm:$0xff] }
 0x4ca   :  { %2613 = vst [vmem:[#allocation2 + $0x3c] sm:$0xff] %v2605_v23  ;;  %v5996_v23 = vld [vmem:[#allocation22 + $0x8] sm:$0xff] }
 0x4cb   :  { %2614 = vst [vmem:[#allocation2 + $0x44] sm:$0xf] %v2606_v25 }
 0x4cd   :  { %v2579_v15 = vpop.f32.mrf.mxu2 }
 0x4ce   :  { %v2580_v28 = vadd.f32 %v2579_v15, %v2413_v0  ;;  %v2598_v30 = vpop.f32.mrf.mxu3 }
 0x4cf   :  { %v2599_v31 = vadd.f32 %v2598_v30, %v2414_v1  ;;  %v2562_v43 = vpop.f32.mrf.mxu1 }
 0x4d0   :  { %v2607_v34 = vpack.c.bf16 %v2580_v28, %v2561_v27  ;;  %v2563_v9 = vadd.f32 %v2562_v43, %v2412_v63  ;;  %v6001_v63 = vld [vmem:[#allocation22 + $0x30] sm:$0xff] }
 0x4d1   :  { %v2608_v37 = vpack.c.bf16 %v2599_v31, %v2599_v31  ;;  %v5942_v38 = vld [vmem:[#allocation2 + $0x38] sm:$0xf0]  ;;  %v5270_v36 = vld [vmem:[#allocation2 + $0x3c] sm:$0xf0]  ;;  %3592 = vmatpush.bf16.msra.mxu2 %v6001_v63 }
 0x4d2   :  { %2615 = vst [vmem:[#allocation2 + $0x48] sm:$0xff] %v2607_v34  ;;  %v5269_v41 = vor.u32 %v5942_v38, %v5268_v35  ;;  %v5273_v42 = vor.u32 %v5941_v39, %v5270_v36  ;;  %v5995_v31 = vld [vmem:[#allocation22] sm:$0xff]  ;;  %v5983_v38 = vld [vmem:[#allocation3 + $0x20] sm:$0xff] }
 0x4d3   :  { %2616 = vst [vmem:[#allocation2 + $0x50] sm:$0xf] %v2608_v37  ;;  %v5994_v35 = vld [vmem:[#allocation4 + $0x38] sm:$0xff] }
 0x4d4   :  { %3152 = vmatmul.bf16.vlgmr.msra.gmra.mxu0 %v5269_v41  ;;  %3171 = vmatmul.bf16.vlgmr.msrb.gmra.mxu1 %v5273_v42  ;;  %v6028_v37 = vld [vmem:[#allocation4 + $0x38] sm:$0xff] }
 0x4d5   :  { %3190 = vmatmul.bf16.vlgmr.msrb.gmra.mxu2 %v5269_v41  ;;  %3209 = vmatmul.bf16.vlgmr.msra.gmra.mxu3 %v5273_v42  ;;  %v2581_v44 = vpop.f32.mrf.mxu2  ;;  %v5993_v41 = vld [vmem:[#allocation4 + $0x30] sm:$0xff] }
 0x4d6   :  { %v2582_v47 = vadd.f32 %v2581_v44, %v2413_v0  ;;  %v2600_v48 = vpop.f32.mrf.mxu3  ;;  %v5986_v0 = vld [vmem:[#allocation3 + $0x38] sm:$0xff]  ;;  %3454 = vmatpush.bf16.msra.mxu1 %v5994_v35  ;;  %v6027_v42 = vld [vmem:[#allocation4 + $0x30] sm:$0xff] }
 0x4d7   :  { %v2601_v50 = vadd.f32 %v2600_v48, %v2414_v1  ;;  %v6000_v1 = vld [vmem:[#allocation22 + $0x28] sm:$0xff]  ;;  %3332 = vmatpush.bf16.xpose.msrb.mxu0 %v5986_v0  ;;  %v6019_v35 = vld [vmem:[#allocation3 + $0x30] sm:$0xff] }
 0x4d8   :  { %v2609_v53 = vpack.c.bf16 %v2582_v47, %v2563_v9  ;;  %3593 = vmatpush.bf16.msra.mxu2 %v6000_v1 }
 0x4d9   :  { %v2610_v54 = vpack.c.bf16 %v2601_v50, %v2601_v50  ;;  %v5276_v55 = vld [vmem:[#allocation2 + $0x48] sm:$0xf]  ;;  %v5943_v32 = vld [vmem:[#allocation2 + $0x4c] sm:$0xf] }
 0x4da   :  { %2617 = vst [vmem:[#allocation2 + $0x54] sm:$0xff] %v2609_v53  ;;  %3455 = vmatpush.bf16.msra.mxu1 %v5993_v41  ;;  %v5992_v50 = vld [vmem:[#allocation4 + $0x28] sm:$0xff]  ;;  %v6017_v41 = vld [vmem:[#allocation3 + $0x20] sm:$0xff] }
 0x4db   :  { %2618 = vst [vmem:[#allocation2 + $0x5c] sm:$0xf] %v2610_v54  ;;  %v6026_v53 = vld [vmem:[#allocation4 + $0x28] sm:$0xff]  ;;  %v5991_v54 = vld [vmem:[#allocation4 + $0x20] sm:$0xff] }
 0x4dc   :  { %3594 = vmatpush.bf16.msra.mxu2 %v5999_v24 }
 0x4de   :  { %3456 = vmatpush.bf16.msra.mxu1 %v5992_v50 }
 0x4df   :  { %3333 = vmatpush.bf16.xpose.msrb.mxu0 %v5985_v6 }
 0x4e0   :  { %3595 = vmatpush.bf16.msra.mxu2 %v5998_v20 }
 0x4e1   :  { %v5944_v56 = vld [vmem:[#allocation2 + $0x50] sm:$0xf0]  ;;  %v5278_v58 = vld [vmem:[#allocation2 + $0x54] sm:$0xf0] }
 0x4e2   :  { %v5277_v59 = vor.u32 %v5944_v56, %v5276_v55  ;;  %v5281_v29 = vor.u32 %v5943_v32, %v5278_v58  ;;  %v6025_v55 = vld [vmem:[#allocation4 + $0x20] sm:$0xff]  ;;  %3457 = vmatpush.bf16.msra.mxu1 %v5991_v54 }
 0x4e4   :  { %3157 = vmatmul.bf16.gmra.mxu0 %v5277_v59  ;;  %3176 = vmatmul.bf16.gmra.mxu1 %v5281_v29 }
 0x4e5   :  { %3195 = vmatmul.bf16.gmra.mxu2 %v5277_v59  ;;  %3214 = vmatmul.bf16.gmra.mxu3 %v5281_v29 }
 0x4e6   :  { %3596 = vmatpush.bf16.msra.mxu2 %v5997_v18 }
 0x4e7   :  { %3334 = vmatpush.bf16.xpose.msrb.mxu0 %v5984_v19 }
 0x4ea   :  { %3597 = vmatpush.bf16.msra.mxu2 %v5996_v23 }
 0x4ee   :  { %3598 = vmatpush.bf16.msra.mxu2 %v5995_v31 }
 0x4ef   :  { %3335 = vmatpush.bf16.xpose.msrb.mxu0 %v5983_v38  ;;  %v5412_v38 = vld [vmem:[#allocation2 + $0x8] sm:$0xf] }
 0x4f2   :  { %3941 = vmatpush.bf16.msrb.mxu2 %v6028_v37  ;;  %v5977_v37 = vld [vmem:[#allocation2 + $0x10] sm:$0xf0] }
 0x4f6   :  { %3942 = vmatpush.bf16.msrb.mxu2 %v6027_v42  ;;  %v5978_v42 = vld [vmem:[#allocation2 + $0x28] sm:$0xf0] }
 0x4fa   :  { %3943 = vmatpush.bf16.msrb.mxu2 %v6026_v53  ;;  %v3351_v53 = vld [vmem:[#allocation10] sm:$0xff] }
 0x4fb   :  { %v3352_v54 = vunpack.c.0.s8 %v3351_v53 }
 0x4fe   :  { %3944 = vmatpush.bf16.msrb.mxu2 %v6025_v55  ;;  %v3356_v55 = vcvt.s32.f32 %v3352_v54 }
 0x500   :  { %vm3360_vm0 = vcmp.gt.f32.partialorder %v3356_v55, 0.0 }
 0x531   :  { %v2844_v62 = vpop.f32.mrf.mxu0  ;;  %v2863_v61 = vpop.f32.mrf.mxu1 }
 0x532   :  { %v2864_v5 = vadd.f32 %v2863_v61, %v2844_v62 }
 0x538   :  { %v2882_v2 = vpop.f32.mrf.mxu2  ;;  %v2901_v3 = vpop.f32.mrf.mxu3 }
 0x539   :  { %v2846_v11 = vpop.f32.mrf.mxu0  ;;  %v2865_v4 = vpop.f32.mrf.mxu1  ;;  %v2902_v33 = vadd.f32 %v2901_v3, %v2882_v2 }
 0x53a   :  { %v2866_v26 = vadd.f32 %v2865_v4, %v2846_v11 }
 0x53c   :  { %v6088_v40 = vpack.c.bf16 %v2866_v26, %v2864_v5 }
 0x53e   :  { %6089 = vst [vmem:[#allocation3] sm:$0xff] %v6088_v40  }
 0x540   :  { %v2884_v8 = vpop.f32.mrf.mxu2  ;;  %v2903_v10 = vpop.f32.mrf.mxu3 }
 0x541   :  { %v2904_v12 = vadd.f32 %v2903_v10, %v2884_v8  ;;  %v2849_v22 = vpop.f32.mrf.mxu0  ;;  %v2868_v49 = vpop.f32.mrf.mxu1 }
 0x542   :  { %v2869_v28 = vadd.f32 %v2868_v49, %v2849_v22 }
 0x543   :  { %v6098_v16 = vpack.c.bf16 %v2904_v12, %v2902_v33 }
 0x545   :  { %6099 = vst [vmem:[#allocation4] sm:$0xff] %v6098_v16   ;;  %v6013_v50 = vld [vmem:[#allocation3] sm:$0xff] }
 0x548   :  { %v2887_v25 = vpop.f32.mrf.mxu2  ;;  %v2906_v17 = vpop.f32.mrf.mxu3 }
 0x549   :  { %v2851_v15 = vpop.f32.mrf.mxu0  ;;  %v2870_v27 = vpop.f32.mrf.mxu1  ;;  %v2907_v43 = vadd.f32 %v2906_v17, %v2887_v25 }
 0x54a   :  { %v2871_v30 = vadd.f32 %v2870_v27, %v2851_v15 }
 0x54c   :  { %v6093_v34 = vpack.c.bf16 %v2871_v30, %v2869_v28  ;;  %v6020_v28 = vld [vmem:[#allocation3 + $0x38] sm:$0xff]  ;;  %v5987_v30 = vld [vmem:[#allocation4] sm:$0xff] }
 0x54d   :  { %v6021_v31 = vld [vmem:[#allocation4] sm:$0xff] }
 0x54e   :  { %6131 = vst [vmem:[#allocation3 + $0x8] sm:$0xff] %v6093_v34   ;;  %v5979_v34 = vld [vmem:[#allocation3] sm:$0xff] }
 0x550   :  { %v2889_v39 = vpop.f32.mrf.mxu2  ;;  %v2908_v36 = vpop.f32.mrf.mxu3 }
 0x551   :  { %v2909_v44 = vadd.f32 %v2908_v36, %v2889_v39  ;;  %v3153_v9 = vpop.f32.mrf.mxu0  ;;  %v3172_v47 = vpop.f32.mrf.mxu1  ;;  %v5413_v39 = vor.u32 %v5977_v37, %v5412_v38  ;;  %v6018_v36 = vld [vmem:[#allocation3 + $0x28] sm:$0xff] }
 0x552   :  { %v3173_v29 = vadd.f32 %v3172_v47, %v3153_v9 }
 0x553   :  { %v6103_v48 = vpack.c.bf16 %v2909_v44, %v2907_v43  ;;  %v5416_v43 = vld [vmem:[#allocation2 + $0x20] sm:$0xf] }
 0x554   :  { %v5417_v44 = vor.u32 %v5978_v42, %v5416_v43 }
 0x555   :  { %6132 = vst [vmem:[#allocation4 + $0x8] sm:$0xff] %v6103_v48   ;;  %v5980_v27 = vld [vmem:[#allocation3 + $0x8] sm:$0xff] }
 0x556   :  { %v6014_v48 = vld [vmem:[#allocation3 + $0x8] sm:$0xff] }
 0x558   :  { %v3191_v56 = vpop.f32.mrf.mxu2  ;;  %v3210_v32 = vpop.f32.mrf.mxu3 }
 0x559   :  { %v3155_v58 = vpop.f32.mrf.mxu0  ;;  %v3174_v59 = vpop.f32.mrf.mxu1  ;;  %v3211_v0 = vadd.f32 %v3210_v32, %v3191_v56  ;;  %v3353_v56 = vunpack.c.1.s8 %v3351_v53 }
 0x55a   :  { %v3175_v60 = vadd.f32 %v3174_v59, %v3155_v58 }
 0x55b   :  { %v3357_v59 = vcvt.s32.f32 %v3353_v56 }
 0x55c   :  { %v6108_v62 = vpack.c.bf16 %v3175_v60, %v3173_v29  ;;  %v5988_v17 = vld [vmem:[#allocation4 + $0x8] sm:$0xff]  ;;  %v3354_v29 = vunpack.c.2.s8 %v3351_v53 }
 0x55d   :  { %v6022_v15 = vld [vmem:[#allocation4 + $0x8] sm:$0xff]  ;;  %vm3361_vm1 = vcmp.gt.f32.partialorder %v3357_v59, 0.0 }
 0x55e   :  { %6133 = vst [vmem:[#allocation3 + $0x10] sm:$0xff] %v6108_v62  }
 0x560   :  { %v3193_v61 = vpop.f32.mrf.mxu2  ;;  %v3212_v63 = vpop.f32.mrf.mxu3 }
 0x561   :  { %v3213_v1 = vadd.f32 %v3212_v63, %v3193_v61  ;;  %v3158_v2 = vpop.f32.mrf.mxu0  ;;  %v3177_v3 = vpop.f32.mrf.mxu1  ;;  %v3358_v61 = vcvt.s32.f32 %v3354_v29  ;;  %v3355_v63 = vunpack.c.3.s8 %v3351_v53 }
 0x562   :  { %v3178_v40 = vadd.f32 %v3177_v3, %v3158_v2 }
 0x563   :  { %v6118_v11 = vpack.c.bf16 %v3213_v1, %v3211_v0  ;;  %vm3362_vm2 = vcmp.gt.f32.partialorder %v3358_v61, 0.0  ;;  %v3359_v2 = vcvt.s32.f32 %v3355_v63 }
 0x565   :  { %6135 = vst [vmem:[#allocation4 + $0x10] sm:$0xff] %v6118_v11   ;;  %v5981_v19 = vld [vmem:[#allocation3 + $0x10] sm:$0xff]  ;;  %vm3363_vm3 = vcmp.gt.f32.partialorder %v3359_v2, 0.0 }
 0x566   :  { %v6015_v47 = vld [vmem:[#allocation3 + $0x10] sm:$0xff] }
 0x568   :  { %v3196_v4 = vpop.f32.mrf.mxu2  ;;  %v3215_v5 = vpop.f32.mrf.mxu3 }
 0x569   :  { %v3160_v26 = vpop.f32.mrf.mxu0  ;;  %v3179_v24 = vpop.f32.mrf.mxu1  ;;  %v3216_v33 = vadd.f32 %v3215_v5, %v3196_v4 }
 0x56a   :  { %v3180_v6 = vadd.f32 %v3179_v24, %v3160_v26 }
 0x56c   :  { %v6113_v20 = vpack.c.bf16 %v3180_v6, %v3178_v40  ;;  %v5989_v23 = vld [vmem:[#allocation4 + $0x10] sm:$0xff] }
 0x56d   :  { %v6023_v25 = vld [vmem:[#allocation4 + $0x10] sm:$0xff] }
 0x56e   :  { %6134 = vst [vmem:[#allocation3 + $0x18] sm:$0xff] %v6113_v20  }
 0x570   :  { %v3198_v8 = vpop.f32.mrf.mxu2  ;;  %v3217_v10 = vpop.f32.mrf.mxu3 }
 0x571   :  { %v3218_v12 = vadd.f32 %v3217_v10, %v3198_v8 }
 0x573   :  { %v6123_v22 = vpack.c.bf16 %v3218_v12, %v3216_v33 }
 0x575   :  { %6136 = vst [vmem:[#allocation4 + $0x18] sm:$0xff] %v6123_v22   ;;  %v5982_v49 = vld [vmem:[#allocation3 + $0x18] sm:$0xff] }
 0x576   :  { %3336 = vmatpush.bf16.xpose.msrb.mxu0 %v5982_v49  ;;  %v6016_v9 = vld [vmem:[#allocation3 + $0x18] sm:$0xff] }
 0x57c   :  { %v5990_v16 = vld [vmem:[#allocation4 + $0x18] sm:$0xff] }
 0x57d   :  { %v6024_v18 = vld [vmem:[#allocation4 + $0x18] sm:$0xff]  ;;  %3458 = vmatpush.bf16.msra.mxu1 %v5990_v16 }
 0x57e   :  { %3945 = vmatpush.bf16.msrb.mxu2 %v6024_v18  ;;  %3337 = vmatpush.bf16.xpose.msrb.mxu0 %v5981_v19 }
 0x581   :  { %3459 = vmatpush.bf16.msra.mxu1 %v5989_v23 }
 0x582   :  { %3946 = vmatpush.bf16.msrb.mxu2 %v6023_v25 }
 0x585   :  { %3460 = vmatpush.bf16.msra.mxu1 %v5988_v17  ;;  %v6011_v17 = vld [vmem:[#allocation2 + $0x40] sm:$0xf0] }
 0x586   :  { %3947 = vmatpush.bf16.msrb.mxu2 %v6022_v15  ;;  %3338 = vmatpush.bf16.xpose.msrb.mxu0 %v5980_v27  ;;  %v5548_v15 = vld [vmem:[#allocation2 + $0x38] sm:$0xf] }
 0x587   :  { %v5549_v27 = vor.u32 %v6011_v17, %v5548_v15 }
 0x589   :  { %3461 = vmatpush.bf16.msra.mxu1 %v5987_v30  ;;  %v5552_v30 = vld [vmem:[#allocation2 + $0x50] sm:$0xf] }
 0x58a   :  { %3948 = vmatpush.bf16.msrb.mxu2 %v6021_v31 }
 0x58d   :  { %3819 = vmatpush.bf16.xpose.msrb.mxu1 %v6020_v28  ;;  %v6012_v28 = vld [vmem:[#allocation2 + $0x58] sm:$0xf0] }
 0x58e   :  { %3339 = vmatpush.bf16.xpose.msrb.mxu0 %v5979_v34  ;;  %v5553_v31 = vor.u32 %v6012_v28, %v5552_v30 }
 0x595   :  { %3820 = vmatpush.bf16.xpose.msrb.mxu1 %v6019_v35  ;;  %3340 = vmatmul.bf16.vlgmr.msrb.gmra.mxu0 %v5413_v39 }
 0x59d   :  { %3821 = vmatpush.bf16.xpose.msrb.mxu1 %v6018_v36 }
 0x5a5   :  { %3822 = vmatpush.bf16.xpose.msrb.mxu1 %v6017_v41  ;;  %3345 = vmatmul.bf16.gmra.mxu0 %v5417_v44 }
 0x5ad   :  { %3823 = vmatpush.bf16.xpose.msrb.mxu1 %v6016_v9 }
 0x5b5   :  { %3824 = vmatpush.bf16.xpose.msrb.mxu1 %v6015_v47 }
 0x5bd   :  { %3825 = vmatpush.bf16.xpose.msrb.mxu1 %v6014_v48 }
 0x5c5   :  { %3826 = vmatpush.bf16.xpose.msrb.mxu1 %v6013_v50 }
 0x612   :  { %v3341_v32 = vpop.f32.mrf.mxu0 }
 0x613   :  { %v3364_v58 = vsel %vm3360_vm0, %v3341_v32, -1e+30 }
 0x614   :  { %3368 = vmax.xlane.f32.xlu1 %v3364_v58 }
 0x61a   :  { %v3343_v60 = vpop.f32.mrf.mxu0 }
 0x61b   :  { %v3365_v62 = vsel %vm3361_vm1, %v3343_v60, -1e+30 }
 0x61c   :  { %3370 = vmax.xlane.f32.xlu2 %v3365_v62 }
 0x622   :  { %v3346_v0 = vpop.f32.mrf.mxu0 }
 0x623   :  { %v3366_v1 = vsel %vm3362_vm2, %v3346_v0, -1e+30 }
 0x624   :  { %3372 = vmax.xlane.f32.xlu0 %v3366_v1 }
 0x62a   :  { %v3348_v3 = vpop.f32.mrf.mxu0 }
 0x62b   :  { %v3367_v11 = vsel %vm3363_vm3, %v3348_v3, -1e+30 }
 0x62c   :  { %3374 = vmax.xlane.f32.xlu1 %v3367_v11 }
 0x687   :  { %v3369_v4 = vpop.xlane.xlu1 %3368 }
 0x688   :  { %v3376_v5 = vsub.f32 %v3364_v58, %v3369_v4  ;;  %vm3396_vm4 = vcmp.gt.f32.partialorder %v3369_v4, -5e+29 }
 0x689   :  { %v3400_v38 = vsel %vm3396_vm4, 1.0, %v6599_v57 }
 0x68a   :  { %v3380_v26 = vmul.f32 1.442695, %v3376_v5 }
 0x68c   :  { %6222 = vpow2.f32 %v3380_v26 }
 0x68f   :  { %v3371_v24 = vpop.xlane.xlu2 %3370 }
 0x690   :  { %v3377_v40 = vsub.f32 %v3365_v62, %v3371_v24  ;;  %vm3397_vm5 = vcmp.gt.f32.partialorder %v3371_v24, -5e+29 }
 0x691   :  { %v3401_v47 = vsel %vm3397_vm5, 1.0, %v6599_v57 }
 0x692   :  { %v6223_v6 = vpop.eup %6222  ;;  %v3382_v20 = vmul.f32 1.442695, %v3377_v40 }
 0x693   :  { %3388 = vadd.xlane.f32.xlu2 %v6223_v6 }
 0x694   :  { %6224 = vpow2.f32 %v3382_v20 }
 0x697   :  { %v3373_v8 = vpop.xlane.xlu0 %3372 }
 0x698   :  { %v3378_v10 = vsub.f32 %v3366_v1, %v3373_v8  ;;  %vm3398_vm6 = vcmp.gt.f32.partialorder %v3373_v8, -5e+29 }
 0x699   :  { %v3402_v60 = vsel %vm3398_vm6, 1.0, %v6599_v57 }
 0x69a   :  { %v6225_v33 = vpop.eup %6224  ;;  %v3384_v12 = vmul.f32 1.442695, %v3378_v10 }
 0x69b   :  { %v3404_v22 = vpack.c.bf16 %v6225_v33, %v6223_v6  ;;  %3390 = vadd.xlane.f32.xlu0 %v6225_v33 }
 0x69c   :  { %6226 = vpow2.f32 %v3384_v12 }
 0x69d   :  { %3462 = vmatmul.bf16.vlgmr.msra.gmra.mxu1 %v3404_v22 }
 0x69f   :  { %v3375_v49 = vpop.xlane.xlu1 %3374 }
 0x6a0   :  { %v3379_v16 = vsub.f32 %v3367_v11, %v3375_v49  ;;  %vm3399_vm7 = vcmp.gt.f32.partialorder %v3375_v49, -5e+29  ;;  %v3838_v11 = vld [vmem:[#allocation10 + $0x8] sm:$0xff] }
 0x6a1   :  { %v3403_v26 = vsel %vm3399_vm7, 1.0, %v6599_v57  ;;  %v3839_v24 = vunpack.c.0.s8 %v3838_v11  ;;  %v3840_v28 = vunpack.c.1.s8 %v3838_v11 }
 0x6a2   :  { %v6227_v18 = vpop.eup %6226  ;;  %v3386_v19 = vmul.f32 1.442695, %v3379_v16 }
 0x6a3   :  { %3392 = vadd.xlane.f32.xlu1 %v6227_v18  ;;  %v3843_v22 = vcvt.s32.f32 %v3839_v24 }
 0x6a4   :  { %6228 = vpow2.f32 %v3386_v19 }
 0x6a5   :  { %vm3847_vm8 = vcmp.gt.f32.partialorder %v3843_v22, 0.0 }
 0x6aa   :  { %v6229_v23 = vpop.eup %6228 }
 0x6ab   :  { %3394 = vadd.xlane.f32.xlu2 %v6229_v23  ;;  %v3405_v25 = vpack.c.bf16 %v6229_v23, %v6227_v18 }
 0x6ad   :  { %3467 = vmatmul.bf16.gmra.mxu1 %v3405_v25 }
 0x6bd   :  { %3827 = vmatmul.bf16.vlgmr.msrb.gmra.mxu1 %v5549_v27 }
 0x6cd   :  { %3832 = vmatmul.bf16.gmra.mxu1 %v5553_v31 }
 0x706   :  { %v3389_v34 = vpop.xlane.xlu2 %3388 }
 0x707   :  { %6230 = vrcp.f32 %v3389_v34 }
 0x70d   :  { %v6231_v37 = vpop.eup %6230 }
 0x70e   :  { %v3391_v35 = vpop.xlane.xlu0 %3390  ;;  %v3477_v39 = vmul.f32 %v6231_v37, %v3400_v38  ;;  %v3844_v38 = vcvt.s32.f32 %v3840_v28 }
 0x70f   :  { %6232 = vrcp.f32 %v3391_v35 }
 0x710   :  { %vm3848_vm9 = vcmp.gt.f32.partialorder %v3844_v38, 0.0 }
 0x715   :  { %v6233_v44 = vpop.eup %6232 }
 0x716   :  { %v3393_v42 = vpop.xlane.xlu1 %3392  ;;  %v3478_v50 = vmul.f32 %v6233_v44, %v3401_v47 }
 0x717   :  { %6234 = vrcp.f32 %v3393_v42 }
 0x71a   :  { %v3463_v36 = vpop.f32.mrf.mxu1 }
 0x71b   :  { %v3481_v41 = vmul.f32 %v3477_v39, %v3463_v36  ;;  %v3841_v36 = vunpack.c.2.s8 %v3838_v11 }
 0x71d   :  { %v3489_v43 = vmul.f32 0.044715, %v3481_v41  ;;  %v6235_v58 = vpop.eup %6234  ;;  %v3485_v49 = vmul.f32 0.5, %v3481_v41  ;;  %v3845_v44 = vcvt.s32.f32 %v3841_v36 }
 0x71e   :  { %v3395_v56 = vpop.xlane.xlu2 %3394  ;;  %v3479_v61 = vmul.f32 %v6235_v58, %v3402_v60 }
 0x71f   :  { %v3493_v9 = vmul.f32 %v3489_v43, %v3481_v41  ;;  %6236 = vrcp.f32 %v3395_v56  ;;  %vm3849_vm10 = vcmp.gt.f32.partialorder %v3845_v44, 0.0  ;;  %v3842_v56 = vunpack.c.3.s8 %v3838_v11  ;;  %v6004_v11 = vld [vmem:[#allocation25 + $0x8] sm:$0xff] }
 0x721   :  { %v3497_v48 = vmul.f32 %v3493_v9, %v3481_v41 }
 0x722   :  { %v3465_v53 = vpop.f32.mrf.mxu1 }
 0x723   :  { %v3501_v54 = vadd.f32 %v3497_v48, %v3481_v41  ;;  %v3482_v55 = vmul.f32 %v3478_v50, %v3465_v53 }
 0x725   :  { %v3490_v32 = vmul.f32 0.044715, %v3482_v55  ;;  %v3505_v59 = vmul.f32 0.7978846, %v3501_v54  ;;  %v6237_v4 = vpop.eup %6236  ;;  %v3486_v19 = vmul.f32 0.5, %v3482_v55 }
 0x726   :  { %v3480_v6 = vmul.f32 %v6237_v4, %v3403_v26  ;;  %v6003_v4 = vld [vmem:[#allocation25] sm:$0xff] }
 0x727   :  { %v3494_v29 = vmul.f32 %v3490_v32, %v3482_v55  ;;  %6238 = vtanh.f32 %v3505_v59 }
 0x729   :  { %v3498_v62 = vmul.f32 %v3494_v29, %v3482_v55  ;;  %v3846_v29 = vcvt.s32.f32 %v3842_v56 }
 0x72a   :  { %v3468_v63 = vpop.f32.mrf.mxu1 }
 0x72b   :  { %v3502_v0 = vadd.f32 %v3498_v62, %v3482_v55  ;;  %v3483_v1 = vmul.f32 %v3479_v61, %v3468_v63  ;;  %vm3850_vm11 = vcmp.gt.f32.partialorder %v3846_v29, 0.0  ;;  %v6010_v61 = vld [vmem:[#allocation25 + $0x38] sm:$0xff]  ;;  %v6009_v63 = vld [vmem:[#allocation25 + $0x30] sm:$0xff]  ;;  %v6033_v29 = vld [vmem:[#allocation22 + $0x60] sm:$0xff] }
 0x72c   :  { %3700 = vmatpush.bf16.msrb.mxu3 %v6010_v61 }
 0x72d   :  { %v3506_v2 = vmul.f32 0.7978846, %v3502_v0  ;;  %v3491_v3 = vmul.f32 0.044715, %v3483_v1  ;;  %v6239_v40 = vpop.eup %6238  ;;  %v3487_v48 = vmul.f32 0.5, %v3483_v1  ;;  %v6008_v0 = vld [vmem:[#allocation25 + $0x28] sm:$0xff] }
 0x72e   :  { %v3513_v12 = vadd.f32 1.0, %v6239_v40 }
 0x72f   :  { %6240 = vtanh.f32 %v3506_v2  ;;  %v3495_v5 = vmul.f32 %v3491_v3, %v3483_v1  ;;  %v6006_v2 = vld [vmem:[#allocation25 + $0x18] sm:$0xff]  ;;  %v6005_v3 = vld [vmem:[#allocation25 + $0x10] sm:$0xff] }
 0x730   :  { %v3517_v15 = vmul.f32 %v3513_v12, %v3485_v49  ;;  %3701 = vmatpush.bf16.msrb.mxu3 %v6009_v63  ;;  %v6170_v12 = vld [vmem:[%s6970_s12] ss:$0 sm:$0xff] }
 0x731   :  { %v3499_v20 = vmul.f32 %v3495_v5, %v3483_v1  ;;  %v6030_v63 = vld [vmem:[#allocation22 + $0x48] sm:$0xff] }
 0x732   :  { %v3470_v8 = vpop.f32.mrf.mxu1 }
 0x733   :  { %v3484_v10 = vmul.f32 %v3480_v6, %v3470_v8  ;;  %v3503_v33 = vadd.f32 %v3499_v20, %v3483_v1  ;;  %v6007_v1 = vld [vmem:[#allocation25 + $0x20] sm:$0xff] }
 0x734   :  { %3702 = vmatpush.bf16.msrb.mxu3 %v6008_v0 }
 0x735   :  { %v6241_v16 = vpop.eup %6240  ;;  %v3492_v18 = vmul.f32 0.044715, %v3484_v10  ;;  %v3507_v17 = vmul.f32 0.7978846, %v3503_v33  ;;  %v3488_v50 = vmul.f32 0.5, %v3484_v10 }
 0x736   :  { %v3514_v23 = vadd.f32 1.0, %v6241_v16 }
 0x737   :  { %v3496_v25 = vmul.f32 %v3492_v18, %v3484_v10  ;;  %6242 = vtanh.f32 %v3507_v17 }
 0x738   :  { %v3518_v27 = vmul.f32 %v3514_v23, %v3486_v19  ;;  %3703 = vmatpush.bf16.msrb.mxu3 %v6007_v1  ;;  %v3611_v23 = vstv %s3610_s9  ;;  %v6029_v1 = vld [vmem:[#allocation22 + $0x40] sm:$0xff] }
 0x739   :  { %v3500_v30 = vmul.f32 %v3496_v25, %v3484_v10  ;;  %v3621_v25 = vstv %s3616_s21 }
 0x73a   :  { %v3828_v31 = vpop.f32.mrf.mxu1  ;;  %v3521_v34 = vpack.c.bf16 %v3518_v27, %v3517_v15 }
 0x73b   :  { %v3851_v35 = vsel %vm3847_vm8, %v3828_v31, -1e+30  ;;  %v3504_v37 = vadd.f32 %v3500_v30, %v3484_v10 }
 0x73c   :  { %3599 = vmatmul.bf16.vlgmr.msra.gmra.mxu2 %v3521_v34  ;;  %3855 = vmax.xlane.f32.xlu0 %v3851_v35  ;;  %v3622_v34 = vmul.f32 %v3621_v25, %v6851_v13  ;;  %v3624_v13 = vmul.f32 %v3621_v25, %v6857_v7  ;;  %v6031_v7 = vld [vmem:[#allocation22 + $0x50] sm:$0xff] }
 0x73d   :  { %v3508_v39 = vmul.f32 0.7978846, %v3504_v37  ;;  %v6243_v41 = vpop.eup %6242  ;;  %3704 = vmatpush.bf16.msrb.mxu3 %v6006_v2 }
 0x73e   :  { %v3515_v9 = vadd.f32 1.0, %v6243_v41 }
 0x73f   :  { %6244 = vtanh.f32 %v3508_v39 }
 0x740   :  { %v3519_v54 = vmul.f32 %v3515_v9, %v3487_v48 }
 0x741   :  { %3705 = vmatpush.bf16.msrb.mxu3 %v6005_v3 }
 0x742   :  { %v3830_v42 = vpop.f32.mrf.mxu1 }
 0x743   :  { %v3852_v43 = vsel %vm3848_vm9, %v3830_v42, -1e+30 }
 0x744   :  { %3857 = vmax.xlane.f32.xlu1 %v3852_v43 }
 0x745   :  { %v6245_v47 = vpop.eup %6244  ;;  %3706 = vmatpush.bf16.msrb.mxu3 %v6004_v11 }
 0x746   :  { %v3516_v53 = vadd.f32 1.0, %v6245_v47 }
 0x748   :  { %v3520_v55 = vmul.f32 %v3516_v53, %v3488_v50 }
 0x749   :  { %3707 = vmatpush.bf16.msrb.mxu3 %v6003_v4 }
 0x74a   :  { %v3833_v32 = vpop.f32.mrf.mxu1  ;;  %v3522_v58 = vpack.c.bf16 %v3520_v55, %v3519_v54 }
 0x74b   :  { %v3853_v59 = vsel %vm3849_vm10, %v3833_v32, -1e+30  ;;  %v6036_v32 = vld [vmem:[#allocation22 + $0x78] sm:$0xff] }
 0x74c   :  { %3859 = vmax.xlane.f32.xlu2 %v3853_v59  ;;  %3604 = vmatmul.bf16.gmra.mxu2 %v3522_v58  ;;  %v6035_v58 = vld [vmem:[#allocation22 + $0x70] sm:$0xff] }
 0x74d   :  { %4080 = vmatpush.bf16.msra.mxu3 %v6036_v32 }
 0x751   :  { %4081 = vmatpush.bf16.msra.mxu3 %v6035_v58 }
 0x752   :  { %v3835_v60 = vpop.f32.mrf.mxu1 }
 0x753   :  { %v3854_v62 = vsel %vm3850_vm11, %v3835_v60, -1e+30 }
 0x754   :  { %3861 = vmax.xlane.f32.xlu0 %v3854_v62 }
 0x7af   :  { %v6906_v5 = vpop.xlane.xlu0 %3855 }
 0x7b0   :  { %v3863_v26 = vsub.f32 %v3851_v35, %v6906_v5  ;;  %v3623_v35 = vmul.f32 %v3621_v25, %v6853_v14  ;;  %v3625_v14 = vmul.f32 %v3621_v25, %v6859_v21  ;;  %vm3883_vm12 = vcmp.gt.f32.partialorder %v6906_v5, -5e+29 }
 0x7b1   :  { %v3887_v0 = vsel %vm3883_vm12, 1.0, %v6599_v57 }
 0x7b2   :  { %v3867_v24 = vmul.f32 1.442695, %v3863_v26 }
 0x7b4   :  { %6246 = vpow2.f32 %v3867_v24 }
 0x7b7   :  { %v6909_v40 = vpop.xlane.xlu1 %3857 }
 0x7b8   :  { %v3864_v6 = vsub.f32 %v3852_v43, %v6909_v40  ;;  %vm3884_vm13 = vcmp.gt.f32.partialorder %v6909_v40, -5e+29 }
 0x7b9   :  { %v3888_v5 = vsel %vm3884_vm13, 1.0, %v6599_v57 }
 0x7ba   :  { %v6247_v20 = vpop.eup %6246  ;;  %v3869_v8 = vmul.f32 1.442695, %v3864_v6 }
 0x7bb   :  { %3875 = vadd.xlane.f32.xlu1 %v6247_v20 }
 0x7bc   :  { %6248 = vpow2.f32 %v3869_v8 }
 0x7bf   :  { %v3600_v10 = vpop.f32.mrf.mxu2  ;;  %v6912_v33 = vpop.xlane.xlu2 %3859 }
 0x7c0   :  { %v3865_v22 = vsub.f32 %v3853_v59, %v6912_v33  ;;  %v3601_v19 = vadd.f32 %v6170_v12, %v3600_v10  ;;  %v6034_v59 = vld [vmem:[#allocation22 + $0x68] sm:$0xff]  ;;  %vm3885_vm14 = vcmp.gt.f32.partialorder %v6912_v33, -5e+29 }
 0x7c1   :  { %4082 = vmatpush.bf16.msra.mxu3 %v6034_v59 }
 0x7c2   :  { %v6249_v16 = vpop.eup %6248  ;;  %v3871_v18 = vmul.f32 1.442695, %v3865_v22  ;;  %v3612_v27 = vmul.f32 %v3611_v23, %v3601_v19 }
 0x7c3   :  { %v3891_v49 = vpack.c.bf16 %v6249_v16, %v6247_v20  ;;  %3877 = vadd.xlane.f32.xlu2 %v6249_v16 }
 0x7c4   :  { %6250 = vpow2.f32 %v3871_v18  ;;  %v3626_v39 = vadd.f32 %v3622_v34, %v3612_v27  ;;  %v3889_v27 = vsel %vm3885_vm14, 1.0, %v6599_v57 }
 0x7c5   :  { %3949 = vmatmul.bf16.vlgmr.msrb.gmra.mxu2 %v3891_v49  ;;  %4083 = vmatpush.bf16.msra.mxu3 %v6033_v29 }
 0x7c7   :  { %v3602_v17 = vpop.f32.mrf.mxu2  ;;  %v6918_v15 = vpop.xlane.xlu0 %3861 }
 0x7c8   :  { %v3603_v28 = vadd.f32 %v6170_v12, %v3602_v17  ;;  %v3866_v30 = vsub.f32 %v3854_v62, %v6918_v15  ;;  %v6032_v62 = vld [vmem:[#allocation22 + $0x58] sm:$0xff]  ;;  %vm3886_vm15 = vcmp.gt.f32.partialorder %v6918_v15, -5e+29  ;;  %v6042_v15 = vld [vmem:[#allocation25 + $0x68] sm:$0xff] }
 0x7c9   :  { %4084 = vmatpush.bf16.msra.mxu3 %v6032_v62 }
 0x7ca   :  { %v6251_v31 = vpop.eup %6250  ;;  %v3613_v37 = vmul.f32 %v3611_v23, %v3603_v28  ;;  %v3873_v38 = vmul.f32 1.442695, %v3866_v30 }
 0x7cb   :  { %3879 = vadd.xlane.f32.xlu0 %v6251_v31 }
 0x7cc   :  { %v3627_v36 = vadd.f32 %v3623_v35, %v3613_v37  ;;  %6252 = vpow2.f32 %v3873_v38  ;;  %v6044_v37 = vld [vmem:[#allocation25 + $0x78] sm:$0xff] }
 0x7cd   :  { %4085 = vmatpush.bf16.msra.mxu3 %v6031_v7  ;;  %4191 = vmatpush.bf16.msra.mxu0 %v6044_v37 }
 0x7ce   :  { %v3630_v41 = vpack.c.bf16 %v3627_v36, %v3626_v39  ;;  %6137 = vmatpush.bf16.msra.mxu2 %v6044_v37 }
 0x7cf   :  { %v3605_v42 = vpop.f32.mrf.mxu2 }
 0x7d0   :  { %3708 = vmatmul.bf16.vlgmr.msrb.gmra.mxu3 %v3630_v41  ;;  %v3606_v9 = vadd.f32 %v6170_v12, %v3605_v42  ;;  %v6043_v42 = vld [vmem:[#allocation25 + $0x70] sm:$0xff] }
 0x7d1   :  { %4086 = vmatpush.bf16.msra.mxu3 %v6030_v63  ;;  %4192 = vmatpush.bf16.msra.mxu0 %v6043_v42 }
 0x7d2   :  { %v6253_v43 = vpop.eup %6252  ;;  %v3614_v48 = vmul.f32 %v3611_v23, %v3606_v9  ;;  %6138 = vmatpush.bf16.msra.mxu2 %v6043_v42 }
 0x7d3   :  { %3881 = vadd.xlane.f32.xlu1 %v6253_v43  ;;  %v3892_v44 = vpack.c.bf16 %v6253_v43, %v6251_v31 }
 0x7d4   :  { %v3628_v54 = vadd.f32 %v3624_v13, %v3614_v48 }
 0x7d5   :  { %3954 = vmatmul.bf16.gmra.mxu2 %v3892_v44  ;;  %4087 = vmatpush.bf16.msra.mxu3 %v6029_v1  ;;  %v3890_v44 = vsel %vm3886_vm15, 1.0, %v6599_v57  ;;  %v6041_v57 = vld [vmem:[#allocation25 + $0x60] sm:$0xff] }
 0x7d6   :  { %4193 = vmatpush.bf16.msra.mxu0 %v6042_v15  ;;  %6139 = vmatpush.bf16.msra.mxu2 %v6042_v15 }
 0x7d7   :  { %v3607_v47 = vpop.f32.mrf.mxu2 }
 0x7d8   :  { %v3608_v50 = vadd.f32 %v6170_v12, %v3607_v47  ;;  %v6932_v12 = vld [vmem:[%s6973_s15] ss:$0 sm:$0xff] }
 0x7da   :  { %v3615_v53 = vmul.f32 %v3611_v23, %v3608_v50  ;;  %4194 = vmatpush.bf16.msra.mxu0 %v6041_v57  ;;  %6140 = vmatpush.bf16.msra.mxu2 %v6041_v57 }
 0x7dc   :  { %v3629_v55 = vadd.f32 %v3625_v14, %v3615_v53 }
 0x7de   :  { %v3631_v56 = vpack.c.bf16 %v3629_v55, %v3628_v54 }
 0x7e0   :  { %3713 = vmatmul.bf16.gmra.mxu3 %v3631_v56 }
 0x82e   :  { %v3876_v60 = vpop.xlane.xlu1 %3875 }
 0x82f   :  { %6254 = vrcp.f32 %v3876_v60 }
 0x835   :  { %v6255_v61 = vpop.eup %6254 }
 0x836   :  { %v3878_v21 = vpop.xlane.xlu2 %3877  ;;  %v3964_v2 = vmul.f32 %v6255_v61, %v3887_v0 }
 0x837   :  { %6256 = vrcp.f32 %v3878_v21 }
 0x83d   :  { %v6257_v24 = vpop.eup %6256 }
 0x83e   :  { %v3880_v4 = vpop.xlane.xlu0 %3879  ;;  %v3965_v8 = vmul.f32 %v6257_v24, %v3888_v5 }
 0x83f   :  { %6258 = vrcp.f32 %v3880_v4 }
 0x845   :  { %v6259_v19 = vpop.eup %6258 }
 0x846   :  { %v3882_v40 = vpop.xlane.xlu1 %3881  ;;  %v3966_v30 = vmul.f32 %v6259_v19, %v3889_v27 }
 0x847   :  { %6260 = vrcp.f32 %v3882_v40  ;;  %v6038_v40 = vld [vmem:[#allocation25 + $0x48] sm:$0xff] }
 0x848   :  { %v3950_v3 = vpop.f32.mrf.mxu2 }
 0x849   :  { %v3968_v11 = vmul.f32 %v3964_v2, %v3950_v3 }
 0x84b   :  { %v3976_v26 = vmul.f32 0.044715, %v3968_v11  ;;  %v3972_v32 = vmul.f32 0.5, %v3968_v11 }
 0x84d   :  { %v3980_v6 = vmul.f32 %v3976_v26, %v3968_v11  ;;  %v6261_v36 = vpop.eup %6260 }
 0x84e   :  { %v3967_v47 = vmul.f32 %v6261_v36, %v3890_v44 }
 0x84f   :  { %v3984_v20 = vmul.f32 %v3980_v6, %v3968_v11 }
 0x850   :  { %v3952_v10 = vpop.f32.mrf.mxu2 }
 0x851   :  { %v3988_v22 = vadd.f32 %v3984_v20, %v3968_v11  ;;  %v3969_v16 = vmul.f32 %v3965_v8, %v3952_v10 }
 0x853   :  { %v3977_v18 = vmul.f32 0.044715, %v3969_v16  ;;  %v3709_v49 = vpop.f32.mrf.mxu3  ;;  %v3992_v25 = vmul.f32 0.7978846, %v3988_v22  ;;  %v3973_v58 = vmul.f32 0.5, %v3969_v16  ;;  %v6040_v22 = vld [vmem:[#allocation25 + $0x58] sm:$0xff] }
 0x854   :  { %v3710_v23 = vadd.f32 %v6932_v12, %v3709_v49  ;;  %4195 = vmatpush.bf16.msra.mxu0 %v6040_v22  ;;  %6141 = vmatpush.bf16.msra.mxu2 %v6040_v22  ;;  %v6172_v49 = vld [vmem:[%s6970_s12 + $0x1] ss:$0 sm:$0xff] }
 0x855   :  { %v3981_v17 = vmul.f32 %v3977_v18, %v3969_v16  ;;  %6262 = vtanh.f32 %v3992_v25  ;;  %v4110_v25 = vstv %s4105_s0 }
 0x856   :  { %3719 = vst [vmem:[#allocation27] sm:$0xff] %v3710_v23  ;;  %v4100_v23 = vstv %s5651_s27  ;;  %v4114_v44 = vmul.f32 %v4110_v25, %v6874_v52 }
 0x857   :  { %v3985_v28 = vmul.f32 %v3981_v17, %v3969_v16 }
 0x858   :  { %v3955_v31 = vpop.f32.mrf.mxu2 }
 0x859   :  { %v3989_v34 = vadd.f32 %v3985_v28, %v3969_v16  ;;  %v3970_v35 = vmul.f32 %v3966_v30, %v3955_v31  ;;  %v6039_v16 = vld [vmem:[#allocation25 + $0x50] sm:$0xff]  ;;  %v4111_v30 = vmul.f32 %v4110_v25, %v6866_v45  ;;  %v4112_v31 = vmul.f32 %v4110_v25, %v6868_v46  ;;  %v6173_v46 = vld [vmem:[%s6973_s15 + $0x1] ss:$0 sm:$0xff] }
 0x85a   :  { %4196 = vmatpush.bf16.msra.mxu0 %v6039_v16  ;;  %6142 = vmatpush.bf16.msra.mxu2 %v6039_v16 }
 0x85b   :  { %v3993_v33 = vmul.f32 0.7978846, %v3989_v34  ;;  %v3978_v38 = vmul.f32 0.044715, %v3970_v35  ;;  %v3711_v39 = vpop.f32.mrf.mxu3  ;;  %v6263_v9 = vpop.eup %6262  ;;  %v3974_v24 = vmul.f32 0.5, %v3970_v35 }
 0x85c   :  { %v3712_v41 = vadd.f32 %v6932_v12, %v3711_v39  ;;  %v4000_v53 = vadd.f32 1.0, %v6263_v9 }
 0x85d   :  { %6264 = vtanh.f32 %v3993_v33  ;;  %v3982_v43 = vmul.f32 %v3978_v38, %v3970_v35 }
 0x85e   :  { %3720 = vst [vmem:[#allocation27 + $0x8] sm:$0xff] %v3712_v41  ;;  %v4004_v7 = vmul.f32 %v4000_v53, %v3972_v32  ;;  %4197 = vmatpush.bf16.msra.mxu0 %v6038_v40  ;;  %6143 = vmatpush.bf16.msra.mxu2 %v6038_v40 }
 0x85f   :  { %v3986_v48 = vmul.f32 %v3982_v43, %v3970_v35  ;;  %v4113_v43 = vmul.f32 %v4110_v25, %v6872_v51 }
 0x860   :  { %v3957_v50 = vpop.f32.mrf.mxu2 }
 0x861   :  { %v3971_v13 = vmul.f32 %v3967_v47, %v3957_v50  ;;  %v3990_v14 = vadd.f32 %v3986_v48, %v3970_v35 }
 0x863   :  { %v6265_v54 = vpop.eup %6264  ;;  %v3979_v55 = vmul.f32 0.044715, %v3971_v13  ;;  %v3714_v56 = vpop.f32.mrf.mxu3  ;;  %v3994_v62 = vmul.f32 0.7978846, %v3990_v14  ;;  %v3975_v6 = vmul.f32 0.5, %v3971_v13 }
 0x864   :  { %v4001_v59 = vadd.f32 1.0, %v6265_v54  ;;  %v3715_v29 = vadd.f32 %v6932_v12, %v3714_v56 }
 0x865   :  { %v3983_v60 = vmul.f32 %v3979_v55, %v3971_v13  ;;  %6266 = vtanh.f32 %v3994_v62 }
 0x866   :  { %3721 = vst [vmem:[#allocation27 + $0x10] sm:$0xff] %v3715_v29  ;;  %v4005_v21 = vmul.f32 %v4001_v59, %v3973_v58 }
 0x867   :  { %v3987_v61 = vmul.f32 %v3983_v60, %v3971_v13 }
 0x868   :  { %v4008_v63 = vpack.c.bf16 %v4005_v21, %v4004_v7 }
 0x869   :  { %v3991_v0 = vadd.f32 %v3987_v61, %v3971_v13 }
 0x86a   :  { %4088 = vmatmul.bf16.vlgmr.msra.gmra.mxu3 %v4008_v63 }
 0x86b   :  { %v3716_v1 = vpop.f32.mrf.mxu3  ;;  %v3995_v2 = vmul.f32 0.7978846, %v3991_v0  ;;  %v6267_v11 = vpop.eup %6266 }
 0x86c   :  { %v3717_v3 = vadd.f32 %v6932_v12, %v3716_v1  ;;  %v4002_v4 = vadd.f32 1.0, %v6267_v11  ;;  %v6037_v12 = vld [vmem:[#allocation25 + $0x40] sm:$0xff] }
 0x86d   :  { %6268 = vtanh.f32 %v3995_v2  ;;  %4198 = vmatpush.bf16.msra.mxu0 %v6037_v12  ;;  %6144 = vmatpush.bf16.msra.mxu2 %v6037_v12 }
 0x86e   :  { %3722 = vst [vmem:[#allocation27 + $0x18] sm:$0xff] %v3717_v3  ;;  %v4006_v20 = vmul.f32 %v4002_v4, %v3974_v24 }
 0x873   :  { %v6269_v26 = vpop.eup %6268 }
 0x874   :  { %v4003_v5 = vadd.f32 1.0, %v6269_v26 }
 0x876   :  { %v4007_v8 = vmul.f32 %v4003_v5, %v3975_v6 }
 0x878   :  { %v4009_v10 = vpack.c.bf16 %v4007_v8, %v4006_v20 }
 0x87a   :  { %4093 = vmatmul.bf16.gmra.mxu3 %v4009_v10 }
 0x8ed   :  { %v4089_v18 = vpop.f32.mrf.mxu3 }
 0x8ee   :  { %v4090_v19 = vadd.f32 %v6172_v49, %v4089_v18 }
 0x8f0   :  { %v4101_v27 = vmul.f32 %v4100_v23, %v4090_v19 }
 0x8f2   :  { %v4115_v35 = vadd.f32 %v4111_v30, %v4101_v27 }
 0x8f5   :  { %v4091_v17 = vpop.f32.mrf.mxu3 }
 0x8f6   :  { %v4092_v28 = vadd.f32 %v6172_v49, %v4091_v17 }
 0x8f8   :  { %v4102_v34 = vmul.f32 %v4100_v23, %v4092_v28 }
 0x8fa   :  { %v4116_v37 = vadd.f32 %v4112_v31, %v4102_v34 }
 0x8fc   :  { %v4119_v33 = vpack.c.bf16 %v4116_v37, %v4115_v35 }
 0x8fd   :  { %v4094_v38 = vpop.f32.mrf.mxu3 }
 0x8fe   :  { %4199 = vmatmul.bf16.vlgmr.msra.gmra.mxu0 %v4119_v33  ;;  %v4095_v39 = vadd.f32 %v6172_v49, %v4094_v38 }
 0x900   :  { %v4103_v41 = vmul.f32 %v4100_v23, %v4095_v39 }
 0x902   :  { %v4117_v47 = vadd.f32 %v4113_v43, %v4103_v41 }
 0x905   :  { %v4096_v36 = vpop.f32.mrf.mxu3 }
 0x906   :  { %v4097_v42 = vadd.f32 %v6172_v49, %v4096_v36 }
 0x908   :  { %v4104_v9 = vmul.f32 %v4100_v23, %v4097_v42 }
 0x90a   :  { %v4118_v48 = vadd.f32 %v4114_v44, %v4104_v9 }
 0x90c   :  { %v4120_v45 = vpack.c.bf16 %v4118_v48, %v4117_v47 }
 0x90e   :  { %4204 = vmatmul.bf16.vlgmr.msra.gmra.mxu2 %v4120_v45 }
 0x97b   :  { %v4200_v50 = vpop.f32.mrf.mxu0 }
 0x97c   :  { %v4201_v15 = vadd.f32 %v6173_v46, %v4200_v50 }
 0x97e   :  { %4210 = vst [vmem:[#allocation27 + $0x20] sm:$0xff] %v4201_v15 }
 0x983   :  { %v4202_v13 = vpop.f32.mrf.mxu0 }
 0x984   :  { %v4203_v14 = vadd.f32 %v6173_v46, %v4202_v13 }
 0x986   :  { %4211 = vst [vmem:[#allocation27 + $0x28] sm:$0xff] %v4203_v14 }
 0x991   :  { %v4205_v53 = vpop.f32.mrf.mxu2 }
 0x992   :  { %v4206_v54 = vadd.f32 %v6173_v46, %v4205_v53 }
 0x994   :  { %4212 = vst [vmem:[#allocation27 + $0x30] sm:$0xff] %v4206_v54 }
 0x999   :  { %v4207_v51 = vpop.f32.mrf.mxu2 }
 0x99a   :  { %v4208_v52 = vadd.f32 %v6173_v46, %v4207_v51 }
 0x99c   :  { %4213 = vst [vmem:[#allocation27 + $0x38] sm:$0xff] %v4208_v52 }
 0x99d   :  { %4226 = dma.vmem_to_hbm [thread:$0]  %s4219_s8, 1024, %s4221_s1, [#allocation8], %s6579_s29, %s6579_s29, %s6580_s30  }
 0x99e   :  { %6576 = dma.done.wait [#allocation8], 1024  }
 0x99f   :  { %6577 = vsyncadd [#allocation8], 4294966272 }
 0x9a0   :  { %4231 = vsyncpa [#allocation7], 1 }
 0x9a1   :  { %4232 = vsyncpa [#allocation11], 1 }
 0x9a2   :  { %4233 = vsyncpa [#allocation14], 1 }
 0x9a3   :  { %4234 = vsyncpa [#allocation17], 1 }
 0x9a4   :  { %4235 = vsyncpa [#allocation21], 1 }
 0x9a5   :  { %4236 = vsyncpa [#allocation26], 1 }
 0x9a6   :  { %4237 = vsyncpa [#allocation8], 1 }
 0x9a7   :  { %4238 = vsyncpa [#allocation9], 1 }
 0x9a8   :  { %4239 = vsyncpa [#allocation24], 1 }

</bundles_post_ra>
